<compile_context>
chip_gen: v7x
topology: tpu7x:2x2x1
jax: 0.10.0
libtpu: 0.0.40
codegen_flags: <defaults>
</compile_context>

<pallas_src>
import functools

import jax
import jax.numpy as jnp
from jax import lax
from jax.experimental import pallas as pl
from jax.experimental.pallas import tpu as pltpu

EPS = 1e-5
LANE = 128
VMEM_LIMIT = 32 * 1024 * 1024   # safe on v5e/v6e (128 MiB phys) and v7x (64 MiB phys)


def _round_up(x, m):
    return (x + m - 1) // m * m


def _pick_row_tile(m):
    # Largest row tile (multiple of 8) dividing M that still gives >= 2 tiles.
    for t in (2048, 1024, 512, 256, 128, 64, 32, 16, 8):
        if m % t == 0 and m // t >= 2:
            return t
    return m


def _write_moments(mom_ref, y):
    # Per-tile partial BN moments from the f32 pre-downcast values; single store.
    mom_ref[0] = jnp.concatenate(
        [jnp.sum(y, axis=0, keepdims=True),
         jnp.sum(y * y, axis=0, keepdims=True)], axis=0)


# ----------------------------- Pallas kernels --------------------------------


def stage1_kernel(x_ref, w_ref, y_ref, mom_ref):
    # 1x1 conv as a matmul (bf16 in, f32 acc); emit bf16 output + f32 BN moments.
    y = jnp.dot(x_ref[...], w_ref[...], preferred_element_type=jnp.float32)
    _write_moments(mom_ref, y)
    y_ref[...] = y.astype(y_ref.dtype)


def stage2_kernel(y1_ref, s1_ref, b1_ref, w2_ref, y2_ref, mom_ref, pad_ref,
                  *, d, H, W):
    Pc = s1_ref.shape[-1]
    bf16 = jnp.bfloat16
    # Fused BN1 (folded scale/bias) + ReLU of the stage-1 output, f32 math,
    # downcast to bf16 for the halo / MXU operand.
    h = jnp.maximum(y1_ref[0].astype(jnp.float32) * s1_ref[...] + b1_ref[...],
                    0.0).astype(bf16)                                  # (H, W, Pc)
    # Zero only the border frame of the halo (interior fully overwritten by h).
    pad_ref[0:d, :, :] = jnp.zeros((d, W + 2 * d, Pc), bf16)
    pad_ref[H + d:H + 2 * d, :, :] = jnp.zeros((d, W + 2 * d, Pc), bf16)
    pad_ref[d:H + d, 0:d, :] = jnp.zeros((H, d, Pc), bf16)
    pad_ref[d:H + d, W + d:W + 2 * d, :] = jnp.zeros((H, d, Pc), bf16)
    pad_ref[d:H + d, d:W + d, :] = h
    # 9 dilated taps, each a K=Pc MXU dot, accumulated in f32 (no concat buffer).
    acc = None
    for k in range(9):
        ky, kx = k // 3, k % 3
        tap = pad_ref[ky * d:ky * d + H, kx * d:kx * d + W, :].reshape(H * W, Pc)
        part = jnp.dot(tap, w2_ref[k], preferred_element_type=jnp.float32)
        acc = part if acc is None else acc + part
    _write_moments(mom_ref, acc)
    y2_ref[0] = acc.astype(y2_ref.dtype)


def stage3a_kernel(y2_ref, s2_ref, b2_ref, w3_ref, y3_ref, mom_ref):
    # Fused BN2 + ReLU of stage-2 output, 1x1 conv matmul, bf16 out + f32 moments.
    h = jnp.maximum(y2_ref[...].astype(jnp.float32) * s2_ref[...] + b2_ref[...],
                    0.0)
    y = jnp.dot(h.astype(jnp.bfloat16), w3_ref[...],
                preferred_element_type=jnp.float32)
    _write_moments(mom_ref, y)
    y3_ref[...] = y.astype(y3_ref.dtype)


def stage3b_kernel(y3_ref, s3_ref, b3_ref, res_ref, o_ref):
    # BN3 + residual add + ReLU, residual streamed tile-wise in f32.
    o_ref[...] = jnp.maximum(
        y3_ref[...].astype(jnp.float32) * s3_ref[...] + b3_ref[...] + res_ref[...],
        0.0)


# ----------------------------- BN fold glue (tiny, per-channel) ---------------


def _fold_bn(mom, gamma, beta, count):
    s = jnp.sum(mom[:, 0, :], axis=0)
    ss = jnp.sum(mom[:, 1, :], axis=0)
    mean = s / count
    var = jnp.maximum(ss / count - mean * mean, 0.0)   # biased var (torch train mode)
    scale = gamma * lax.rsqrt(var + EPS)
    bias = beta - mean * scale
    return scale.reshape(1, -1), bias.reshape(1, -1)


# ----------------------------- wrapper ----------------------------------------


def bottleneck_forward(x_nchw, params, dilation=1):
    N, Cin, H, W = x_nchw.shape
    P = params["w1"].shape[1]
    assert Cin == 4 * P, "downsample=None requires inplanes == planes * expansion"
    assert W % 8 == 0, "in-kernel spatial flatten assumes W % 8 == 0"
    d = int(dilation)
    assert d >= 1
    M = N * H * W

    Pc = _round_up(P, LANE)
    Cc = _round_up(Cin, LANE)
    f32, bf16 = jnp.float32, jnp.bfloat16

    # lane-padded bf16 conv weights (padded rows/cols are zero => padded channels
    # stay exactly zero through BN/ReLU and are sliced off at the end)
    w1 = jnp.zeros((Cc, Pc), bf16).at[:Cin, :P].set(params["w1"].astype(bf16))
    w2 = (jnp.zeros((3, 3, Pc, Pc), bf16)
          .at[:, :, :P, :P].set(params["w2"].astype(bf16))
          .reshape(9, Pc, Pc))                        # tap-major (k = ky*3 + kx)
    w3 = jnp.zeros((Pc, Cc), bf16).at[:P, :Cin].set(params["w3"].astype(bf16))
    g1 = jnp.ones((Pc,), f32).at[:P].set(params["g1"])
    b1 = jnp.zeros((Pc,), f32).at[:P].set(params["b1"])
    g2 = jnp.ones((Pc,), f32).at[:P].set(params["g2"])
    b2 = jnp.zeros((Pc,), f32).at[:P].set(params["b2"])
    g3 = jnp.ones((Cc,), f32).at[:Cin].set(params["g3"])
    b3 = jnp.zeros((Cc,), f32).at[:Cin].set(params["b3"])

    # NCHW -> NHWC, flatten spatial, lane-pad channels.
    # f32 copy = residual stream (exact); bf16 copy = stage-1 feed (mem-bound).
    x = jnp.transpose(x_nchw, (0, 2, 3, 1)).astype(f32).reshape(M, Cin)
    xp = jnp.zeros((M, Cc), f32).at[:, :Cin].set(x)
    xp_bf = xp.astype(bf16)

    tm = _pick_row_tile(M)
    G = M // tm
    cp = pltpu.CompilerParams(dimension_semantics=("parallel",),
                              vmem_limit_bytes=VMEM_LIMIT)

    # ---- stage 1: 1x1 conv matmul + BN moments (row-tiled grid) ----
    y1, mom1 = pl.pallas_call(
        stage1_kernel,
        grid=(G,),
        in_specs=[pl.BlockSpec((tm, Cc), lambda i: (i, 0)),
                  pl.BlockSpec((Cc, Pc), lambda i: (0, 0))],
        out_specs=[pl.BlockSpec((tm, Pc), lambda i: (i, 0)),
                   pl.BlockSpec((1, 2, Pc), lambda i: (i, 0, 0))],
        out_shape=[jax.ShapeDtypeStruct((M, Pc), bf16),
                   jax.ShapeDtypeStruct((G, 2, Pc), f32)],
        compiler_params=cp,
        cost_estimate=pl.CostEstimate(
            flops=2 * M * Cc * Pc, transcendentals=0,
            bytes_accessed=2 * M * (Cc + Pc) + 2 * Cc * Pc),
    )(xp_bf, w1)
    s1, t1 = _fold_bn(mom1, g1, b1, M)

    # ---- stage 2: fused BN1+ReLU, bf16 halo, 9 accumulated K=Pc MXU dots ----
    y2, mom2 = pl.pallas_call(
        functools.partial(stage2_kernel, d=d, H=H, W=W),
        grid=(N,),
        in_specs=[pl.BlockSpec((1, H, W, Pc), lambda n: (n, 0, 0, 0)),
                  pl.BlockSpec((1, Pc), lambda n: (0, 0)),
                  pl.BlockSpec((1, Pc), lambda n: (0, 0)),
                  pl.BlockSpec((9, Pc, Pc), lambda n: (0, 0, 0))],
        out_specs=[pl.BlockSpec((1, H * W, Pc), lambda n: (n, 0, 0)),
                   pl.BlockSpec((1, 2, Pc), lambda n: (n, 0, 0))],
        out_shape=[jax.ShapeDtypeStruct((N, H * W, Pc), bf16),
                   jax.ShapeDtypeStruct((N, 2, Pc), f32)],
        scratch_shapes=[pltpu.VMEM((H + 2 * d, W + 2 * d, Pc), bf16)],
        compiler_params=cp,
        cost_estimate=pl.CostEstimate(
            flops=2 * M * 9 * Pc * Pc, transcendentals=0,
            bytes_accessed=4 * M * Pc + 18 * Pc * Pc),
    )(y1.reshape(N, H, W, Pc), s1, t1, w2)
    s2, t2 = _fold_bn(mom2, g2, b2, M)

    # ---- stage 3a: fused BN2+ReLU + 1x1 conv matmul + BN moments ----
    y3, mom3 = pl.pallas_call(
        stage3a_kernel,
        grid=(G,),
        in_specs=[pl.BlockSpec((tm, Pc), lambda i: (i, 0)),
                  pl.BlockSpec((1, Pc), lambda i: (0, 0)),
                  pl.BlockSpec((1, Pc), lambda i: (0, 0)),
                  pl.BlockSpec((Pc, Cc), lambda i: (0, 0))],
        out_specs=[pl.BlockSpec((tm, Cc), lambda i: (i, 0)),
                   pl.BlockSpec((1, 2, Cc), lambda i: (i, 0, 0))],
        out_shape=[jax.ShapeDtypeStruct((M, Cc), bf16),
                   jax.ShapeDtypeStruct((G, 2, Cc), f32)],
        compiler_params=cp,
        cost_estimate=pl.CostEstimate(
            flops=2 * M * Pc * Cc, transcendentals=0,
            bytes_accessed=2 * M * (Pc + Cc) + 2 * Pc * Cc),
    )(y2.reshape(M, Pc), s2, t2, w3)
    s3, t3 = _fold_bn(mom3, g3, b3, M)

    # ---- stage 3b: BN3 + residual add + ReLU (residual streamed tile-wise) ----
    out = pl.pallas_call(
        stage3b_kernel,
        grid=(G,),
        in_specs=[pl.BlockSpec((tm, Cc), lambda i: (i, 0)),
                  pl.BlockSpec((1, Cc), lambda i: (0, 0)),
                  pl.BlockSpec((1, Cc), lambda i: (0, 0)),
                  pl.BlockSpec((tm, Cc), lambda i: (i, 0))],
        out_specs=pl.BlockSpec((tm, Cc), lambda i: (i, 0)),
        out_shape=jax.ShapeDtypeStruct((M, Cc), f32),
        compiler_params=cp,
        cost_estimate=pl.CostEstimate(flops=4 * M * Cc, transcendentals=0,
                                      bytes_accessed=10 * M * Cc),
    )(y3, s3, t3, xp)

    # back to NCHW, drop lane padding
    return jnp.transpose(out.reshape(N, H, W, Cc)[..., :Cin], (0, 3, 1, 2))


# ----------------------------- pure-JAX reference -----------------------------


def reference_forward(x_nchw, params, dilation=1):
    x = jnp.transpose(x_nchw, (0, 2, 3, 1)).astype(jnp.float32)
    d = dilation

    def bn(y, g, b):
        mean = jnp.mean(y, axis=(0, 1, 2), keepdims=True)
        var = jnp.mean((y - mean) ** 2, axis=(0, 1, 2), keepdims=True)
        return (y - mean) * lax.rsqrt(var + EPS) * g + b

    dn = ("NHWC", "HWIO", "NHWC")
    out = lax.conv_general_dilated(x, params["w1"][None, None], (1, 1), "VALID",
                                   dimension_numbers=dn)
    out = jnp.maximum(bn(out, params["g1"], params["b1"]), 0.0)
    out = lax.conv_general_dilated(out, params["w2"], (1, 1), [(d, d), (d, d)],
                                   rhs_dilation=(d, d), dimension_numbers=dn)
    out = jnp.maximum(bn(out, params["g2"], params["b2"]), 0.0)
    out = lax.conv_general_dilated(out, params["w3"][None, None], (1, 1), "VALID",
                                   dimension_numbers=dn)
    out = bn(out, params["g3"], params["b3"]) + x
    return jnp.transpose(jnp.maximum(out, 0.0), (0, 3, 1, 2))


# ----------------------------- deterministic params ---------------------------


def init_params(key, inplanes, planes):
    ks = jax.random.split(key, 9)
    p4 = planes * 4
    return {
        "w1": 0.1 * jax.random.normal(ks[0], (inplanes, planes), jnp.float32),
        "w2": 0.1 * jax.random.normal(ks[1], (3, 3, planes, planes), jnp.float32),
        "w3": 0.1 * jax.random.normal(ks[2], (planes, p4), jnp.float32),
        "g1": 1.0 + 0.1 * jax.random.normal(ks[3], (planes,), jnp.float32),
        "b1": 0.1 * jax.random.normal(ks[4], (planes,), jnp.float32),
        "g2": 1.0 + 0.1 * jax.random.normal(ks[5], (planes,), jnp.float32),
        "b2": 0.1 * jax.random.normal(ks[6], (planes,), jnp.float32),
        "g3": 1.0 + 0.1 * jax.random.normal(ks[7], (p4,), jnp.float32),
        "b3": 0.1 * jax.random.normal(ks[8], (p4,), jnp.float32),
    }


if __name__ == "__main__":
    key = jax.random.PRNGKey(0)
    kx, kp = jax.random.split(key)

    N, planes, H, W = 2, 4, 8, 16
    inplanes = planes * 4          # identity residual requires inplanes == 4*planes
    dilation = 1

    x = jax.random.normal(kx, (N, inplanes, H, W), jnp.float32)   # NCHW like PyTorch
    params = init_params(kp, inplanes, planes)

    fwd = jax.jit(functools.partial(bottleneck_forward, dilation=dilation))
    out = jax.block_until_ready(fwd(x, params))

    ref = reference_forward(x, params, dilation=dilation)
    assert out.shape == (N, inplanes, H, W)
    max_err = float(jnp.max(jnp.abs(out - ref)))
    # bf16 MXU operands + bf16 inter-stage activations (f32 accumulation & BN
    # statistics) => modest tolerance vs the f32 reference
    assert jnp.allclose(out, ref, atol=7e-2, rtol=5e-2), f"max abs err = {max_err}"

    print("KERNEL_OK")
</pallas_src>

<mosaic_0001>
module attributes {stable_mosaic.version = 11 : i64} {
  func.func @stage1_kernel(%arg0: i32, %arg1: memref<128x128xbf16, #tpu.memory_space<vmem>>, %arg2: memref<128x128xbf16, #tpu.memory_space<vmem>>, %arg3: memref<128x128xbf16, #tpu.memory_space<vmem>>, %arg4: memref<1x2x128xf32, #tpu.memory_space<vmem>>) attributes {dimension_semantics = [#tpu.dimension_semantics<parallel>], iteration_bounds = array<i64: 2>, scalar_prefetch = 0 : i64, scratch_operands = 0 : i64, tpu.core_type = #tpu.core_type<tc>, window_params = [{transform_indices = @transform_0, window_bounds = array<i64: 128, 128>}, {pipeline_mode = #tpu.pipeline_mode<synchronous>, transform_indices = @transform_1, window_bounds = array<i64: 128, 128>}, {transform_indices = @transform_2, window_bounds = array<i64: 128, 128>}, {transform_indices = @transform_3, window_bounds = array<i64: 1, 2, 128>}]} {
    %c0 = arith.constant 0 : index
    %c0_0 = arith.constant 0 : index
    %0 = vector.load %arg1[%c0, %c0_0] : memref<128x128xbf16, #tpu.memory_space<vmem>>, vector<128x128xbf16>
    %c0_1 = arith.constant 0 : index
    %c0_2 = arith.constant 0 : index
    %1 = vector.load %arg2[%c0_1, %c0_2] : memref<128x128xbf16, #tpu.memory_space<vmem>>, vector<128x128xbf16>
    %cst = arith.constant dense<0.000000e+00> : vector<128x128xf32>
    %2 = tpu.matmul %0, %1, %cst {dimension_numbers = #tpu.dot_dimension_numbers<[1], [0], [0], [1], [0, 0, 1, 1], [], []>} : vector<128x128xbf16>, vector<128x128xbf16>, vector<128x128xf32> -> vector<128x128xf32>
    %cst_3 = arith.constant dense<0.000000e+00> : vector<128xf32>
    %3 = vector.multi_reduction <add>, %2, %cst_3 [0] : vector<128x128xf32> to vector<128xf32>
    %4 = vector.shape_cast %3 : vector<128xf32> to vector<1x128xf32>
    %5 = arith.mulf %2, %2 : vector<128x128xf32>
    %cst_4 = arith.constant dense<0.000000e+00> : vector<128xf32>
    %6 = vector.multi_reduction <add>, %5, %cst_4 [0] : vector<128x128xf32> to vector<128xf32>
    %7 = vector.shape_cast %6 : vector<128xf32> to vector<1x128xf32>
    %8 = tpu.concatenate %4, %7 in 0 : vector<1x128xf32>, vector<1x128xf32> -> vector<2x128xf32>
    %c0_5 = arith.constant 0 : index
    %c0_6 = arith.constant 0 : index
    %c0_7 = arith.constant 0 : index
    %9 = vector.load %arg4[%c0_5, %c0_6, %c0_7] : memref<1x2x128xf32, #tpu.memory_space<vmem>>, vector<1x2x128xf32>
    %10 = vector.shape_cast %9 : vector<1x2x128xf32> to vector<2x128xf32>
    %11 = vector.shape_cast %8 : vector<2x128xf32> to vector<1x2x128xf32>
    tpu.vector_store %arg4[%c0_5, %c0_6, %c0_7], %11 {strides = array<i32>} : memref<1x2x128xf32, #tpu.memory_space<vmem>>, vector<1x2x128xf32>,
    %12 = arith.truncf %2 : vector<128x128xf32> to vector<128x128xbf16>
    %c0_8 = arith.constant 0 : index
    %c0_9 = arith.constant 0 : index
    %13 = vector.load %arg3[%c0_8, %c0_9] : memref<128x128xbf16, #tpu.memory_space<vmem>>, vector<128x128xbf16>
    tpu.vector_store %arg3[%c0_8, %c0_9], %12 {strides = array<i32>} : memref<128x128xbf16, #tpu.memory_space<vmem>>, vector<128x128xbf16>,
    return
  }
  func.func @transform_0(%arg0: i32) -> (i32, i32) {
    %c0_i32 = arith.constant 0 : i32
    %c0_i32_0 = arith.constant 0 : i32
    return %arg0, %c0_i32 : i32, i32
  }
  func.func @transform_1(%arg0: i32) -> (i32, i32) {
    %c0_i32 = arith.constant 0 : i32
    %c0_i32_0 = arith.constant 0 : i32
    %c0_i32_1 = arith.constant 0 : i32
    return %c0_i32, %c0_i32_0 : i32, i32
  }
  func.func @transform_2(%arg0: i32) -> (i32, i32) {
    %c0_i32 = arith.constant 0 : i32
    %c0_i32_0 = arith.constant 0 : i32
    return %arg0, %c0_i32 : i32, i32
  }
  func.func @transform_3(%arg0: i32) -> (i32, i32, i32) {
    %c0_i32 = arith.constant 0 : i32
    %c0_i32_0 = arith.constant 0 : i32
    %c0_i32_1 = arith.constant 0 : i32
    return %arg0, %c0_i32, %c0_i32_0 : i32, i32, i32
  }
}

module attributes {stable_mosaic.version = 11 : i64} {
  func.func @stage2_kernel(%arg0: i32, %arg1: memref<1x8x16x128xbf16, #tpu.memory_space<vmem>>, %arg2: memref<1x128xf32, #tpu.memory_space<vmem>>, %arg3: memref<1x128xf32, #tpu.memory_space<vmem>>, %arg4: memref<9x128x128xbf16, #tpu.memory_space<vmem>>, %arg5: memref<1x128x128xbf16, #tpu.memory_space<vmem>>, %arg6: memref<1x2x128xf32, #tpu.memory_space<vmem>>, %arg7: memref<10x18x128xbf16, #tpu.memory_space<vmem>>) attributes {dimension_semantics = [#tpu.dimension_semantics<parallel>], iteration_bounds = array<i64: 2>, scalar_prefetch = 0 : i64, scratch_operands = 1 : i64, tpu.core_type = #tpu.core_type<tc>, window_params = [{transform_indices = @transform_0, window_bounds = array<i64: 1, 8, 16, 128>}, {pipeline_mode = #tpu.pipeline_mode<synchronous>, transform_indices = @transform_1, window_bounds = array<i64: 1, 128>}, {pipeline_mode = #tpu.pipeline_mode<synchronous>, transform_indices = @transform_2, window_bounds = array<i64: 1, 128>}, {pipeline_mode = #tpu.pipeline_mode<synchronous>, transform_indices = @transform_3, window_bounds = array<i64: 9, 128, 128>}, {transform_indices = @transform_4, window_bounds = array<i64: 1, 128, 128>}, {transform_indices = @transform_5, window_bounds = array<i64: 1, 2, 128>}]} {
    %c0 = arith.constant 0 : index
    %c0_0 = arith.constant 0 : index
    %c0_1 = arith.constant 0 : index
    %c0_2 = arith.constant 0 : index
    %0 = vector.load %arg1[%c0, %c0_0, %c0_1, %c0_2] : memref<1x8x16x128xbf16, #tpu.memory_space<vmem>>, vector<1x8x16x128xbf16>
    %1 = vector.shape_cast %0 : vector<1x8x16x128xbf16> to vector<8x16x128xbf16>
    %2 = arith.extf %1 : vector<8x16x128xbf16> to vector<8x16x128xf32>
    %c0_3 = arith.constant 0 : index
    %c0_4 = arith.constant 0 : index
    %3 = vector.load %arg2[%c0_3, %c0_4] : memref<1x128xf32, #tpu.memory_space<vmem>>, vector<1x128xf32>
    %4 = vector.shape_cast %3 : vector<1x128xf32> to vector<1x1x128xf32>
    %5 = vector.broadcast %4 : vector<1x1x128xf32> to vector<8x16x128xf32>
    %6 = arith.mulf %2, %5 : vector<8x16x128xf32>
    %c0_5 = arith.constant 0 : index
    %c0_6 = arith.constant 0 : index
    %7 = vector.load %arg3[%c0_5, %c0_6] : memref<1x128xf32, #tpu.memory_space<vmem>>, vector<1x128xf32>
    %8 = vector.shape_cast %7 : vector<1x128xf32> to vector<1x1x128xf32>
    %9 = vector.broadcast %8 : vector<1x1x128xf32> to vector<8x16x128xf32>
    %10 = arith.addf %6, %9 : vector<8x16x128xf32>
    %cst = arith.constant 0.000000e+00 : f32
    %11 = vector.broadcast %cst : f32 to vector<8x16x128xf32>
    %12 = arith.maximumf %10, %11 : vector<8x16x128xf32>
    %13 = arith.truncf %12 : vector<8x16x128xf32> to vector<8x16x128xbf16>
    %cst_7 = arith.constant 0.000000e+00 : bf16
    %14 = vector.broadcast %cst_7 : bf16 to vector<1x18x128xbf16>
    %c0_8 = arith.constant 0 : index
    %c0_9 = arith.constant 0 : index
    %c0_10 = arith.constant 0 : index
    %15 = vector.load %arg7[%c0_8, %c0_9, %c0_10] : memref<10x18x128xbf16, #tpu.memory_space<vmem>>, vector<1x18x128xbf16>
    tpu.vector_store %arg7[%c0_8, %c0_9, %c0_10], %14 {strides = array<i32>} : memref<10x18x128xbf16, #tpu.memory_space<vmem>>, vector<1x18x128xbf16>,
    %cst_11 = arith.constant 0.000000e+00 : bf16
    %16 = vector.broadcast %cst_11 : bf16 to vector<1x18x128xbf16>
    %c9 = arith.constant 9 : index
    %c0_12 = arith.constant 0 : index
    %c0_13 = arith.constant 0 : index
    %17 = vector.load %arg7[%c9, %c0_12, %c0_13] : memref<10x18x128xbf16, #tpu.memory_space<vmem>>, vector<1x18x128xbf16>
    tpu.vector_store %arg7[%c9, %c0_12, %c0_13], %16 {strides = array<i32>} : memref<10x18x128xbf16, #tpu.memory_space<vmem>>, vector<1x18x128xbf16>,
    %cst_14 = arith.constant 0.000000e+00 : bf16
    %18 = vector.broadcast %cst_14 : bf16 to vector<8x1x128xbf16>
    %c1 = arith.constant 1 : index
    %c0_15 = arith.constant 0 : index
    %c0_16 = arith.constant 0 : index
    %19 = vector.load %arg7[%c1, %c0_15, %c0_16] : memref<10x18x128xbf16, #tpu.memory_space<vmem>>, vector<8x1x128xbf16>
    tpu.vector_store %arg7[%c1, %c0_15, %c0_16], %18 {strides = array<i32>} : memref<10x18x128xbf16, #tpu.memory_space<vmem>>, vector<8x1x128xbf16>,
    %cst_17 = arith.constant 0.000000e+00 : bf16
    %20 = vector.broadcast %cst_17 : bf16 to vector<8x1x128xbf16>
    %c1_18 = arith.constant 1 : index
    %c17 = arith.constant 17 : index
    %c0_19 = arith.constant 0 : index
    %21 = vector.load %arg7[%c1_18, %c17, %c0_19] : memref<10x18x128xbf16, #tpu.memory_space<vmem>>, vector<8x1x128xbf16>
    tpu.vector_store %arg7[%c1_18, %c17, %c0_19], %20 {strides = array<i32>} : memref<10x18x128xbf16, #tpu.memory_space<vmem>>, vector<8x1x128xbf16>,
    %c1_20 = arith.constant 1 : index
    %c1_21 = arith.constant 1 : index
    %c0_22 = arith.constant 0 : index
    %22 = vector.load %arg7[%c1_20, %c1_21, %c0_22] : memref<10x18x128xbf16, #tpu.memory_space<vmem>>, vector<8x16x128xbf16>
    tpu.vector_store %arg7[%c1_20, %c1_21, %c0_22], %13 {strides = array<i32>} : memref<10x18x128xbf16, #tpu.memory_space<vmem>>, vector<8x16x128xbf16>,
    %c0_23 = arith.constant 0 : index
    %c0_24 = arith.constant 0 : index
    %c0_25 = arith.constant 0 : index
    %23 = vector.load %arg7[%c0_23, %c0_24, %c0_25] : memref<10x18x128xbf16, #tpu.memory_space<vmem>>, vector<8x16x128xbf16>
    %24 = vector.shape_cast %23 : vector<8x16x128xbf16> to vector<128x128xbf16>
    %c0_26 = arith.constant 0 : index
    %c0_27 = arith.constant 0 : index
    %c0_28 = arith.constant 0 : index
    %25 = vector.load %arg4[%c0_26, %c0_27, %c0_28] : memref<9x128x128xbf16, #tpu.memory_space<vmem>>, vector<1x128x128xbf16>
    %26 = vector.shape_cast %25 : vector<1x128x128xbf16> to vector<128x128xbf16>
    %cst_29 = arith.constant dense<0.000000e+00> : vector<128x128xf32>
    %27 = tpu.matmul %24, %26, %cst_29 {dimension_numbers = #tpu.dot_dimension_numbers<[1], [0], [0], [1], [0, 0, 1, 1], [], []>} : vector<128x128xbf16>, vector<128x128xbf16>, vector<128x128xf32> -> vector<128x128xf32>
    %c0_30 = arith.constant 0 : index
    %c1_31 = arith.constant 1 : index
    %c0_32 = arith.constant 0 : index
    %28 = vector.load %arg7[%c0_30, %c1_31, %c0_32] : memref<10x18x128xbf16, #tpu.memory_space<vmem>>, vector<8x16x128xbf16>
    %29 = vector.shape_cast %28 : vector<8x16x128xbf16> to vector<128x128xbf16>
    %c1_33 = arith.constant 1 : index
    %c0_34 = arith.constant 0 : index
    %c0_35 = arith.constant 0 : index
    %30 = vector.load %arg4[%c1_33, %c0_34, %c0_35] : memref<9x128x128xbf16, #tpu.memory_space<vmem>>, vector<1x128x128xbf16>
    %31 = vector.shape_cast %30 : vector<1x128x128xbf16> to vector<128x128xbf16>
    %cst_36 = arith.constant dense<0.000000e+00> : vector<128x128xf32>
    %32 = tpu.matmul %29, %31, %cst_36 {dimension_numbers = #tpu.dot_dimension_numbers<[1], [0], [0], [1], [0, 0, 1, 1], [], []>} : vector<128x128xbf16>, vector<128x128xbf16>, vector<128x128xf32> -> vector<128x128xf32>
    %33 = arith.addf %27, %32 : vector<128x128xf32>
    %c0_37 = arith.constant 0 : index
    %c2 = arith.constant 2 : index
    %c0_38 = arith.constant 0 : index
    %34 = vector.load %arg7[%c0_37, %c2, %c0_38] : memref<10x18x128xbf16, #tpu.memory_space<vmem>>, vector<8x16x128xbf16>
    %35 = vector.shape_cast %34 : vector<8x16x128xbf16> to vector<128x128xbf16>
    %c2_39 = arith.constant 2 : index
    %c0_40 = arith.constant 0 : index
    %c0_41 = arith.constant 0 : index
    %36 = vector.load %arg4[%c2_39, %c0_40, %c0_41] : memref<9x128x128xbf16, #tpu.memory_space<vmem>>, vector<1x128x128xbf16>
    %37 = vector.shape_cast %36 : vector<1x128x128xbf16> to vector<128x128xbf16>
    %cst_42 = arith.constant dense<0.000000e+00> : vector<128x128xf32>
    %38 = tpu.matmul %35, %37, %cst_42 {dimension_numbers = #tpu.dot_dimension_numbers<[1], [0], [0], [1], [0, 0, 1, 1], [], []>} : vector<128x128xbf16>, vector<128x128xbf16>, vector<128x128xf32> -> vector<128x128xf32>
    %39 = arith.addf %33, %38 : vector<128x128xf32>
    %c1_43 = arith.constant 1 : index
    %c0_44 = arith.constant 0 : index
    %c0_45 = arith.constant 0 : index
    %40 = vector.load %arg7[%c1_43, %c0_44, %c0_45] : memref<10x18x128xbf16, #tpu.memory_space<vmem>>, vector<8x16x128xbf16>
    %41 = vector.shape_cast %40 : vector<8x16x128xbf16> to vector<128x128xbf16>
    %c3 = arith.constant 3 : index
    %c0_46 = arith.constant 0 : index
    %c0_47 = arith.constant 0 : index
    %42 = vector.load %arg4[%c3, %c0_46, %c0_47] : memref<9x128x128xbf16, #tpu.memory_space<vmem>>, vector<1x128x128xbf16>
    %43 = vector.shape_cast %42 : vector<1x128x128xbf16> to vector<128x128xbf16>
    %cst_48 = arith.constant dense<0.000000e+00> : vector<128x128xf32>
    %44 = tpu.matmul %41, %43, %cst_48 {dimension_numbers = #tpu.dot_dimension_numbers<[1], [0], [0], [1], [0, 0, 1, 1], [], []>} : vector<128x128xbf16>, vector<128x128xbf16>, vector<128x128xf32> -> vector<128x128xf32>
    %45 = arith.addf %39, %44 : vector<128x128xf32>
    %c1_49 = arith.constant 1 : index
    %c1_50 = arith.constant 1 : index
    %c0_51 = arith.constant 0 : index
    %46 = vector.load %arg7[%c1_49, %c1_50, %c0_51] : memref<10x18x128xbf16, #tpu.memory_space<vmem>>, vector<8x16x128xbf16>
    %47 = vector.shape_cast %46 : vector<8x16x128xbf16> to vector<128x128xbf16>
    %c4 = arith.constant 4 : index
    %c0_52 = arith.constant 0 : index
    %c0_53 = arith.constant 0 : index
    %48 = vector.load %arg4[%c4, %c0_52, %c0_53] : memref<9x128x128xbf16, #tpu.memory_space<vmem>>, vector<1x128x128xbf16>
    %49 = vector.shape_cast %48 : vector<1x128x128xbf16> to vector<128x128xbf16>
    %cst_54 = arith.constant dense<0.000000e+00> : vector<128x128xf32>
    %50 = tpu.matmul %47, %49, %cst_54 {dimension_numbers = #tpu.dot_dimension_numbers<[1], [0], [0], [1], [0, 0, 1, 1], [], []>} : vector<128x128xbf16>, vector<128x128xbf16>, vector<128x128xf32> -> vector<128x128xf32>
    %51 = arith.addf %45, %50 : vector<128x128xf32>
    %c1_55 = arith.constant 1 : index
    %c2_56 = arith.constant 2 : index
    %c0_57 = arith.constant 0 : index
    %52 = vector.load %arg7[%c1_55, %c2_56, %c0_57] : memref<10x18x128xbf16, #tpu.memory_space<vmem>>, vector<8x16x128xbf16>
    %53 = vector.shape_cast %52 : vector<8x16x128xbf16> to vector<128x128xbf16>
    %c5 = arith.constant 5 : index
    %c0_58 = arith.constant 0 : index
    %c0_59 = arith.constant 0 : index
    %54 = vector.load %arg4[%c5, %c0_58, %c0_59] : memref<9x128x128xbf16, #tpu.memory_space<vmem>>, vector<1x128x128xbf16>
    %55 = vector.shape_cast %54 : vector<1x128x128xbf16> to vector<128x128xbf16>
    %cst_60 = arith.constant dense<0.000000e+00> : vector<128x128xf32>
    %56 = tpu.matmul %53, %55, %cst_60 {dimension_numbers = #tpu.dot_dimension_numbers<[1], [0], [0], [1], [0, 0, 1, 1], [], []>} : vector<128x128xbf16>, vector<128x128xbf16>, vector<128x128xf32> -> vector<128x128xf32>
    %57 = arith.addf %51, %56 : vector<128x128xf32>
    %c2_61 = arith.constant 2 : index
    %c0_62 = arith.constant 0 : index
    %c0_63 = arith.constant 0 : index
    %58 = vector.load %arg7[%c2_61, %c0_62, %c0_63] : memref<10x18x128xbf16, #tpu.memory_space<vmem>>, vector<8x16x128xbf16>
    %59 = vector.shape_cast %58 : vector<8x16x128xbf16> to vector<128x128xbf16>
    %c6 = arith.constant 6 : index
    %c0_64 = arith.constant 0 : index
    %c0_65 = arith.constant 0 : index
    %60 = vector.load %arg4[%c6, %c0_64, %c0_65] : memref<9x128x128xbf16, #tpu.memory_space<vmem>>, vector<1x128x128xbf16>
    %61 = vector.shape_cast %60 : vector<1x128x128xbf16> to vector<128x128xbf16>
    %cst_66 = arith.constant dense<0.000000e+00> : vector<128x128xf32>
    %62 = tpu.matmul %59, %61, %cst_66 {dimension_numbers = #tpu.dot_dimension_numbers<[1], [0], [0], [1], [0, 0, 1, 1], [], []>} : vector<128x128xbf16>, vector<128x128xbf16>, vector<128x128xf32> -> vector<128x128xf32>
    %63 = arith.addf %57, %62 : vector<128x128xf32>
    %c2_67 = arith.constant 2 : index
    %c1_68 = arith.constant 1 : index
    %c0_69 = arith.constant 0 : index
    %64 = vector.load %arg7[%c2_67, %c1_68, %c0_69] : memref<10x18x128xbf16, #tpu.memory_space<vmem>>, vector<8x16x128xbf16>
    %65 = vector.shape_cast %64 : vector<8x16x128xbf16> to vector<128x128xbf16>
    %c7 = arith.constant 7 : index
    %c0_70 = arith.constant 0 : index
    %c0_71 = arith.constant 0 : index
    %66 = vector.load %arg4[%c7, %c0_70, %c0_71] : memref<9x128x128xbf16, #tpu.memory_space<vmem>>, vector<1x128x128xbf16>
    %67 = vector.shape_cast %66 : vector<1x128x128xbf16> to vector<128x128xbf16>
    %cst_72 = arith.constant dense<0.000000e+00> : vector<128x128xf32>
    %68 = tpu.matmul %65, %67, %cst_72 {dimension_numbers = #tpu.dot_dimension_numbers<[1], [0], [0], [1], [0, 0, 1, 1], [], []>} : vector<128x128xbf16>, vector<128x128xbf16>, vector<128x128xf32> -> vector<128x128xf32>
    %69 = arith.addf %63, %68 : vector<128x128xf32>
    %c2_73 = arith.constant 2 : index
    %c2_74 = arith.constant 2 : index
    %c0_75 = arith.constant 0 : index
    %70 = vector.load %arg7[%c2_73, %c2_74, %c0_75] : memref<10x18x128xbf16, #tpu.memory_space<vmem>>, vector<8x16x128xbf16>
    %71 = vector.shape_cast %70 : vector<8x16x128xbf16> to vector<128x128xbf16>
    %c8 = arith.constant 8 : index
    %c0_76 = arith.constant 0 : index
    %c0_77 = arith.constant 0 : index
    %72 = vector.load %arg4[%c8, %c0_76, %c0_77] : memref<9x128x128xbf16, #tpu.memory_space<vmem>>, vector<1x128x128xbf16>
    %73 = vector.shape_cast %72 : vector<1x128x128xbf16> to vector<128x128xbf16>
    %cst_78 = arith.constant dense<0.000000e+00> : vector<128x128xf32>
    %74 = tpu.matmul %71, %73, %cst_78 {dimension_numbers = #tpu.dot_dimension_numbers<[1], [0], [0], [1], [0, 0, 1, 1], [], []>} : vector<128x128xbf16>, vector<128x128xbf16>, vector<128x128xf32> -> vector<128x128xf32>
    %75 = arith.addf %69, %74 : vector<128x128xf32>
    %cst_79 = arith.constant dense<0.000000e+00> : vector<128xf32>
    %76 = vector.multi_reduction <add>, %75, %cst_79 [0] : vector<128x128xf32> to vector<128xf32>
    %77 = vector.shape_cast %76 : vector<128xf32> to vector<1x128xf32>
    %78 = arith.mulf %75, %75 : vector<128x128xf32>
    %cst_80 = arith.constant dense<0.000000e+00> : vector<128xf32>
    %79 = vector.multi_reduction <add>, %78, %cst_80 [0] : vector<128x128xf32> to vector<128xf32>
    %80 = vector.shape_cast %79 : vector<128xf32> to vector<1x128xf32>
    %81 = tpu.concatenate %77, %80 in 0 : vector<1x128xf32>, vector<1x128xf32> -> vector<2x128xf32>
    %c0_81 = arith.constant 0 : index
    %c0_82 = arith.constant 0 : index
    %c0_83 = arith.constant 0 : index
    %82 = vector.load %arg6[%c0_81, %c0_82, %c0_83] : memref<1x2x128xf32, #tpu.memory_space<vmem>>, vector<1x2x128xf32>
    %83 = vector.shape_cast %82 : vector<1x2x128xf32> to vector<2x128xf32>
    %84 = vector.shape_cast %81 : vector<2x128xf32> to vector<1x2x128xf32>
    tpu.vector_store %arg6[%c0_81, %c0_82, %c0_83], %84 {strides = array<i32>} : memref<1x2x128xf32, #tpu.memory_space<vmem>>, vector<1x2x128xf32>,
    %85 = arith.truncf %75 : vector<128x128xf32> to vector<128x128xbf16>
    %c0_84 = arith.constant 0 : index
    %c0_85 = arith.constant 0 : index
    %c0_86 = arith.constant 0 : index
    %86 = vector.load %arg5[%c0_84, %c0_85, %c0_86] : memref<1x128x128xbf16, #tpu.memory_space<vmem>>, vector<1x128x128xbf16>
    %87 = vector.shape_cast %86 : vector<1x128x128xbf16> to vector<128x128xbf16>
    %88 = vector.shape_cast %85 : vector<128x128xbf16> to vector<1x128x128xbf16>
    tpu.vector_store %arg5[%c0_84, %c0_85, %c0_86], %88 {strides = array<i32>} : memref<1x128x128xbf16, #tpu.memory_space<vmem>>, vector<1x128x128xbf16>,
    return
  }
  func.func @transform_0(%arg0: i32) -> (i32, i32, i32, i32) {
    %c0_i32 = arith.constant 0 : i32
    %c0_i32_0 = arith.constant 0 : i32
    %c0_i32_1 = arith.constant 0 : i32
    %c0_i32_2 = arith.constant 0 : i32
    return %arg0, %c0_i32, %c0_i32_0, %c0_i32_1 : i32, i32, i32, i32
  }
  func.func @transform_1(%arg0: i32) -> (i32, i32) {
    %c0_i32 = arith.constant 0 : i32
    %c0_i32_0 = arith.constant 0 : i32
    %c0_i32_1 = arith.constant 0 : i32
    return %c0_i32, %c0_i32_0 : i32, i32
  }
  func.func @transform_2(%arg0: i32) -> (i32, i32) {
    %c0_i32 = arith.constant 0 : i32
    %c0_i32_0 = arith.constant 0 : i32
    %c0_i32_1 = arith.constant 0 : i32
    return %c0_i32, %c0_i32_0 : i32, i32
  }
  func.func @transform_3(%arg0: i32) -> (i32, i32, i32) {
    %c0_i32 = arith.constant 0 : i32
    %c0_i32_0 = arith.constant 0 : i32
    %c0_i32_1 = arith.constant 0 : i32
    %c0_i32_2 = arith.constant 0 : i32
    return %c0_i32, %c0_i32_0, %c0_i32_1 : i32, i32, i32
  }
  func.func @transform_4(%arg0: i32) -> (i32, i32, i32) {
    %c0_i32 = arith.constant 0 : i32
    %c0_i32_0 = arith.constant 0 : i32
    %c0_i32_1 = arith.constant 0 : i32
    return %arg0, %c0_i32, %c0_i32_0 : i32, i32, i32
  }
  func.func @transform_5(%arg0: i32) -> (i32, i32, i32) {
    %c0_i32 = arith.constant 0 : i32
    %c0_i32_0 = arith.constant 0 : i32
    %c0_i32_1 = arith.constant 0 : i32
    return %arg0, %c0_i32, %c0_i32_0 : i32, i32, i32
  }
}

module attributes {stable_mosaic.version = 11 : i64} {
  func.func @stage3a_kernel(%arg0: i32, %arg1: memref<128x128xbf16, #tpu.memory_space<vmem>>, %arg2: memref<1x128xf32, #tpu.memory_space<vmem>>, %arg3: memref<1x128xf32, #tpu.memory_space<vmem>>, %arg4: memref<128x128xbf16, #tpu.memory_space<vmem>>, %arg5: memref<128x128xbf16, #tpu.memory_space<vmem>>, %arg6: memref<1x2x128xf32, #tpu.memory_space<vmem>>) attributes {dimension_semantics = [#tpu.dimension_semantics<parallel>], iteration_bounds = array<i64: 2>, scalar_prefetch = 0 : i64, scratch_operands = 0 : i64, tpu.core_type = #tpu.core_type<tc>, window_params = [{transform_indices = @transform_0, window_bounds = array<i64: 128, 128>}, {pipeline_mode = #tpu.pipeline_mode<synchronous>, transform_indices = @transform_1, window_bounds = array<i64: 1, 128>}, {pipeline_mode = #tpu.pipeline_mode<synchronous>, transform_indices = @transform_2, window_bounds = array<i64: 1, 128>}, {pipeline_mode = #tpu.pipeline_mode<synchronous>, transform_indices = @transform_3, window_bounds = array<i64: 128, 128>}, {transform_indices = @transform_4, window_bounds = array<i64: 128, 128>}, {transform_indices = @transform_5, window_bounds = array<i64: 1, 2, 128>}]} {
    %c0 = arith.constant 0 : index
    %c0_0 = arith.constant 0 : index
    %0 = vector.load %arg1[%c0, %c0_0] : memref<128x128xbf16, #tpu.memory_space<vmem>>, vector<128x128xbf16>
    %1 = arith.extf %0 : vector<128x128xbf16> to vector<128x128xf32>
    %c0_1 = arith.constant 0 : index
    %c0_2 = arith.constant 0 : index
    %2 = vector.load %arg2[%c0_1, %c0_2] : memref<1x128xf32, #tpu.memory_space<vmem>>, vector<1x128xf32>
    %3 = vector.broadcast %2 : vector<1x128xf32> to vector<128x128xf32>
    %4 = arith.mulf %1, %3 : vector<128x128xf32>
    %c0_3 = arith.constant 0 : index
    %c0_4 = arith.constant 0 : index
    %5 = vector.load %arg3[%c0_3, %c0_4] : memref<1x128xf32, #tpu.memory_space<vmem>>, vector<1x128xf32>
    %6 = vector.broadcast %5 : vector<1x128xf32> to vector<128x128xf32>
    %7 = arith.addf %4, %6 : vector<128x128xf32>
    %cst = arith.constant 0.000000e+00 : f32
    %8 = vector.broadcast %cst : f32 to vector<128x128xf32>
    %9 = arith.maximumf %7, %8 : vector<128x128xf32>
    %10 = arith.truncf %9 : vector<128x128xf32> to vector<128x128xbf16>
    %c0_5 = arith.constant 0 : index
    %c0_6 = arith.constant 0 : index
    %11 = vector.load %arg4[%c0_5, %c0_6] : memref<128x128xbf16, #tpu.memory_space<vmem>>, vector<128x128xbf16>
    %cst_7 = arith.constant dense<0.000000e+00> : vector<128x128xf32>
    %12 = tpu.matmul %10, %11, %cst_7 {dimension_numbers = #tpu.dot_dimension_numbers<[1], [0], [0], [1], [0, 0, 1, 1], [], []>} : vector<128x128xbf16>, vector<128x128xbf16>, vector<128x128xf32> -> vector<128x128xf32>
    %cst_8 = arith.constant dense<0.000000e+00> : vector<128xf32>
    %13 = vector.multi_reduction <add>, %12, %cst_8 [0] : vector<128x128xf32> to vector<128xf32>
    %14 = vector.shape_cast %13 : vector<128xf32> to vector<1x128xf32>
    %15 = arith.mulf %12, %12 : vector<128x128xf32>
    %cst_9 = arith.constant dense<0.000000e+00> : vector<128xf32>
    %16 = vector.multi_reduction <add>, %15, %cst_9 [0] : vector<128x128xf32> to vector<128xf32>
    %17 = vector.shape_cast %16 : vector<128xf32> to vector<1x128xf32>
    %18 = tpu.concatenate %14, %17 in 0 : vector<1x128xf32>, vector<1x128xf32> -> vector<2x128xf32>
    %c0_10 = arith.constant 0 : index
    %c0_11 = arith.constant 0 : index
    %c0_12 = arith.constant 0 : index
    %19 = vector.load %arg6[%c0_10, %c0_11, %c0_12] : memref<1x2x128xf32, #tpu.memory_space<vmem>>, vector<1x2x128xf32>
    %20 = vector.shape_cast %19 : vector<1x2x128xf32> to vector<2x128xf32>
    %21 = vector.shape_cast %18 : vector<2x128xf32> to vector<1x2x128xf32>
    tpu.vector_store %arg6[%c0_10, %c0_11, %c0_12], %21 {strides = array<i32>} : memref<1x2x128xf32, #tpu.memory_space<vmem>>, vector<1x2x128xf32>,
    %22 = arith.truncf %12 : vector<128x128xf32> to vector<128x128xbf16>
    %c0_13 = arith.constant 0 : index
    %c0_14 = arith.constant 0 : index
    %23 = vector.load %arg5[%c0_13, %c0_14] : memref<128x128xbf16, #tpu.memory_space<vmem>>, vector<128x128xbf16>
    tpu.vector_store %arg5[%c0_13, %c0_14], %22 {strides = array<i32>} : memref<128x128xbf16, #tpu.memory_space<vmem>>, vector<128x128xbf16>,
    return
  }
  func.func @transform_0(%arg0: i32) -> (i32, i32) {
    %c0_i32 = arith.constant 0 : i32
    %c0_i32_0 = arith.constant 0 : i32
    return %arg0, %c0_i32 : i32, i32
  }
  func.func @transform_1(%arg0: i32) -> (i32, i32) {
    %c0_i32 = arith.constant 0 : i32
    %c0_i32_0 = arith.constant 0 : i32
    %c0_i32_1 = arith.constant 0 : i32
    return %c0_i32, %c0_i32_0 : i32, i32
  }
  func.func @transform_2(%arg0: i32) -> (i32, i32) {
    %c0_i32 = arith.constant 0 : i32
    %c0_i32_0 = arith.constant 0 : i32
    %c0_i32_1 = arith.constant 0 : i32
    return %c0_i32, %c0_i32_0 : i32, i32
  }
  func.func @transform_3(%arg0: i32) -> (i32, i32) {
    %c0_i32 = arith.constant 0 : i32
    %c0_i32_0 = arith.constant 0 : i32
    %c0_i32_1 = arith.constant 0 : i32
    return %c0_i32, %c0_i32_0 : i32, i32
  }
  func.func @transform_4(%arg0: i32) -> (i32, i32) {
    %c0_i32 = arith.constant 0 : i32
    %c0_i32_0 = arith.constant 0 : i32
    return %arg0, %c0_i32 : i32, i32
  }
  func.func @transform_5(%arg0: i32) -> (i32, i32, i32) {
    %c0_i32 = arith.constant 0 : i32
    %c0_i32_0 = arith.constant 0 : i32
    %c0_i32_1 = arith.constant 0 : i32
    return %arg0, %c0_i32, %c0_i32_0 : i32, i32, i32
  }
}

module attributes {stable_mosaic.version = 11 : i64} {
  func.func @stage3b_kernel(%arg0: i32, %arg1: memref<128x128xbf16, #tpu.memory_space<vmem>>, %arg2: memref<1x128xf32, #tpu.memory_space<vmem>>, %arg3: memref<1x128xf32, #tpu.memory_space<vmem>>, %arg4: memref<128x128xf32, #tpu.memory_space<vmem>>, %arg5: memref<128x128xf32, #tpu.memory_space<vmem>>) attributes {dimension_semantics = [#tpu.dimension_semantics<parallel>], iteration_bounds = array<i64: 2>, scalar_prefetch = 0 : i64, scratch_operands = 0 : i64, tpu.core_type = #tpu.core_type<tc>, window_params = [{transform_indices = @transform_0, window_bounds = array<i64: 128, 128>}, {pipeline_mode = #tpu.pipeline_mode<synchronous>, transform_indices = @transform_1, window_bounds = array<i64: 1, 128>}, {pipeline_mode = #tpu.pipeline_mode<synchronous>, transform_indices = @transform_2, window_bounds = array<i64: 1, 128>}, {transform_indices = @transform_3, window_bounds = array<i64: 128, 128>}, {transform_indices = @transform_4, window_bounds = array<i64: 128, 128>}]} {
    %c0 = arith.constant 0 : index
    %c0_0 = arith.constant 0 : index
    %0 = vector.load %arg1[%c0, %c0_0] : memref<128x128xbf16, #tpu.memory_space<vmem>>, vector<128x128xbf16>
    %1 = arith.extf %0 : vector<128x128xbf16> to vector<128x128xf32>
    %c0_1 = arith.constant 0 : index
    %c0_2 = arith.constant 0 : index
    %2 = vector.load %arg2[%c0_1, %c0_2] : memref<1x128xf32, #tpu.memory_space<vmem>>, vector<1x128xf32>
    %3 = vector.broadcast %2 : vector<1x128xf32> to vector<128x128xf32>
    %4 = arith.mulf %1, %3 : vector<128x128xf32>
    %c0_3 = arith.constant 0 : index
    %c0_4 = arith.constant 0 : index
    %5 = vector.load %arg3[%c0_3, %c0_4] : memref<1x128xf32, #tpu.memory_space<vmem>>, vector<1x128xf32>
    %6 = vector.broadcast %5 : vector<1x128xf32> to vector<128x128xf32>
    %7 = arith.addf %4, %6 : vector<128x128xf32>
    %c0_5 = arith.constant 0 : index
    %c0_6 = arith.constant 0 : index
    %8 = vector.load %arg4[%c0_5, %c0_6] : memref<128x128xf32, #tpu.memory_space<vmem>>, vector<128x128xf32>
    %9 = arith.addf %7, %8 : vector<128x128xf32>
    %cst = arith.constant 0.000000e+00 : f32
    %10 = vector.broadcast %cst : f32 to vector<128x128xf32>
    %11 = arith.maximumf %9, %10 : vector<128x128xf32>
    %c0_7 = arith.constant 0 : index
    %c0_8 = arith.constant 0 : index
    %12 = vector.load %arg5[%c0_7, %c0_8] : memref<128x128xf32, #tpu.memory_space<vmem>>, vector<128x128xf32>
    tpu.vector_store %arg5[%c0_7, %c0_8], %11 {strides = array<i32>} : memref<128x128xf32, #tpu.memory_space<vmem>>, vector<128x128xf32>,
    return
  }
  func.func @transform_0(%arg0: i32) -> (i32, i32) {
    %c0_i32 = arith.constant 0 : i32
    %c0_i32_0 = arith.constant 0 : i32
    return %arg0, %c0_i32 : i32, i32
  }
  func.func @transform_1(%arg0: i32) -> (i32, i32) {
    %c0_i32 = arith.constant 0 : i32
    %c0_i32_0 = arith.constant 0 : i32
    %c0_i32_1 = arith.constant 0 : i32
    return %c0_i32, %c0_i32_0 : i32, i32
  }
  func.func @transform_2(%arg0: i32) -> (i32, i32) {
    %c0_i32 = arith.constant 0 : i32
    %c0_i32_0 = arith.constant 0 : i32
    %c0_i32_1 = arith.constant 0 : i32
    return %c0_i32, %c0_i32_0 : i32, i32
  }
  func.func @transform_3(%arg0: i32) -> (i32, i32) {
    %c0_i32 = arith.constant 0 : i32
    %c0_i32_0 = arith.constant 0 : i32
    return %arg0, %c0_i32 : i32, i32
  }
  func.func @transform_4(%arg0: i32) -> (i32, i32) {
    %c0_i32 = arith.constant 0 : i32
    %c0_i32_0 = arith.constant 0 : i32
    return %arg0, %c0_i32 : i32, i32
  }
}

</mosaic_0001>

<bundles_post_ra>
// kernel: bottleneck_forward.4
= control target key start
LH: loop header
LB: loop body
LE: loop exit
PB: predicated region body
PF: predicated region fallthrough
CT: control target
= control target key end

     0   :  { %s862_s12 = smov 0   ;;  %s938_s0 = inlined_call_operand.vmem [shape: bf16[256,128], index: 0, kind: input, shape index: {}]   ;;  %s939_s1 = inlined_call_operand.vmem [shape: bf16[128,128], index: 1, kind: input, shape index: {}]   ;;  %s940_s2 = inlined_call_operand.vmem [shape: bf16[256,128], index: 2, kind: output, shape index: {0}]   ;;  %s941_s3 = inlined_call_operand.vmem [shape: f32[2,2,128], index: 3, kind: output, shape index: {1}]  }
   0x1 LB: > { %s868_s13 = sadd.s32 4294967295, %s840_s12   ;;  %p643_p0 = scmp.ge.s32.totalorder %s840_s12, 1  ;;  %s840_s12 = sphi %s862_s12, %s14_s12  }
   0x2   : > { %p141_p1 = scmp.lt.s32.totalorder %s840_s12, 3 }
   0x4   : > { %p142_p2 = pnand %p643_p0, %p141_p1 }
   0x5   : > { %v818_v0 = vld [vmem:[%s939_s1] sm:$0xff] (!%p142_p2)   ;;  %s644_s16 = sshll.u32 (!%p142_p2), %s868_s13, 4  ;;  %v819_v1 = vld [vmem:[%s939_s1 + $0x8] sm:$0xff] (!%p142_p2)   ;;  %v820_v2 = vld [vmem:[%s939_s1 + $0x10] sm:$0xff] (!%p142_p2)   ;;  %p181_p4 = scmp.lt.s32.totalorder (!%p142_p2), %s868_s13, 1  ;;  %vm469_vm0 = vcmask (!%p142_p2), 1040384  }
   0x6   : > { %145 = sbr.rel (%p142_p2) target bundleno = 299 (0x12b), region = 28  ;;  %p170_p3 = scmp.lt.s32.totalorder (!%p142_p2), %s644_s16, 31  ;;  %762 = vmatprep.subr.bf16.mxu0 (!%p142_p2), %v818_v0  ;;  %794 = vmatprep.subr.bf16.mxu1 (!%p142_p2), %v818_v0  ;;  %v821_v3 = vld [vmem:[%s939_s1 + $0x18] sm:$0xff] (!%p142_p2)   ;;  %v822_v5 = vld [vmem:[%s939_s1 + $0x20] sm:$0xff] (!%p142_p2)   ;;  %v823_v7 = vld [vmem:[%s939_s1 + $0x28] sm:$0xff] (!%p142_p2)  }
   0x7   : > { %763 = vmatpush3.bf16.msra.mxu0 (!%p142_p2), %v818_v0  ;;  %802 = vmatpush3.bf16.msra.mxu1 (!%p142_p2), %v818_v0  ;;  %v824_v8 = vld [vmem:[%s939_s1 + $0x30] sm:$0xff] (!%p142_p2)   ;;  %v825_v9 = vld [vmem:[%s939_s1 + $0x38] sm:$0xff] (!%p142_p2)  }
   0x8   : > { %764 = vmatprep.subr.bf16.mxu0 (!%p142_p2), %v819_v1  ;;  %795 = vmatprep.subr.bf16.mxu1 (!%p142_p2), %v819_v1 }
   0xb   : > { %765 = vmatpush3.bf16.msra.mxu0 (!%p142_p2), %v819_v1  ;;  %803 = vmatpush3.bf16.msra.mxu1 (!%p142_p2), %v819_v1 }
   0xc   : > { %766 = vmatprep.subr.bf16.mxu0 (!%p142_p2), %v820_v2  ;;  %796 = vmatprep.subr.bf16.mxu1 (!%p142_p2), %v820_v2 }
   0xd   : > { %s943_s16 = smov (!%p170_p3, %s644_s16), 31  ;;  %s945_s13 = smov (!%p181_p4, %s868_s13), 1 }
   0xe   : > { %s645_s21 = sshll.u32 %s943_s16, 2  ;;  %s648_s11 = sshll.u32 %s945_s13, 1 }
   0xf   : > { %s890_s24 = scalar_lea.vmem %s938_s0, %s645_s21  ;;  %767 = vmatpush3.bf16.msra.mxu0 %v820_v2  ;;  %804 = vmatpush3.bf16.msra.mxu1 %v820_v2  ;;  %s920_s10 = scalar_lea.vmem %s940_s2, %s645_s21 }
  0x10   : > { %v826_v4 = vld [vmem:[%s890_s24] sm:$0xff]   ;;  %768 = vmatprep.subr.bf16.mxu0 %v821_v3  ;;  %797 = vmatprep.subr.bf16.mxu1 %v821_v3  ;;  %v827_v10 = vld [vmem:[%s890_s24 + $0x8] sm:$0xff]   ;;  %v828_v12 = vld [vmem:[%s890_s24 + $0x10] sm:$0xff]   ;;  %s184_s16 = scalar_lea.vmem %s941_s3, %s648_s11 }
  0x11   : > { %778 = vmatprep.mubr.bf16.mxu0 %v826_v4  ;;  %v830_v6 = vld [vmem:[%s890_s24 + $0x20] sm:$0xff]   ;;  %v831_v11 = vld [vmem:[%s890_s24 + $0x28] sm:$0xff]   ;;  %v832_v13 = vld [vmem:[%s890_s24 + $0x30] sm:$0xff]  }
  0x12   : > { %786 = vmatprep.mubr.bf16.mxu1 %v830_v6  ;;  %v829_v14 = vld [vmem:[%s890_s24 + $0x18] sm:$0xff]  }
  0x13   : > { %769 = vmatpush3.bf16.msra.mxu0 %v821_v3  ;;  %805 = vmatpush3.bf16.msra.mxu1 %v821_v3  ;;  %v833_v15 = vld [vmem:[%s890_s24 + $0x38] sm:$0xff]  }
  0x14   : > { %770 = vmatprep.subr.bf16.mxu0 %v822_v5  ;;  %798 = vmatprep.subr.bf16.mxu1 %v822_v5 }
  0x17   : > { %771 = vmatpush3.bf16.msra.mxu0 %v822_v5  ;;  %806 = vmatpush3.bf16.msra.mxu1 %v822_v5 }
  0x18   : > { %772 = vmatprep.subr.bf16.mxu0 %v823_v7  ;;  %799 = vmatprep.subr.bf16.mxu1 %v823_v7 }
  0x1b   : > { %773 = vmatpush3.bf16.msra.mxu0 %v823_v7  ;;  %807 = vmatpush3.bf16.msra.mxu1 %v823_v7 }
  0x1c   : > { %774 = vmatprep.subr.bf16.mxu0 %v824_v8  ;;  %800 = vmatprep.subr.bf16.mxu1 %v824_v8 }
  0x1f   : > { %775 = vmatpush3.bf16.msra.mxu0 %v824_v8  ;;  %808 = vmatpush3.bf16.msra.mxu1 %v824_v8 }
  0x20   : > { %776 = vmatprep.subr.bf16.mxu0 %v825_v9  ;;  %801 = vmatprep.subr.bf16.mxu1 %v825_v9 }
  0x23   : > { %777 = vmatpush3.bf16.msra.mxu0 %v825_v9  ;;  %809 = vmatpush3.bf16.msra.mxu1 %v825_v9 }
  0x26   : > { %779 = vmatmul.mubr.bf16.vlgmr.msra.gmra.mrb[0].mxu0 %v827_v10  ;;  %787 = vmatmul.mubr.bf16.vlgmr.msra.gmra.mrb[0].mxu1 %v831_v11 }
  0x27   : > { %782 = vmatprep.mubr.bf16.mxu0 %v828_v12  ;;  %790 = vmatprep.mubr.bf16.mxu1 %v832_v13 }
  0x2e   : > { %783 = vmatmul.mubr.bf16.gmra.mrb[4].mxu0 %v829_v14  ;;  %791 = vmatmul.mubr.bf16.gmra.mrb[4].mxu1 %v833_v15 }
  0xf9   : > { %v780_v16 = vpop.f32.mrb[0].mxu0  ;;  %v788_v17 = vpop.f32.mrb[0].mxu1 }
  0xfa   : > { %v348_v18 = vpop.f32.mrb[1].mxu0  ;;  %v380_v19 = vpop.f32.mrb[1].mxu1  ;;  %v434_v31 = vmul.f32 %v780_v16, %v780_v16  ;;  %v442_v3 = vmul.f32 %v788_v17, %v788_v17 }
  0xfb   : > { %v781_v20 = vpop.f32.mrb[2].mxu0  ;;  %v789_v21 = vpop.f32.mrb[2].mxu1  ;;  %v432_v26 = vmul.f32 %v348_v18, %v348_v18  ;;  %v440_v61 = vmul.f32 %v380_v19, %v380_v19 }
  0xfc   : > { %v707_v22 = vpack.c.bf16 %v781_v20, %v780_v16  ;;  %v351_v23 = vpop.f32.mrb[3].mxu0  ;;  %v727_v24 = vpack.c.bf16 %v789_v21, %v788_v17  ;;  %v383_v25 = vpop.f32.mrb[3].mxu1  ;;  %v435_v34 = vmul.f32 %v781_v20, %v781_v20  ;;  %v443_v6 = vmul.f32 %v789_v21, %v789_v21 }
  0xfd   : > { %v411_v27 = vadd.f32 %v351_v23, %v348_v18  ;;  %v433_v28 = vmul.f32 %v351_v23, %v351_v23  ;;  %v702_v29 = vpack.c.bf16 %v351_v23, %v348_v18  ;;  %v722_v30 = vpack.c.bf16 %v383_v25, %v380_v19 }
  0xfe   : > { %739 = vst [vmem:[%s920_s10 + $0x8] sm:$0xff] %v707_v22   ;;  %743 = vst [vmem:[%s920_s10 + $0x28] sm:$0xff] %v727_v24   ;;  %v441_v2 = vmul.f32 %v383_v25, %v383_v25 }
  0xff   : > { %v412_v32 = vadd.f32 %v780_v16, %v411_v27  ;;  %v448_v33 = vadd.f32 %v433_v28, %v432_v26  ;;  %703 = vst [vmem:[%s920_s10] sm:$0xff] %v702_v29   ;;  %742 = vst [vmem:[%s920_s10 + $0x20] sm:$0xff] %v722_v30  }
 0x101   : > { %v449_v35 = vadd.f32 %v448_v33, %v434_v31  ;;  %v784_v36 = vpop.f32.mrb[4].mxu0  ;;  %v413_v37 = vadd.f32 %v781_v20, %v412_v32  ;;  %v792_v38 = vpop.f32.mrb[4].mxu1 }
 0x102   : > { %v364_v39 = vpop.f32.mrb[5].mxu0  ;;  %v396_v40 = vpop.f32.mrb[5].mxu1  ;;  %v438_v55 = vmul.f32 %v784_v36, %v784_v36  ;;  %v446_v15 = vmul.f32 %v792_v38, %v792_v38 }
 0x103   : > { %v414_v41 = vadd.f32 %v413_v37, %v364_v39  ;;  %v436_v42 = vmul.f32 %v364_v39, %v364_v39  ;;  %v450_v43 = vadd.f32 %v449_v35, %v435_v34  ;;  %v785_v44 = vpop.f32.mrb[6].mxu0  ;;  %v793_v45 = vpop.f32.mrb[6].mxu1  ;;  %v444_v9 = vmul.f32 %v396_v40, %v396_v40 }
 0x104   : > { %v717_v46 = vpack.c.bf16 %v785_v44, %v784_v36  ;;  %v367_v47 = vpop.f32.mrb[7].mxu0  ;;  %v737_v48 = vpack.c.bf16 %v793_v45, %v792_v38  ;;  %v399_v49 = vpop.f32.mrb[7].mxu1  ;;  %v439_v58 = vmul.f32 %v785_v44, %v785_v44 }
 0x105   : > { %v451_v50 = vadd.f32 %v450_v43, %v436_v42  ;;  %v415_v51 = vadd.f32 %v414_v41, %v367_v47  ;;  %v437_v52 = vmul.f32 %v367_v47, %v367_v47  ;;  %v712_v53 = vpack.c.bf16 %v367_v47, %v364_v39 }
 0x106   : > { %741 = vst [vmem:[%s920_s10 + $0x18] sm:$0xff] %v717_v46   ;;  %745 = vst [vmem:[%s920_s10 + $0x38] sm:$0xff] %v737_v48   ;;  %v732_v54 = vpack.c.bf16 %v399_v49, %v396_v40  ;;  %v445_v14 = vmul.f32 %v399_v49, %v399_v49 }
 0x107   : > { %v416_v56 = vadd.f32 %v784_v36, %v415_v51  ;;  %v452_v57 = vadd.f32 %v451_v50, %v437_v52  ;;  %740 = vst [vmem:[%s920_s10 + $0x10] sm:$0xff] %v712_v53  }
 0x108   : > { %744 = vst [vmem:[%s920_s10 + $0x30] sm:$0xff] %v732_v54  }
 0x109   : > { %v453_v59 = vadd.f32 %v452_v57, %v438_v55  ;;  %v417_v60 = vadd.f32 %v785_v44, %v416_v56 }
 0x10b   : > { %v418_v62 = vadd.f32 %v417_v60, %v380_v19  ;;  %v454_v63 = vadd.f32 %v453_v59, %v439_v58  ;;  %v447_v19 = vmul.f32 %v793_v45, %v793_v45 }
 0x10d   : > { %v455_v0 = vadd.f32 %v454_v63, %v440_v61  ;;  %v419_v1 = vadd.f32 %v418_v62, %v383_v25 }
 0x10f   : > { %v420_v4 = vadd.f32 %v788_v17, %v419_v1  ;;  %v456_v5 = vadd.f32 %v455_v0, %v441_v2 }
 0x111   : > { %v457_v7 = vadd.f32 %v456_v5, %v442_v3  ;;  %v421_v8 = vadd.f32 %v789_v21, %v420_v4 }
 0x113   : > { %v422_v10 = vadd.f32 %v421_v8, %v396_v40  ;;  %v458_v11 = vadd.f32 %v457_v7, %v443_v6 }
 0x115   : > { %v459_v12 = vadd.f32 %v458_v11, %v444_v9  ;;  %v423_v13 = vadd.f32 %v422_v10, %v399_v49 }
 0x117   : > { %v424_v16 = vadd.f32 %v792_v38, %v423_v13  ;;  %v460_v18 = vadd.f32 %v459_v12, %v445_v14 }
 0x119   : > { %v425_v20 = vadd.f32 %v793_v45, %v424_v16  ;;  %v461_v22 = vadd.f32 %v460_v18, %v446_v15 }
 0x11b   : > { %v426_v23 = vrot.slane %v425_v20, 4  ;;  %v462_v17 = vadd.f32 %v461_v22, %v447_v19 }
 0x11d   : > { %v427_v24 = vadd.f32 %v426_v23, %v425_v20  ;;  %v463_v25 = vrot.slane %v462_v17, 4 }
 0x11f   : > { %v428_v26 = vrot.slane %v427_v24, 2  ;;  %v464_v21 = vadd.f32 %v463_v25, %v462_v17 }
 0x121   : > { %v429_v27 = vadd.f32 %v428_v26, %v427_v24  ;;  %v465_v28 = vrot.slane %v464_v21, 2 }
 0x123   : > { %v430_v29 = vrot.slane %v429_v27, 1  ;;  %v466_v30 = vadd.f32 %v465_v28, %v464_v21 }
 0x125   : > { %v467_v31 = vrot.slane %v466_v30, 1  ;;  %v431_v32 = vadd.f32 %v430_v29, %v429_v27 }
 0x127   : > { %v468_v33 = vadd.f32 %v467_v31, %v466_v30 }
 0x129   : > { %v470_v34 = vsel %vm469_vm0, %v431_v32, %v468_v33 }
 0x12a   : > { %471 = vst [vmem:[%s184_s16] sm:$0x3] %v470_v34 }
 0x12b PF: > { %s14_s12 = sadd.s32 1, %s840_s12  }
 0x12c   : > { %p11_p5 = scmp.ge.s32.totalorder %s14_s12, 4  }
 0x12e   :  { %13 = sbr.rel (!%p11_p5) target bundleno = 1 (0x1), region = 70 }

// kernel: bottleneck_forward.7
= control target key start
LH: loop header
LB: loop body
LE: loop exit
PB: predicated region body
PF: predicated region fallthrough
CT: control target
= control target key end

     0   :  { %s528_s15 = smov 0   ;;  %s644_s0 = inlined_call_operand.vmem [shape: bf16[256,128], index: 0, kind: input, shape index: {}]   ;;  %s645_s1 = inlined_call_operand.vmem [shape: f32[1,128], index: 1, kind: input, shape index: {}]   ;;  %s646_s2 = inlined_call_operand.vmem [shape: f32[1,128], index: 2, kind: input, shape index: {}]   ;;  %s647_s3 = inlined_call_operand.vmem [shape: f32[256,128], index: 3, kind: input, shape index: {}]   ;;  %s648_s4 = inlined_call_operand.vmem [shape: f32[256,128], index: 4, kind: output, shape index: {}]  }
   0x1 LB: > { %s433_s16 = sadd.s32 4294967295, %s501_s15   ;;  %p437_p0 = scmp.ge.s32.totalorder %s501_s15, 1  ;;  %s501_s15 = sphi %s528_s15, %s14_s15  }
   0x2   : > { %p174_p1 = scmp.lt.s32.totalorder %s501_s15, 3 }
   0x4   : > { %p175_p2 = pnand %p437_p0, %p174_p1 }
   0x5   : > { %s438_s17 = sshll.u32 (!%p175_p2), %s433_s16, 4  ;;  %v549_v1 = vld [vmem:[%s645_s1] ss:$0 sm:$0xff] (!%p175_p2) }
   0x6   : > { %178 = sbr.rel (%p175_p2) target bundleno = 41 (0x29), region = 36  ;;  %p206_p3 = scmp.lt.s32.totalorder (!%p175_p2), %s438_s17, 31  ;;  %v562_v5 = vld [vmem:[%s646_s2] ss:$0 sm:$0xff] (!%p175_p2) }
   0xd   : > { %s650_s17 = smov (!%p206_p3, %s438_s17), 31 }
   0xe   : > { %s439_s18 = sshll.u32 %s650_s17, 2  ;;  %s441_s19 = sshll.u32 %s650_s17, 3 }
   0xf   : > { %s543_s22 = scalar_lea.vmem %s644_s0, %s439_s18  ;;  %s556_s27 = scalar_lea.vmem %s647_s3, %s441_s19 }
  0x10   : > { %v449_v0 = vld [vmem:[%s543_s22] sm:$0xff]   ;;  %v480_v4 = vld [vmem:[%s543_s22 + $0x8] sm:$0xff]   ;;  %v481_v8 = vld [vmem:[%s543_s22 + $0x10] sm:$0xff]   ;;  %s593_s6 = scalar_lea.vmem %s648_s4, %s441_s19 }
  0x11   : > { %v450_v2 = vunpack.c.l.bf16 %v449_v0  ;;  %v451_v3 = vunpack.c.h.bf16 %v449_v0  ;;  %v454_v6 = vunpack.c.l.bf16 %v480_v4  ;;  %v455_v7 = vunpack.c.h.bf16 %v480_v4  ;;  %v482_v13 = vld [vmem:[%s543_s22 + $0x18] sm:$0xff]   ;;  %v301_v14 = vld [vmem:[%s556_s27] sm:$0xff]  ;;  %v302_v15 = vld [vmem:[%s556_s27 + $0x8] sm:$0xff] }
  0x12   : > { %v458_v11 = vunpack.c.l.bf16 %v481_v8  ;;  %v459_v12 = vunpack.c.h.bf16 %v481_v8  ;;  %v462_v18 = vunpack.c.l.bf16 %v482_v13  ;;  %v463_v19 = vunpack.c.h.bf16 %v482_v13  ;;  %v303_v22 = vld [vmem:[%s556_s27 + $0x10] sm:$0xff]  ;;  %v304_v23 = vld [vmem:[%s556_s27 + $0x18] sm:$0xff]  ;;  %v305_v28 = vld [vmem:[%s556_s27 + $0x20] sm:$0xff] }
  0x13   : > { %v262_v9 = vmul.f32 %v450_v2, %v549_v1  ;;  %v263_v10 = vmul.f32 %v451_v3, %v549_v1  ;;  %v264_v16 = vmul.f32 %v454_v6, %v549_v1  ;;  %v265_v17 = vmul.f32 %v455_v7, %v549_v1  ;;  %v306_v29 = vld [vmem:[%s556_s27 + $0x28] sm:$0xff]  ;;  %v307_v36 = vld [vmem:[%s556_s27 + $0x30] sm:$0xff]  ;;  %v308_v37 = vld [vmem:[%s556_s27 + $0x38] sm:$0xff] }
  0x14   : > { %v266_v24 = vmul.f32 %v458_v11, %v549_v1  ;;  %v267_v25 = vmul.f32 %v459_v12, %v549_v1  ;;  %v268_v30 = vmul.f32 %v462_v18, %v549_v1  ;;  %v269_v31 = vmul.f32 %v463_v19, %v549_v1  ;;  %v483_v42 = vld [vmem:[%s543_s22 + $0x20] sm:$0xff]   ;;  %v484_v47 = vld [vmem:[%s543_s22 + $0x28] sm:$0xff]   ;;  %v485_v52 = vld [vmem:[%s543_s22 + $0x30] sm:$0xff]  }
  0x15   : > { %v285_v20 = vadd.f32 %v562_v5, %v262_v9  ;;  %v286_v21 = vadd.f32 %v562_v5, %v263_v10  ;;  %v287_v26 = vadd.f32 %v562_v5, %v264_v16  ;;  %v288_v27 = vadd.f32 %v562_v5, %v265_v17  ;;  %v486_v57 = vld [vmem:[%s543_s22 + $0x38] sm:$0xff]   ;;  %v309_v3 = vld [vmem:[%s556_s27 + $0x40] sm:$0xff]  ;;  %v310_v4 = vld [vmem:[%s556_s27 + $0x48] sm:$0xff] }
  0x16   : > { %v289_v34 = vadd.f32 %v562_v5, %v266_v24  ;;  %v290_v35 = vadd.f32 %v562_v5, %v267_v25  ;;  %v291_v40 = vadd.f32 %v562_v5, %v268_v30  ;;  %v292_v41 = vadd.f32 %v562_v5, %v269_v31  ;;  %v311_v12 = vld [vmem:[%s556_s27 + $0x50] sm:$0xff]  ;;  %v312_v13 = vld [vmem:[%s556_s27 + $0x58] sm:$0xff]  ;;  %v313_v18 = vld [vmem:[%s556_s27 + $0x60] sm:$0xff] }
  0x17   : > { %v317_v32 = vadd.f32 %v301_v14, %v285_v20  ;;  %v318_v33 = vadd.f32 %v302_v15, %v286_v21  ;;  %v319_v38 = vadd.f32 %v303_v22, %v287_v26  ;;  %v320_v39 = vadd.f32 %v304_v23, %v288_v27  ;;  %v314_v19 = vld [vmem:[%s556_s27 + $0x68] sm:$0xff]  ;;  %v315_v26 = vld [vmem:[%s556_s27 + $0x70] sm:$0xff]  ;;  %v316_v27 = vld [vmem:[%s556_s27 + $0x78] sm:$0xff] }
  0x18   : > { %v321_v45 = vadd.f32 %v305_v28, %v289_v34  ;;  %v322_v46 = vadd.f32 %v306_v29, %v290_v35  ;;  %v323_v50 = vadd.f32 %v307_v36, %v291_v40  ;;  %v324_v51 = vadd.f32 %v308_v37, %v292_v41 }
  0x19   : > { %v333_v43 = vmax.f32 %v317_v32, 0.0  ;;  %v334_v44 = vmax.f32 %v318_v33, 0.0  ;;  %v335_v48 = vmax.f32 %v319_v38, 0.0  ;;  %v336_v49 = vmax.f32 %v320_v39, 0.0 }
  0x1a   : > { %v337_v53 = vmax.f32 %v321_v45, 0.0  ;;  %v338_v54 = vmax.f32 %v322_v46, 0.0  ;;  %v466_v55 = vunpack.c.l.bf16 %v483_v42  ;;  %v467_v56 = vunpack.c.h.bf16 %v483_v42 }
  0x1b   : > { %349 = vst [vmem:[%s593_s6] sm:$0xff] %v333_v43  ;;  %350 = vst [vmem:[%s593_s6 + $0x8] sm:$0xff] %v334_v44  ;;  %v339_v58 = vmax.f32 %v323_v50, 0.0  ;;  %v340_v59 = vmax.f32 %v324_v51, 0.0  ;;  %v470_v60 = vunpack.c.l.bf16 %v484_v47  ;;  %v471_v61 = vunpack.c.h.bf16 %v484_v47 }
  0x1c   : > { %351 = vst [vmem:[%s593_s6 + $0x10] sm:$0xff] %v335_v48  ;;  %352 = vst [vmem:[%s593_s6 + $0x18] sm:$0xff] %v336_v49  ;;  %v270_v62 = vmul.f32 %v466_v55, %v549_v1  ;;  %v271_v63 = vmul.f32 %v467_v56, %v549_v1  ;;  %v474_v0 = vunpack.c.l.bf16 %v485_v52  ;;  %v475_v2 = vunpack.c.h.bf16 %v485_v52 }
  0x1d   : > { %353 = vst [vmem:[%s593_s6 + $0x20] sm:$0xff] %v337_v53  ;;  %354 = vst [vmem:[%s593_s6 + $0x28] sm:$0xff] %v338_v54  ;;  %v272_v6 = vmul.f32 %v470_v60, %v549_v1  ;;  %v273_v7 = vmul.f32 %v471_v61, %v549_v1  ;;  %v478_v8 = vunpack.c.l.bf16 %v486_v57  ;;  %v479_v9 = vunpack.c.h.bf16 %v486_v57 }
  0x1e   : > { %355 = vst [vmem:[%s593_s6 + $0x30] sm:$0xff] %v339_v58  ;;  %356 = vst [vmem:[%s593_s6 + $0x38] sm:$0xff] %v340_v59  ;;  %v293_v10 = vadd.f32 %v562_v5, %v270_v62  ;;  %v294_v11 = vadd.f32 %v562_v5, %v271_v63  ;;  %v274_v14 = vmul.f32 %v474_v0, %v549_v1 }
  0x1f   : > { %v275_v15 = vmul.f32 %v475_v2, %v549_v1  ;;  %v295_v16 = vadd.f32 %v562_v5, %v272_v6  ;;  %v296_v17 = vadd.f32 %v562_v5, %v273_v7  ;;  %v276_v20 = vmul.f32 %v478_v8, %v549_v1 }
  0x20   : > { %v277_v21 = vmul.f32 %v479_v9, %v549_v1  ;;  %v325_v22 = vadd.f32 %v309_v3, %v293_v10  ;;  %v326_v23 = vadd.f32 %v310_v4, %v294_v11  ;;  %v297_v24 = vadd.f32 %v562_v5, %v274_v14 }
  0x21   : > { %v298_v25 = vadd.f32 %v562_v5, %v275_v15  ;;  %v327_v28 = vadd.f32 %v311_v12, %v295_v16  ;;  %v328_v29 = vadd.f32 %v312_v13, %v296_v17  ;;  %v299_v30 = vadd.f32 %v562_v5, %v276_v20 }
  0x22   : > { %v300_v31 = vadd.f32 %v562_v5, %v277_v21  ;;  %v341_v32 = vmax.f32 %v325_v22, 0.0  ;;  %v342_v1 = vmax.f32 %v326_v23, 0.0  ;;  %v329_v33 = vadd.f32 %v313_v18, %v297_v24 }
  0x23   : > { %v330_v34 = vadd.f32 %v314_v19, %v298_v25  ;;  %v343_v35 = vmax.f32 %v327_v28, 0.0  ;;  %v344_v36 = vmax.f32 %v328_v29, 0.0  ;;  %v331_v37 = vadd.f32 %v315_v26, %v299_v30 }
  0x24   : > { %v332_v38 = vadd.f32 %v316_v27, %v300_v31  ;;  %357 = vst [vmem:[%s593_s6 + $0x40] sm:$0xff] %v341_v32  ;;  %358 = vst [vmem:[%s593_s6 + $0x48] sm:$0xff] %v342_v1  ;;  %v345_v39 = vmax.f32 %v329_v33, 0.0 }
  0x25   : > { %v346_v40 = vmax.f32 %v330_v34, 0.0  ;;  %359 = vst [vmem:[%s593_s6 + $0x50] sm:$0xff] %v343_v35  ;;  %360 = vst [vmem:[%s593_s6 + $0x58] sm:$0xff] %v344_v36  ;;  %v347_v41 = vmax.f32 %v331_v37, 0.0 }
  0x26   : > { %v348_v5 = vmax.f32 %v332_v38, 0.0  ;;  %361 = vst [vmem:[%s593_s6 + $0x60] sm:$0xff] %v345_v39 }
  0x27   : > { %362 = vst [vmem:[%s593_s6 + $0x68] sm:$0xff] %v346_v40  ;;  %363 = vst [vmem:[%s593_s6 + $0x70] sm:$0xff] %v347_v41 }
  0x28   : > { %364 = vst [vmem:[%s593_s6 + $0x78] sm:$0xff] %v348_v5 }
  0x29 PF: > { %s14_s15 = sadd.s32 1, %s501_s15  }
  0x2a   : > { %p11_p4 = scmp.ge.s32.totalorder %s14_s15, 4  }
  0x2c   :  { %13 = sbr.rel (!%p11_p4) target bundleno = 1 (0x1), region = 69 }

// kernel: bottleneck_forward.6
= control target key start
LH: loop header
LB: loop body
LE: loop exit
PB: predicated region body
PF: predicated region fallthrough
CT: control target
= control target key end

     0   :  { %s989_s18 = smov 0   ;;  %s1107_s0 = inlined_call_operand.vmem [shape: bf16[256,128], index: 0, kind: input, shape index: {}]   ;;  %s1108_s1 = inlined_call_operand.vmem [shape: f32[1,128], index: 1, kind: input, shape index: {}]   ;;  %s1109_s2 = inlined_call_operand.vmem [shape: f32[1,128], index: 2, kind: input, shape index: {}]   ;;  %s1110_s3 = inlined_call_operand.vmem [shape: bf16[128,128], index: 3, kind: input, shape index: {}]   ;;  %s1111_s4 = inlined_call_operand.vmem [shape: bf16[256,128], index: 4, kind: output, shape index: {0}]   ;;  %s1112_s5 = inlined_call_operand.vmem [shape: f32[2,2,128], index: 5, kind: output, shape index: {1}]  }
   0x1 LB: > { %s995_s19 = sadd.s32 4294967295, %s957_s18   ;;  %p735_p0 = scmp.ge.s32.totalorder %s957_s18, 1  ;;  %s957_s18 = sphi %s989_s18, %s16_s18  }
   0x2   : > { %p191_p1 = scmp.lt.s32.totalorder %s957_s18, 3 }
   0x4   : > { %p192_p2 = pnand %p735_p0, %p191_p1 }
   0x5   : > { %v943_v0 = vld [vmem:[%s1110_s3] sm:$0xff] (!%p192_p2)   ;;  %s736_s22 = sshll.u32 (!%p192_p2), %s995_s19, 4  ;;  %v944_v1 = vld [vmem:[%s1110_s3 + $0x8] sm:$0xff] (!%p192_p2)   ;;  %v945_v2 = vld [vmem:[%s1110_s3 + $0x10] sm:$0xff] (!%p192_p2)   ;;  %p235_p4 = scmp.lt.s32.totalorder (!%p192_p2), %s995_s19, 1  ;;  %vm561_vm0 = vcmask (!%p192_p2), 1040384  }
   0x6   : > { %195 = sbr.rel (%p192_p2) target bundleno = 299 (0x12b), region = 36  ;;  %p224_p3 = scmp.lt.s32.totalorder (!%p192_p2), %s736_s22, 31  ;;  %887 = vmatprep.subr.bf16.mxu0 (!%p192_p2), %v943_v0  ;;  %919 = vmatprep.subr.bf16.mxu1 (!%p192_p2), %v943_v0  ;;  %v946_v3 = vld [vmem:[%s1110_s3 + $0x18] sm:$0xff] (!%p192_p2)   ;;  %v1026_v5 = vld [vmem:[%s1108_s1] ss:$0 sm:$0xff] (!%p192_p2)  ;;  %v948_v28 = vld [vmem:[%s1110_s3 + $0x28] sm:$0xff] (!%p192_p2)  }
   0x7   : > { %888 = vmatpush3.bf16.msra.mxu0 (!%p192_p2), %v943_v0  ;;  %927 = vmatpush3.bf16.msra.mxu1 (!%p192_p2), %v943_v0  ;;  %v1033_v10 = vld [vmem:[%s1109_s2] ss:$0 sm:$0xff] (!%p192_p2)  ;;  %v949_v44 = vld [vmem:[%s1110_s3 + $0x30] sm:$0xff] (!%p192_p2)   ;;  %v950_v61 = vld [vmem:[%s1110_s3 + $0x38] sm:$0xff] (!%p192_p2)  }
   0x8   : > { %889 = vmatprep.subr.bf16.mxu0 (!%p192_p2), %v944_v1  ;;  %920 = vmatprep.subr.bf16.mxu1 (!%p192_p2), %v944_v1  ;;  %v947_v16 = vld [vmem:[%s1110_s3 + $0x20] sm:$0xff] (!%p192_p2)  }
   0xb   : > { %890 = vmatpush3.bf16.msra.mxu0 (!%p192_p2), %v944_v1  ;;  %928 = vmatpush3.bf16.msra.mxu1 (!%p192_p2), %v944_v1 }
   0xc   : > { %891 = vmatprep.subr.bf16.mxu0 (!%p192_p2), %v945_v2  ;;  %921 = vmatprep.subr.bf16.mxu1 (!%p192_p2), %v945_v2 }
   0xd   : > { %s1114_s22 = smov (!%p224_p3, %s736_s22), 31  ;;  %s1116_s19 = smov (!%p235_p4, %s995_s19), 1 }
   0xe   : > { %s737_s27 = sshll.u32 %s1114_s22, 2  ;;  %s740_s22 = sshll.u32 %s1116_s19, 1 }
   0xf   : > { %s1017_s30 = scalar_lea.vmem %s1107_s0, %s737_s27  ;;  %892 = vmatpush3.bf16.msra.mxu0 %v945_v2  ;;  %929 = vmatpush3.bf16.msra.mxu1 %v945_v2  ;;  %s1089_s25 = scalar_lea.vmem %s1111_s4, %s737_s27 }
  0x10   : > { %v786_v4 = vld [vmem:[%s1017_s30] sm:$0xff]   ;;  %v857_v8 = vld [vmem:[%s1017_s30 + $0x8] sm:$0xff]   ;;  %v858_v9 = vld [vmem:[%s1017_s30 + $0x10] sm:$0xff]   ;;  %893 = vmatprep.subr.bf16.mxu0 %v946_v3  ;;  %922 = vmatprep.subr.bf16.mxu1 %v946_v3  ;;  %s238_s28 = scalar_lea.vmem %s1112_s5, %s740_s22 }
  0x11   : > { %v787_v6 = vunpack.c.l.bf16 %v786_v4  ;;  %v788_v7 = vunpack.c.h.bf16 %v786_v4  ;;  %v791_v11 = vunpack.c.l.bf16 %v857_v8  ;;  %v792_v14 = vunpack.c.h.bf16 %v857_v8  ;;  %v860_v15 = vld [vmem:[%s1017_s30 + $0x20] sm:$0xff]   ;;  %v859_v22 = vld [vmem:[%s1017_s30 + $0x18] sm:$0xff]   ;;  %v861_v27 = vld [vmem:[%s1017_s30 + $0x28] sm:$0xff]  }
  0x12   : > { %v795_v17 = vunpack.c.l.bf16 %v858_v9  ;;  %v796_v21 = vunpack.c.h.bf16 %v858_v9  ;;  %v803_v23 = vunpack.c.l.bf16 %v860_v15  ;;  %v862_v30 = vld [vmem:[%s1017_s30 + $0x30] sm:$0xff]   ;;  %v799_v32 = vunpack.c.l.bf16 %v859_v22  ;;  %v863_v39 = vld [vmem:[%s1017_s30 + $0x38] sm:$0xff]  }
  0x13   : > { %v279_v12 = vmul.f32 %v787_v6, %v1026_v5  ;;  %v280_v13 = vmul.f32 %v788_v7, %v1026_v5  ;;  %v281_v20 = vmul.f32 %v791_v11, %v1026_v5  ;;  %894 = vmatpush3.bf16.msra.mxu0 %v946_v3  ;;  %930 = vmatpush3.bf16.msra.mxu1 %v946_v3  ;;  %v800_v33 = vunpack.c.h.bf16 %v859_v22 }
  0x14   : > { %v282_v26 = vmul.f32 %v792_v14, %v1026_v5  ;;  %895 = vmatprep.subr.bf16.mxu0 %v947_v16  ;;  %923 = vmatprep.subr.bf16.mxu1 %v947_v16  ;;  %v283_v29 = vmul.f32 %v795_v17, %v1026_v5  ;;  %v804_v34 = vunpack.c.h.bf16 %v860_v15  ;;  %v284_v36 = vmul.f32 %v796_v21, %v1026_v5 }
  0x15   : > { %v302_v18 = vadd.f32 %v1033_v10, %v279_v12  ;;  %v303_v19 = vadd.f32 %v1033_v10, %v280_v13  ;;  %v304_v35 = vadd.f32 %v1033_v10, %v281_v20  ;;  %v287_v37 = vmul.f32 %v803_v23, %v1026_v5 }
  0x16   : > { %v807_v38 = vunpack.c.l.bf16 %v861_v27  ;;  %v305_v40 = vadd.f32 %v1033_v10, %v282_v26  ;;  %v288_v41 = vmul.f32 %v804_v34, %v1026_v5  ;;  %v808_v42 = vunpack.c.h.bf16 %v861_v27 }
  0x17   : > { %v318_v24 = vmax.f32 %v302_v18, 0.0  ;;  %v319_v25 = vmax.f32 %v303_v19, 0.0  ;;  %896 = vmatpush3.bf16.msra.mxu0 %v947_v16  ;;  %931 = vmatpush3.bf16.msra.mxu1 %v947_v16  ;;  %v811_v43 = vunpack.c.l.bf16 %v862_v30  ;;  %v306_v45 = vadd.f32 %v1033_v10, %v283_v29 }
  0x18   : > { %897 = vmatprep.subr.bf16.mxu0 %v948_v28  ;;  %v310_v46 = vadd.f32 %v1033_v10, %v287_v37  ;;  %v289_v47 = vmul.f32 %v807_v38, %v1026_v5  ;;  %v812_v48 = vunpack.c.h.bf16 %v862_v30  ;;  %924 = vmatprep.subr.bf16.mxu1 %v948_v28  ;;  %v311_v49 = vadd.f32 %v1033_v10, %v288_v41 }
  0x19   : > { %v334_v31 = vpack.c.bf16 %v319_v25, %v318_v24  ;;  %v290_v50 = vmul.f32 %v808_v42, %v1026_v5  ;;  %v291_v51 = vmul.f32 %v811_v43, %v1026_v5  ;;  %v815_v52 = vunpack.c.l.bf16 %v863_v39 }
  0x1a   : > { %v326_v53 = vmax.f32 %v310_v46, 0.0  ;;  %v312_v54 = vadd.f32 %v1033_v10, %v289_v47  ;;  %v292_v55 = vmul.f32 %v812_v48, %v1026_v5  ;;  %v816_v56 = vunpack.c.h.bf16 %v863_v39 }
  0x1b   : > { %903 = vmatprep.mubr.bf16.mxu0 %v334_v31  ;;  %898 = vmatpush3.bf16.msra.mxu0 %v948_v28  ;;  %v307_v57 = vadd.f32 %v1033_v10, %v284_v36  ;;  %v327_v58 = vmax.f32 %v311_v49, 0.0  ;;  %v313_v59 = vadd.f32 %v1033_v10, %v290_v50  ;;  %v314_v60 = vadd.f32 %v1033_v10, %v291_v51 }
  0x1c   : > { %932 = vmatpush3.bf16.msra.mxu1 %v948_v28  ;;  %899 = vmatprep.subr.bf16.mxu0 %v949_v44  ;;  %v285_v62 = vmul.f32 %v799_v32, %v1026_v5  ;;  %v315_v63 = vadd.f32 %v1033_v10, %v292_v55  ;;  %v320_v0 = vmax.f32 %v304_v35, 0.0  ;;  %v321_v1 = vmax.f32 %v305_v40, 0.0 }
  0x1d   : > { %925 = vmatprep.subr.bf16.mxu1 %v949_v44  ;;  %v286_v2 = vmul.f32 %v800_v33, %v1026_v5  ;;  %v338_v3 = vpack.c.bf16 %v327_v58, %v326_v53  ;;  %v328_v4 = vmax.f32 %v312_v54, 0.0  ;;  %v329_v6 = vmax.f32 %v313_v59, 0.0 }
  0x1e   : > { %v293_v7 = vmul.f32 %v815_v52, %v1026_v5  ;;  %v294_v8 = vmul.f32 %v816_v56, %v1026_v5  ;;  %v322_v9 = vmax.f32 %v306_v45, 0.0  ;;  %v323_v11 = vmax.f32 %v307_v57, 0.0 }
  0x1f   : > { %900 = vmatpush3.bf16.msra.mxu0 %v949_v44  ;;  %v330_v12 = vmax.f32 %v314_v60, 0.0  ;;  %v331_v13 = vmax.f32 %v315_v63, 0.0  ;;  %v308_v14 = vadd.f32 %v1033_v10, %v285_v62  ;;  %v309_v15 = vadd.f32 %v1033_v10, %v286_v2  ;;  %911 = vmatprep.mubr.bf16.mxu1 %v338_v3 }
  0x20   : > { %933 = vmatpush3.bf16.msra.mxu1 %v949_v44  ;;  %901 = vmatprep.subr.bf16.mxu0 %v950_v61  ;;  %v335_v16 = vpack.c.bf16 %v321_v1, %v320_v0  ;;  %v339_v17 = vpack.c.bf16 %v329_v6, %v328_v4  ;;  %v316_v18 = vadd.f32 %v1033_v10, %v293_v7 }
  0x21   : > { %926 = vmatprep.subr.bf16.mxu1 %v950_v61  ;;  %v317_v19 = vadd.f32 %v1033_v10, %v294_v8  ;;  %v336_v5 = vpack.c.bf16 %v323_v11, %v322_v9  ;;  %v340_v20 = vpack.c.bf16 %v331_v13, %v330_v12  ;;  %v324_v21 = vmax.f32 %v308_v14, 0.0 }
  0x22   : > { %v325_v22 = vmax.f32 %v309_v15, 0.0  ;;  %v332_v23 = vmax.f32 %v316_v18, 0.0 }
  0x23   : > { %902 = vmatpush3.bf16.msra.mxu0 %v950_v61  ;;  %v333_v24 = vmax.f32 %v317_v19, 0.0 }
  0x24   : > { %934 = vmatpush3.bf16.msra.mxu1 %v950_v61  ;;  %v337_v25 = vpack.c.bf16 %v325_v22, %v324_v21 }
  0x25   : > { %v341_v26 = vpack.c.bf16 %v333_v24, %v332_v23 }
  0x26   : > { %904 = vmatmul.mubr.bf16.vlgmr.msra.gmra.mrb[0].mxu0 %v335_v16 }
  0x27   : > { %912 = vmatmul.mubr.bf16.vlgmr.msra.gmra.mrb[0].mxu1 %v339_v17  ;;  %907 = vmatprep.mubr.bf16.mxu0 %v336_v5 }
  0x28   : > { %915 = vmatprep.mubr.bf16.mxu1 %v340_v20 }
  0x2e   : > { %908 = vmatmul.mubr.bf16.gmra.mrb[4].mxu0 %v337_v25 }
  0x2f   : > { %916 = vmatmul.mubr.bf16.gmra.mrb[4].mxu1 %v341_v26 }
  0xf9   : > { %v905_v27 = vpop.f32.mrb[0].mxu0 }
  0xfa   : > { %v913_v28 = vpop.f32.mrb[0].mxu1  ;;  %v440_v10 = vpop.f32.mrb[1].mxu0  ;;  %v526_v41 = vmul.f32 %v905_v27, %v905_v27 }
  0xfb   : > { %v472_v29 = vpop.f32.mrb[1].mxu1  ;;  %v906_v30 = vpop.f32.mrb[2].mxu0  ;;  %v524_v36 = vmul.f32 %v440_v10, %v440_v10  ;;  %v534_v15 = vmul.f32 %v913_v28, %v913_v28 }
  0xfc   : > { %v914_v31 = vpop.f32.mrb[2].mxu1  ;;  %v825_v32 = vpack.c.bf16 %v906_v30, %v905_v27  ;;  %v443_v33 = vpop.f32.mrb[3].mxu0  ;;  %v527_v44 = vmul.f32 %v906_v30, %v906_v30  ;;  %v532_v8 = vmul.f32 %v472_v29, %v472_v29 }
  0xfd   : > { %v845_v34 = vpack.c.bf16 %v914_v31, %v913_v28  ;;  %v475_v35 = vpop.f32.mrb[3].mxu1  ;;  %v503_v37 = vadd.f32 %v443_v33, %v440_v10  ;;  %v525_v38 = vmul.f32 %v443_v33, %v443_v33  ;;  %v820_v39 = vpack.c.bf16 %v443_v33, %v440_v10 }
  0xfe   : > { %864 = vst [vmem:[%s1089_s25 + $0x8] sm:$0xff] %v825_v32   ;;  %v840_v40 = vpack.c.bf16 %v475_v35, %v472_v29  ;;  %v533_v14 = vmul.f32 %v475_v35, %v475_v35  ;;  %v535_v18 = vmul.f32 %v914_v31, %v914_v31 }
  0xff   : > { %868 = vst [vmem:[%s1089_s25 + $0x28] sm:$0xff] %v845_v34   ;;  %v504_v42 = vadd.f32 %v905_v27, %v503_v37  ;;  %v540_v43 = vadd.f32 %v525_v38, %v524_v36  ;;  %821 = vst [vmem:[%s1089_s25] sm:$0xff] %v820_v39  }
 0x100   : > { %867 = vst [vmem:[%s1089_s25 + $0x20] sm:$0xff] %v840_v40  }
 0x101   : > { %v541_v45 = vadd.f32 %v540_v43, %v526_v41  ;;  %v909_v46 = vpop.f32.mrb[4].mxu0  ;;  %v505_v47 = vadd.f32 %v906_v30, %v504_v42 }
 0x102   : > { %v917_v48 = vpop.f32.mrb[4].mxu1  ;;  %v456_v49 = vpop.f32.mrb[5].mxu0  ;;  %v530_v1 = vmul.f32 %v909_v46, %v909_v46 }
 0x103   : > { %v488_v50 = vpop.f32.mrb[5].mxu1  ;;  %v506_v51 = vadd.f32 %v505_v47, %v456_v49  ;;  %v528_v52 = vmul.f32 %v456_v49, %v456_v49  ;;  %v542_v53 = vadd.f32 %v541_v45, %v527_v44  ;;  %v910_v54 = vpop.f32.mrb[6].mxu0  ;;  %v538_v26 = vmul.f32 %v917_v48, %v917_v48 }
 0x104   : > { %v918_v55 = vpop.f32.mrb[6].mxu1  ;;  %v835_v56 = vpack.c.bf16 %v910_v54, %v909_v46  ;;  %v459_v57 = vpop.f32.mrb[7].mxu0  ;;  %v531_v4 = vmul.f32 %v910_v54, %v910_v54  ;;  %v536_v20 = vmul.f32 %v488_v50, %v488_v50 }
 0x105   : > { %v855_v58 = vpack.c.bf16 %v918_v55, %v917_v48  ;;  %v491_v59 = vpop.f32.mrb[7].mxu1  ;;  %v543_v60 = vadd.f32 %v542_v53, %v528_v52  ;;  %v507_v61 = vadd.f32 %v506_v51, %v459_v57  ;;  %v529_v62 = vmul.f32 %v459_v57, %v459_v57 }
 0x106   : > { %v830_v63 = vpack.c.bf16 %v459_v57, %v456_v49  ;;  %866 = vst [vmem:[%s1089_s25 + $0x18] sm:$0xff] %v835_v56   ;;  %v850_v0 = vpack.c.bf16 %v491_v59, %v488_v50  ;;  %v537_v25 = vmul.f32 %v491_v59, %v491_v59 }
 0x107   : > { %870 = vst [vmem:[%s1089_s25 + $0x38] sm:$0xff] %v855_v58   ;;  %v508_v2 = vadd.f32 %v909_v46, %v507_v61  ;;  %v544_v3 = vadd.f32 %v543_v60, %v529_v62 }
 0x108   : > { %865 = vst [vmem:[%s1089_s25 + $0x10] sm:$0xff] %v830_v63   ;;  %869 = vst [vmem:[%s1089_s25 + $0x30] sm:$0xff] %v850_v0  }
 0x109   : > { %v545_v6 = vadd.f32 %v544_v3, %v530_v1  ;;  %v509_v7 = vadd.f32 %v910_v54, %v508_v2 }
 0x10b   : > { %v510_v9 = vadd.f32 %v509_v7, %v472_v29  ;;  %v546_v11 = vadd.f32 %v545_v6, %v531_v4  ;;  %v539_v29 = vmul.f32 %v918_v55, %v918_v55 }
 0x10d   : > { %v547_v12 = vadd.f32 %v546_v11, %v532_v8  ;;  %v511_v13 = vadd.f32 %v510_v9, %v475_v35 }
 0x10f   : > { %v512_v16 = vadd.f32 %v913_v28, %v511_v13  ;;  %v548_v17 = vadd.f32 %v547_v12, %v533_v14 }
 0x111   : > { %v549_v19 = vadd.f32 %v548_v17, %v534_v15  ;;  %v513_v5 = vadd.f32 %v914_v31, %v512_v16 }
 0x113   : > { %v514_v21 = vadd.f32 %v513_v5, %v488_v50  ;;  %v550_v22 = vadd.f32 %v549_v19, %v535_v18 }
 0x115   : > { %v551_v23 = vadd.f32 %v550_v22, %v536_v20  ;;  %v515_v24 = vadd.f32 %v514_v21, %v491_v59 }
 0x117   : > { %v516_v27 = vadd.f32 %v917_v48, %v515_v24  ;;  %v552_v10 = vadd.f32 %v551_v23, %v537_v25 }
 0x119   : > { %v517_v30 = vadd.f32 %v918_v55, %v516_v27  ;;  %v553_v32 = vadd.f32 %v552_v10, %v538_v26 }
 0x11b   : > { %v518_v33 = vrot.slane %v517_v30, 4  ;;  %v554_v28 = vadd.f32 %v553_v32, %v539_v29 }
 0x11d   : > { %v519_v34 = vadd.f32 %v518_v33, %v517_v30  ;;  %v555_v35 = vrot.slane %v554_v28, 4 }
 0x11f   : > { %v520_v36 = vrot.slane %v519_v34, 2  ;;  %v556_v31 = vadd.f32 %v555_v35, %v554_v28 }
 0x121   : > { %v521_v37 = vadd.f32 %v520_v36, %v519_v34  ;;  %v557_v38 = vrot.slane %v556_v31, 2 }
 0x123   : > { %v522_v39 = vrot.slane %v521_v37, 1  ;;  %v558_v40 = vadd.f32 %v557_v38, %v556_v31 }
 0x125   : > { %v559_v41 = vrot.slane %v558_v40, 1  ;;  %v523_v42 = vadd.f32 %v522_v39, %v521_v37 }
 0x127   : > { %v560_v43 = vadd.f32 %v559_v41, %v558_v40 }
 0x129   : > { %v562_v44 = vsel %vm561_vm0, %v523_v42, %v560_v43 }
 0x12a   : > { %563 = vst [vmem:[%s238_s28] sm:$0x3] %v562_v44 }
 0x12b PF: > { %s16_s18 = sadd.s32 1, %s957_s18  }
 0x12c   : > { %p13_p5 = scmp.ge.s32.totalorder %s16_s18, 4  }
 0x12e   :  { %15 = sbr.rel (!%p13_p5) target bundleno = 1 (0x1), region = 78 }

// kernel: bottleneck_forward.5
= control target key start
LH: loop header
LB: loop body
LE: loop exit
PB: predicated region body
PF: predicated region fallthrough
CT: control target
= control target key end

     0   :  { %s4932_s18 = smov 0   ;;  %s6105_s0 = inlined_call_operand.vmem [shape: bf16[2,8,16,128], index: 0, kind: input, shape index: {}]   ;;  %s6106_s1 = inlined_call_operand.vmem [shape: f32[1,128], index: 1, kind: input, shape index: {}]   ;;  %s6107_s2 = inlined_call_operand.vmem [shape: f32[1,128], index: 2, kind: input, shape index: {}]   ;;  %s6108_s3 = inlined_call_operand.vmem [shape: bf16[9,128,128], index: 3, kind: input, shape index: {}]   ;;  %s6109_s4 = inlined_call_operand.vmem [shape: bf16[2,128,128], index: 4, kind: output, shape index: {0}]   ;;  %s6110_s5 = inlined_call_operand.vmem [shape: f32[2,2,128], index: 5, kind: output, shape index: {1}]  }
   0x1 LB: > { %s3735_s19 = sadd.s32 4294967295, %s4899_s18   ;;  %p3739_p0 = scmp.ge.s32.totalorder %s4899_s18, 1  ;;  %s4899_s18 = sphi %s4932_s18, %s16_s18  }
   0x2   : > { %p190_p1 = scmp.lt.s32.totalorder %s4899_s18, 3 }
   0x4   : > { %p191_p2 = pnand %p3739_p0, %p190_p1 }
   0x6   : > { %194 = sbr.rel (%p191_p2) target bundleno = 531 (0x213), region = 36 }
   0xd   : > { %v4782_v0 = vld [vmem:[%s6108_s3 + $0x40] sm:$0xff]   ;;  %v4901_v2 = vmov 0   ;;  %v4784_v3 = vld [vmem:[%s6108_s3 + $0x48] sm:$0xff]   ;;  %v4786_v5 = vld [vmem:[%s6108_s3 + $0x50] sm:$0xff]   ;;  %p222_p3 = scmp.lt.s32.totalorder %s3735_s19, 1  ;;  %vm347_vm2 = vcmask 1040384  }
   0xe   : > { %v4783_v1 = vld [vmem:[%s6108_s3 + $0x100] sm:$0xff]   ;;  %339 = vst [vmem:[#allocation2] sm:$0xf] %v4901_v2  ;;  %340 = vst [vmem:[#allocation2 + $0x4] sm:$0xf] %v4901_v2  ;;  %4341 = vmatprep.subr.bf16.mxu1 %v4782_v0  ;;  %v4785_v4 = vld [vmem:[%s6108_s3 + $0x108] sm:$0xff]  }
   0xf   : > { %341 = vst [vmem:[#allocation2 + $0x8] sm:$0x1] %v4901_v2  ;;  %343 = vst [vmem:[#allocation2 + $0x6c] sm:$0xf] %v4901_v2  ;;  %4469 = vmatprep.subr.bf16.mxu0 %v4783_v1  ;;  %4342 = vmatpush3.bf16.msra.mxu1 %v4782_v0  ;;  %v4787_v6 = vld [vmem:[%s6108_s3 + $0x110] sm:$0xff]   ;;  %v4788_v7 = vld [vmem:[%s6108_s3 + $0x58] sm:$0xff]  }
  0x10   : > { %344 = vst [vmem:[#allocation2 + $0x70] sm:$0xf] %v4901_v2  ;;  %345 = vst [vmem:[#allocation2 + $0x74] sm:$0x1] %v4901_v2  ;;  %4470 = vmatpush3.bf16.msra.mxu0 %v4783_v1  ;;  %4343 = vmatprep.subr.bf16.mxu1 %v4784_v3  ;;  %s6128_s19 = smov (!%p222_p3, %s3735_s19), 1  ;;  %v4789_v8 = vld [vmem:[%s6108_s3 + $0x118] sm:$0xff]  }
  0x11   : > { %4471 = vmatprep.subr.bf16.mxu0 %v4785_v4  ;;  %v4790_v9 = vld [vmem:[%s6108_s3 + $0x60] sm:$0xff]   ;;  %s4077_s13 = sshll.u32 %s6128_s19, 6  ;;  %v4792_v11 = vld [vmem:[%s6108_s3 + $0x68] sm:$0xff]   ;;  %vm700_vm0 = vsmask.f32 3328  ;;  %v4794_v18 = vld [vmem:[%s6108_s3 + $0x70] sm:$0xff]  }
  0x12   : > { %v4791_v10 = vld [vmem:[%s6108_s3 + $0x120] sm:$0xff]   ;;  %v4793_v12 = vld [vmem:[%s6108_s3 + $0x128] sm:$0xff]   ;;  %s4984_s24 = scalar_lea.vmem %s6105_s0, %s4077_s13  ;;  %vm701_vm1 = vsmask.f32 7440  ;;  %v4795_v29 = vld [vmem:[%s6108_s3 + $0x130] sm:$0xff]   ;;  %vm602_vm9 = vcmask 1043456   ;;  %s6041_s25 = scalar_lea.vmem %s6109_s4, %s4077_s13 }
  0x13   : > { %4344 = vmatpush3.bf16.msra.mxu1 %v4784_v3  ;;  %v4112_v22 = vld [vmem:[%s4984_s24] sm:$0xff]   ;;  %vm5005_vm3 = vmor %vm700_vm0, %vm701_vm1  ;;  %vm348_vm4 = vsmask.f32 256  ;;  %v350_v38 = vld [vmem:[#allocation2 + $0xc] sm:$0x1]  ;;  %vm1306_vm12 = vcmask 1042432  }
  0x14   : > { %4472 = vmatpush3.bf16.msra.mxu0 %v4785_v4  ;;  %4345 = vmatprep.subr.bf16.mxu1 %v4786_v5  ;;  %v4113_v25 = vunpack.c.l.bf16 %v4112_v22  ;;  %v4114_v26 = vunpack.c.h.bf16 %v4112_v22  ;;  %v4993_v27 = vld [vmem:[%s6106_s1] ss:$0 sm:$0xff]  ;;  %vm5013_vm5 = vmand %vm347_vm2, %vm348_vm4  ;;  %vm374_vm6 = vsmask.f32 7938  ;;  %v376_v39 = vld [vmem:[#allocation2 + $0x14] sm:$0x1] }
  0x15   : > { %4473 = vmatprep.subr.bf16.mxu0 %v4787_v6  ;;  %v660_v13 = vld [vmem:[#allocation2] sm:$0xf]  ;;  %v661_v14 = vld [vmem:[#allocation2 + $0x4] sm:$0xf]  ;;  %v351_v41 = vsel %vm5013_vm5, 0, %v350_v38  ;;  %vm5021_vm7 = vmand %vm347_vm2, %vm374_vm6  ;;  %vm1307_vm13 = vcmask 1046532  }
  0x16   : > { %v692_v15 = vld [vmem:[#allocation2 + $0x8] sm:$0x1]  ;;  %v704_v16 = vshrl.u32 %v660_v13, 16  ;;  %v707_v17 = vshll.u32 %v660_v13, 16  ;;  %v713_v19 = vshll.u32 %v661_v14, 16  ;;  %v717_v20 = vshrl.u32 %v661_v14, 16  ;;  %vm5069_vm11 = vmand %vm602_vm9, %vm374_vm6 }
  0x17   : > { %4346 = vmatpush3.bf16.msra.mxu1 %v4786_v5  ;;  %v723_v21 = vshll.u32 %v692_v15, 16  ;;  %v4998_v28 = vld [vmem:[%s6107_s2] ss:$0 sm:$0xff]  ;;  %v276_v35 = vmul.f32 %v4113_v25, %v4993_v27  ;;  %v277_v36 = vmul.f32 %v4114_v26, %v4993_v27  ;;  %vm440_vm8 = vsmask.f32 4368  ;;  %v4183_v43 = vld [vmem:[%s4984_s24 + $0x8] sm:$0xff]   ;;  %vm5407_vm14 = vmor %vm1306_vm12, %vm1307_vm13 }
  0x18   : > { %4474 = vmatpush3.bf16.msra.mxu0 %v4787_v6  ;;  %4347 = vmatprep.subr.bf16.mxu1 %v4788_v7  ;;  %v706_v23 = vrot.slane %v704_v16, 4  ;;  %v709_v24 = vrot.slane %v707_v17, 5  ;;  %v715_v31 = vrot.slane %v713_v19, 5  ;;  %v719_v32 = vrot.slane %v717_v20, 4  ;;  %352 = vst [vmem:[#allocation2 + $0xc] sm:$0x1] %v351_v41  ;;  %vm5061_vm10 = vmor %vm348_vm4, %vm440_vm8 }
  0x19   : > { %4475 = vmatprep.subr.bf16.mxu0 %v4789_v8  ;;  %v725_v33 = vrot.slane %v723_v21, 5  ;;  %v299_v45 = vadd.f32 %v4998_v28, %v276_v35  ;;  %v300_v46 = vadd.f32 %v4998_v28, %v277_v36  ;;  %v377_v47 = vsel %vm5021_vm7, 0, %v376_v39  ;;  %v4796_v48 = vld [vmem:[%s6108_s3 + $0x78] sm:$0xff]   ;;  %v379_v58 = vld [vmem:[#allocation2 + $0x20] sm:$0x1]  ;;  %v4184_v4 = vld [vmem:[%s4984_s24 + $0x10] sm:$0xff]  }
  0x1a   : > { %v710_v34 = vor.u32 %v709_v24, %v706_v23  ;;  %v720_v40 = vor.u32 %v719_v32, %v715_v31  ;;  %378 = vst [vmem:[#allocation2 + $0x14] sm:$0x1] %v377_v47  ;;  %v4117_v50 = vunpack.c.l.bf16 %v4183_v43  ;;  %v4118_v51 = vunpack.c.h.bf16 %v4183_v43  ;;  %v353_v52 = vld [vmem:[#allocation2 + $0x18] sm:$0x1]  ;;  %v5045_v60 = vld [vmem:[%s6108_s3] sm:$0xff]   ;;  %s3744_s13 = sshll.u32 %s6128_s19, 1 }
  0x1b   : > { %4348 = vmatpush3.bf16.msra.mxu1 %v4788_v7  ;;  %v4797_v53 = vld [vmem:[%s6108_s3 + $0x138] sm:$0xff]   ;;  %v315_v55 = vmax.f32 %v299_v45, 0.0  ;;  %v316_v56 = vmax.f32 %v300_v46, 0.0  ;;  %v354_v57 = vsel %vm5013_vm5, 0, %v353_v52  ;;  %v380_v63 = vsel %vm5021_vm7, 0, %v379_v58  ;;  %v5054_v3 = vld [vmem:[%s6108_s3 + $0x140] sm:$0xff]   ;;  %s235_s27 = scalar_lea.vmem %s6110_s5, %s3744_s13 }
  0x1c   : > { %4476 = vmatpush3.bf16.msra.mxu0 %v4789_v8  ;;  %4349 = vmatprep.subr.bf16.mxu1 %v4790_v9  ;;  %v711_v44 = vrot.slane %v710_v34, 4  ;;  %v721_v49 = vrot.slane %v720_v40, 4  ;;  %v278_v61 = vmul.f32 %v4117_v50, %v4993_v27  ;;  %v279_v62 = vmul.f32 %v4118_v51, %v4993_v27  ;;  %355 = vst [vmem:[#allocation2 + $0x18] sm:$0x1] %v354_v57  ;;  %v4185_v38 = vld [vmem:[%s4984_s24 + $0x18] sm:$0xff]  }
  0x1d   : > { %4477 = vmatprep.subr.bf16.mxu0 %v4791_v10  ;;  %v4079_v1 = vpack.c.bf16 %v315_v55, %v315_v55  ;;  %v4080_v2 = vpack.c.bf16 %v316_v56, %v316_v56  ;;  %381 = vst [vmem:[#allocation2 + $0x20] sm:$0x1] %v380_v63  ;;  %v4121_v7 = vunpack.c.l.bf16 %v4184_v4  ;;  %v4122_v8 = vunpack.c.h.bf16 %v4184_v4  ;;  %v385_v51 = vld [vmem:[#allocation2 + $0x38] sm:$0x1] }
  0x1e   : > { %v716_v54 = vsel %vm5005_vm3, %v711_v44, %v715_v31  ;;  %v726_v59 = vsel %vm5005_vm3, %v721_v49, %v725_v33  ;;  %v301_v5 = vadd.f32 %v4998_v28, %v278_v61  ;;  %v302_v6 = vadd.f32 %v4998_v28, %v279_v62  ;;  %v359_v44 = vld [vmem:[#allocation2 + $0x30] sm:$0x1] }
  0x1f   : > { %4350 = vmatpush3.bf16.msra.mxu1 %v4790_v9  ;;  %v3779_v0 = vcombine.low %v716_v54, %v726_v59  ;;  %v356_v9 = vld [vmem:[#allocation2 + $0x24] sm:$0x1]  ;;  %v451_v13 = vshrl.u32 %v4080_v2, 16  ;;  %v454_v14 = vshll.u32 %v4080_v2, 16  ;;  %v281_v19 = vmul.f32 %v4122_v8, %v4993_v27  ;;  %v604_v23 = vld [vmem:[#allocation2 + $0xc] sm:$0xf] }
  0x20   : > { %4478 = vmatpush3.bf16.msra.mxu0 %v4791_v10  ;;  %4351 = vmatprep.subr.bf16.mxu1 %v4792_v11  ;;  %v382_v10 = vld [vmem:[#allocation2 + $0x2c] sm:$0x1]  ;;  %v317_v16 = vmax.f32 %v301_v5, 0.0  ;;  %v318_v17 = vmax.f32 %v302_v6, 0.0  ;;  %v357_v24 = vsel %vm5013_vm5, 0, %v356_v9  ;;  %v4125_v55 = vunpack.c.l.bf16 %v4185_v38 }
  0x21   : > { %4479 = vmatprep.subr.bf16.mxu0 %v4793_v12  ;;  %4357 = vmatprep.mubr.bf16.mxu1 %v3779_v0  ;;  %v453_v21 = vrot.slane %v451_v13, 7  ;;  %v383_v25 = vsel %vm5021_vm7, 0, %v382_v10  ;;  %v608_v26 = vld [vmem:[#allocation2 + $0x14] sm:$0x1]  ;;  %358 = vst [vmem:[#allocation2 + $0x24] sm:$0x1] %v357_v24  ;;  %v304_v50 = vadd.f32 %v4998_v28, %v281_v19  ;;  %v4126_v57 = vunpack.c.h.bf16 %v4185_v38 }
  0x22   : > { %v4082_v31 = vpack.c.bf16 %v318_v17, %v318_v17  ;;  %384 = vst [vmem:[#allocation2 + $0x2c] sm:$0x1] %v383_v25  ;;  %v360_v58 = vsel %vm5013_vm5, 0, %v359_v44  ;;  %v386_v59 = vsel %vm5021_vm7, 0, %v385_v51  ;;  %v282_v5 = vmul.f32 %v4125_v55, %v4993_v27 }
  0x23   : > { %4352 = vmatpush3.bf16.msra.mxu1 %v4792_v11  ;;  %v443_v11 = vshrl.u32 %v4079_v1, 16  ;;  %v456_v35 = vor.u32 %v454_v14, %v453_v21  ;;  %v458_v36 = vrot.slane %v453_v21, 4  ;;  %v320_v56 = vmax.f32 %v304_v50, 0.0  ;;  %361 = vst [vmem:[#allocation2 + $0x30] sm:$0x1] %v360_v58 }
  0x24   : > { %4480 = vmatpush3.bf16.msra.mxu0 %v4793_v12  ;;  %4353 = vmatprep.subr.bf16.mxu1 %v4794_v18  ;;  %v446_v12 = vshll.u32 %v4079_v1, 16  ;;  %v468_v41 = vshrl.u32 %v4082_v31, 16  ;;  %v471_v43 = vshll.u32 %v4082_v31, 16  ;;  %v615_v49 = vld [vmem:[#allocation2 + $0x20] sm:$0x1]  ;;  %v283_v6 = vmul.f32 %v4126_v57, %v4993_v27 }
  0x25   : > { %4481 = vmatprep.subr.bf16.mxu0 %v4795_v29  ;;  %v445_v20 = vrot.slane %v443_v11, 7  ;;  %v609_v47 = vsel %vm5013_vm5, %v458_v36, %v608_v26  ;;  %387 = vst [vmem:[#allocation2 + $0x38] sm:$0x1] %v386_v59  ;;  %v4186_v1 = vld [vmem:[%s4984_s24 + $0x20] sm:$0xff]   ;;  %v5095_v4 = vpack.c.bf16 %v320_v56, %v320_v56 }
  0x26   : > { %610 = vst [vmem:[#allocation2 + $0x14] sm:$0x1] %v609_v47  ;;  %v4129_v10 = vunpack.c.l.bf16 %v4186_v1  ;;  %v5116_v21 = vadd.f32 %v4998_v28, %v283_v6 }
  0x27   : > { %4354 = vmatpush3.bf16.msra.mxu1 %v4794_v18  ;;  %v280_v18 = vmul.f32 %v4121_v7, %v4993_v27  ;;  %v448_v33 = vor.u32 %v446_v12, %v445_v20  ;;  %v449_v34 = vrot.slane %v445_v20, 4  ;;  %v485_v13 = vshrl.u32 %v5095_v4, 16 }
  0x28   : > { %4482 = vmatpush3.bf16.msra.mxu0 %v4795_v29  ;;  %4355 = vmatprep.subr.bf16.mxu1 %v4796_v48  ;;  %v4081_v29 = vpack.c.bf16 %v317_v16, %v317_v16  ;;  %v488_v14 = vshll.u32 %v5095_v4, 16  ;;  %v5110_v16 = vld [vmem:[%s4984_s24 + $0x28] sm:$0xff]   ;;  %v5113_v20 = vadd.f32 %v4998_v28, %v282_v5 }
  0x29   : > { %4483 = vmatprep.subr.bf16.mxu0 %v4797_v53  ;;  %v303_v32 = vadd.f32 %v4998_v28, %v280_v18  ;;  %v457_v45 = vsel %vm5061_vm10, %v449_v34, %v456_v35  ;;  %v605_v46 = vsel %vm5069_vm11, %v448_v33, %v604_v23  ;;  %v4130_v23 = vunpack.c.h.bf16 %v4186_v1 }
  0x2a   : > { %v460_v39 = vshrl.u32 %v4081_v29, 16  ;;  %v463_v40 = vshll.u32 %v4081_v29, 16  ;;  %606 = vst [vmem:[#allocation2 + $0xc] sm:$0xf] %v605_v46  ;;  %607 = vst [vmem:[#allocation2 + $0x10] sm:$0xf] %v457_v45  ;;  %v284_v35 = vmul.f32 %v4129_v10, %v4993_v27  ;;  %v4133_v36 = vunpack.c.l.bf16 %v5110_v16 }
  0x2b   : > { %4356 = vmatpush3.bf16.msra.mxu1 %v4796_v48  ;;  %v611_v48 = vld [vmem:[#allocation2 + $0x18] sm:$0xf]  ;;  %v319_v54 = vmax.f32 %v303_v32, 0.0  ;;  %v4134_v38 = vunpack.c.h.bf16 %v5110_v16  ;;  %v5124_v57 = vmul.f32 %v4130_v23, %v4993_v27 }
  0x2c   : > { %4484 = vmatpush3.bf16.msra.mxu0 %v4797_v53  ;;  %4373 = vmatprep.subr.bf16.mxu1 %v5045_v60  ;;  %v462_v52 = vrot.slane %v460_v39, 7  ;;  %v470_v53 = vrot.slane %v468_v41, 7 }
  0x2d   : > { %4501 = vmatprep.subr.bf16.mxu0 %v5054_v3  ;;  %v5093_v2 = vpack.c.bf16 %v319_v54, %v319_v54  ;;  %v693_v19 = vld [vmem:[#allocation2 + $0x14] sm:$0x1] }
  0x2e   : > { %v465_v61 = vor.u32 %v463_v40, %v462_v52  ;;  %v466_v62 = vrot.slane %v462_v52, 4  ;;  %v473_v63 = vor.u32 %v471_v43, %v470_v53  ;;  %v475_v0 = vrot.slane %v470_v53, 4  ;;  %v1819_v34 = vld [vmem:[#allocation2 + $0x14] sm:$0x1] }
  0x2f   : > { %v477_v11 = vshrl.u32 %v5093_v2, 16  ;;  %v480_v12 = vshll.u32 %v5093_v2, 16  ;;  %v747_v32 = vshll.u32 %v693_v19, 16  ;;  %v1861_v51 = vshll.u32 %v1819_v34, 16 }
  0x30   : > { %v474_v7 = vsel %vm5061_vm10, %v466_v62, %v473_v63  ;;  %v612_v8 = vsel %vm5069_vm11, %v465_v61, %v611_v48  ;;  %v616_v9 = vsel %vm5013_vm5, %v475_v0, %v615_v49 }
  0x31   : > { %613 = vst [vmem:[#allocation2 + $0x18] sm:$0xf] %v612_v8  ;;  %614 = vst [vmem:[#allocation2 + $0x1c] sm:$0xf] %v474_v7  ;;  %v662_v17 = vld [vmem:[#allocation2 + $0xc] sm:$0xf] }
  0x32   : > { %617 = vst [vmem:[#allocation2 + $0x20] sm:$0x1] %v616_v9  ;;  %v663_v18 = vld [vmem:[#allocation2 + $0x10] sm:$0xf]  ;;  %v728_v24 = vshrl.u32 %v662_v17, 16  ;;  %v731_v25 = vshll.u32 %v662_v17, 16 }
  0x33   : > { %v737_v26 = vshll.u32 %v663_v18, 16  ;;  %v741_v29 = vshrl.u32 %v663_v18, 16  ;;  %v1817_v31 = vld [vmem:[#allocation2 + $0xc] sm:$0xf]  ;;  %v1818_v33 = vld [vmem:[#allocation2 + $0x10] sm:$0xf] }
  0x34   : > { %v730_v39 = vrot.slane %v728_v24, 4  ;;  %v733_v40 = vrot.slane %v731_v25, 5  ;;  %v749_v44 = vrot.slane %v747_v32, 5  ;;  %v1842_v45 = vshrl.u32 %v1817_v31, 16  ;;  %v4800_v25 = vld [vmem:[%s6108_s3 + $0x8] sm:$0xff]  }
  0x35   : > { %v739_v41 = vrot.slane %v737_v26, 5  ;;  %v743_v43 = vrot.slane %v741_v29, 4  ;;  %v1845_v46 = vshll.u32 %v1817_v31, 16  ;;  %v1851_v47 = vshll.u32 %v1818_v33, 16 }
  0x36   : > { %v734_v48 = vor.u32 %v733_v40, %v730_v39  ;;  %v1855_v50 = vshrl.u32 %v1818_v33, 16  ;;  %v1844_v54 = vrot.slane %v1842_v45, 4  ;;  %v1863_v62 = vrot.slane %v1861_v51, 5 }
  0x37   : > { %v744_v49 = vor.u32 %v743_v43, %v739_v41  ;;  %v1847_v55 = vrot.slane %v1845_v46, 5  ;;  %v1853_v56 = vrot.slane %v1851_v47, 5 }
  0x38   : > { %v1820_v52 = vld [vmem:[#allocation2 + $0x18] sm:$0xf]  ;;  %v5121_v53 = vld [vmem:[#allocation2 + $0x1c] sm:$0xf]  ;;  %v735_v58 = vrot.slane %v734_v48, 4  ;;  %v1857_v61 = vrot.slane %v1855_v50, 4 }
  0x39   : > { %v745_v59 = vrot.slane %v744_v49, 4  ;;  %v1848_v63 = vor.u32 %v1847_v55, %v1844_v54  ;;  %v5126_v0 = vld [vmem:[#allocation2 + $0x20] sm:$0x1]  ;;  %v1866_v1 = vshrl.u32 %v1820_v52, 16  ;;  %v1869_v5 = vshll.u32 %v1820_v52, 16 }
  0x3a   : > { %v1875_v6 = vshll.u32 %v5121_v53, 16  ;;  %v740_v7 = vsel %vm5005_vm3, %v735_v58, %v739_v41  ;;  %v1858_v9 = vor.u32 %v1857_v61, %v1853_v56  ;;  %v1879_v10 = vshrl.u32 %v5121_v53, 16  ;;  %v664_v17 = vld [vmem:[#allocation2 + $0x18] sm:$0xf]  ;;  %v665_v26 = vld [vmem:[#allocation2 + $0x1c] sm:$0xf] }
  0x3b   : > { %v750_v8 = vsel %vm5005_vm3, %v745_v59, %v749_v44  ;;  %v1849_v19 = vrot.slane %v1848_v63, 4  ;;  %v1868_v23 = vrot.slane %v1866_v1, 4  ;;  %v1871_v24 = vrot.slane %v1869_v5, 5  ;;  %v694_v46 = vld [vmem:[#allocation2 + $0x20] sm:$0x1]  ;;  %v4801_v1 = vld [vmem:[%s6108_s3 + $0x148] sm:$0xff]  }
  0x3c   : > { %v3780_v18 = vcombine.low %v740_v7, %v750_v8  ;;  %v1859_v29 = vrot.slane %v1858_v9, 4  ;;  %v1877_v31 = vrot.slane %v1875_v6, 5  ;;  %v1881_v32 = vrot.slane %v1879_v10, 4  ;;  %v618_v58 = vld [vmem:[#allocation2 + $0x24] sm:$0xf] }
  0x3d   : > { %v1885_v33 = vshll.u32 %v5126_v0, 16  ;;  %v1854_v34 = vsel %vm5005_vm3, %v1849_v19, %v1853_v56  ;;  %v1872_v39 = vor.u32 %v1871_v24, %v1868_v23  ;;  %v2284_v40 = vrot.slane %v5121_v53, 5  ;;  %v362_v19 = vld [vmem:[#allocation2 + $0x3c] sm:$0x1]  ;;  %v388_v23 = vld [vmem:[#allocation2 + $0x44] sm:$0x1] }
  0x3e   : > { %4358 = vmatmul.mubr.bf16.vlgmr.msra.gmra.mrb[0].mxu1 %v3780_v18  ;;  %v5142_v41 = vadd.f32 %v4998_v28, %v284_v35  ;;  %v1864_v43 = vsel %vm5005_vm3, %v1859_v29, %v1863_v62  ;;  %v1882_v44 = vor.u32 %v1881_v32, %v1877_v31  ;;  %v752_v47 = vshrl.u32 %v664_v17, 16  ;;  %v4802_v35 = vld [vmem:[%s6108_s3 + $0x10] sm:$0xff]   ;;  %v4804_v18 = vld [vmem:[%s6108_s3 + $0x18] sm:$0xff]  }
  0x3f   : > { %4374 = vmatpush3.bf16.msra.mxu1 %v5045_v60  ;;  %v1887_v45 = vrot.slane %v1885_v33, 5  ;;  %v3899_v48 = vcombine.low %v1854_v34, %v1864_v43  ;;  %v1873_v49 = vrot.slane %v1872_v39, 4  ;;  %v2287_v50 = vrot.slane %v5126_v0, 5  ;;  %v365_v43 = vld [vmem:[#allocation2 + $0x48] sm:$0x1] }
  0x40   : > { %4375 = vmatprep.subr.bf16.mxu1 %v4800_v25  ;;  %v755_v51 = vshll.u32 %v664_v17, 16  ;;  %v1883_v52 = vrot.slane %v1882_v44, 4  ;;  %v754_v54 = vrot.slane %v752_v47, 4  ;;  %v761_v55 = vshll.u32 %v665_v26, 16  ;;  %v4806_v47 = vld [vmem:[%s6108_s3 + $0x20] sm:$0xff]  }
  0x41   : > { %v765_v56 = vshrl.u32 %v665_v26, 16  ;;  %4485 = vmatprep.mubr.bf16.mxu0 %v3899_v48  ;;  %v1878_v60 = vsel %vm5005_vm3, %v1873_v49, %v1877_v31  ;;  %v771_v61 = vshll.u32 %v694_v46, 16  ;;  %v479_v62 = vrot.slane %v477_v11, 7  ;;  %v622_v11 = vld [vmem:[#allocation2 + $0x2c] sm:$0x1] }
  0x42   : > { %v757_v59 = vrot.slane %v755_v51, 5  ;;  %v1888_v63 = vsel %vm5005_vm3, %v1883_v52, %v1887_v45  ;;  %v763_v5 = vrot.slane %v761_v55, 5  ;;  %v487_v7 = vrot.slane %v485_v13, 7  ;;  %v4805_v52 = vld [vmem:[%s6108_s3 + $0x158] sm:$0xff]  }
  0x43   : > { %4376 = vmatpush3.bf16.msra.mxu1 %v4800_v25  ;;  %v767_v6 = vrot.slane %v765_v56, 4  ;;  %v3900_v8 = vcombine.low %v1878_v60, %v1888_v63  ;;  %v773_v10 = vrot.slane %v771_v61, 5  ;;  %v482_v17 = vor.u32 %v480_v12, %v479_v62 }
  0x44   : > { %v758_v9 = vor.u32 %v757_v59, %v754_v54  ;;  %4377 = vmatprep.subr.bf16.mxu1 %v4802_v35  ;;  %v483_v25 = vrot.slane %v479_v62, 4  ;;  %v490_v26 = vor.u32 %v488_v14, %v487_v7  ;;  %v492_v13 = vrot.slane %v487_v7, 4  ;;  %v4808_v62 = vld [vmem:[%s6108_s3 + $0x28] sm:$0xff]  }
  0x45   : > { %v768_v24 = vor.u32 %v767_v6, %v763_v5  ;;  %4486 = vmatmul.mubr.bf16.vlgmr.msra.gmra.mrb[0].mxu0 %v3900_v8  ;;  %v619_v2 = vsel %vm5069_vm11, %v482_v17, %v618_v58  ;;  %v321_v12 = vmax.f32 %v5113_v20, 0.0  ;;  %v322_v31 = vmax.f32 %v5116_v21, 0.0  ;;  %v4810_v17 = vld [vmem:[%s6108_s3 + $0x30] sm:$0xff]  }
  0x46   : > { %v759_v29 = vrot.slane %v758_v9, 4  ;;  %4502 = vmatpush3.bf16.msra.mxu0 %v5054_v3  ;;  %v491_v33 = vsel %vm5061_vm10, %v483_v25, %v490_v26  ;;  %620 = vst [vmem:[#allocation2 + $0x24] sm:$0xf] %v619_v2  ;;  %v623_v4 = vsel %vm5013_vm5, %v492_v13, %v622_v11  ;;  %v308_v14 = vadd.f32 %v4998_v28, %v5124_v57  ;;  %v4803_v3 = vld [vmem:[%s6108_s3 + $0x150] sm:$0xff]  }
  0x47   : > { %v769_v32 = vrot.slane %v768_v24, 4  ;;  %4378 = vmatpush3.bf16.msra.mxu1 %v4802_v35  ;;  %4503 = vmatprep.subr.bf16.mxu0 %v4801_v1  ;;  %621 = vst [vmem:[#allocation2 + $0x28] sm:$0xf] %v491_v33  ;;  %624 = vst [vmem:[#allocation2 + $0x2c] sm:$0x1] %v623_v4  ;;  %v4085_v21 = vpack.c.bf16 %v321_v12, %v321_v12  ;;  %v4086_v34 = vpack.c.bf16 %v322_v31, %v322_v31 }
  0x48   : > { %v764_v20 = vsel %vm5005_vm3, %v759_v29, %v763_v5  ;;  %4379 = vmatprep.subr.bf16.mxu1 %v4804_v18  ;;  %v323_v39 = vmax.f32 %v5142_v41, 0.0  ;;  %v324_v57 = vmax.f32 %v308_v14, 0.0  ;;  %v363_v45 = vsel %vm5013_vm5, 0, %v362_v19  ;;  %v625_v24 = vld [vmem:[#allocation2 + $0x30] sm:$0xf] }
  0x49   : > { %v774_v44 = vsel %vm5005_vm3, %v769_v32, %v773_v10  ;;  %v389_v46 = vsel %vm5021_vm7, 0, %v388_v23  ;;  %v494_v49 = vshrl.u32 %v4085_v21, 16  ;;  %v497_v51 = vshll.u32 %v4085_v21, 16  ;;  %364 = vst [vmem:[#allocation2 + $0x3c] sm:$0x1] %v363_v45  ;;  %v4807_v10 = vld [vmem:[%s6108_s3 + $0x160] sm:$0xff]  }
  0x4a   : > { %v3781_v48 = vcombine.low %v764_v20, %v774_v44  ;;  %v502_v35 = vshrl.u32 %v4086_v34, 16  ;;  %390 = vst [vmem:[#allocation2 + $0x44] sm:$0x1] %v389_v46  ;;  %4504 = vmatpush3.bf16.msra.mxu0 %v4801_v1  ;;  %v505_v41 = vshll.u32 %v4086_v34, 16  ;;  %v5198_v54 = vpack.c.bf16 %v323_v39, %v323_v39 }
  0x4b   : > { %4380 = vmatpush3.bf16.msra.mxu1 %v4804_v18  ;;  %v5200_v55 = vpack.c.bf16 %v324_v57, %v324_v57  ;;  %v286_v56 = vmul.f32 %v4133_v36, %v4993_v27  ;;  %4505 = vmatprep.subr.bf16.mxu0 %v4803_v3  ;;  %v496_v58 = vrot.slane %v494_v49, 7  ;;  %v287_v59 = vmul.f32 %v4134_v38, %v4993_v27 }
  0x4c   : > { %4361 = vmatprep.mubr.bf16.mxu1 %v3781_v48  ;;  %v5205_v60 = vrot.slane %v502_v35, 7  ;;  %v366_v61 = vsel %vm5013_vm5, 0, %v365_v43  ;;  %v511_v63 = vshrl.u32 %v5198_v54, 16  ;;  %v514_v36 = vshll.u32 %v5198_v54, 16  ;;  %4381 = vmatprep.subr.bf16.mxu1 %v4806_v47  ;;  %v629_v43 = vld [vmem:[#allocation2 + $0x38] sm:$0x1] }
  0x4d   : > { %v519_v1 = vshrl.u32 %v5200_v55, 16  ;;  %v522_v5 = vshll.u32 %v5200_v55, 16  ;;  %367 = vst [vmem:[#allocation2 + $0x48] sm:$0x1] %v366_v61  ;;  %v5219_v6 = vld [vmem:[#allocation2 + $0x24] sm:$0xf]  ;;  %v499_v38 = vor.u32 %v497_v51, %v496_v58  ;;  %v5234_v25 = vadd.f32 %v4998_v28, %v286_v56 }
  0x4e   : > { %v1823_v16 = vld [vmem:[#allocation2 + $0x24] sm:$0xf]  ;;  %v500_v7 = vrot.slane %v496_v58, 4  ;;  %v507_v8 = vor.u32 %v505_v41, %v5205_v60  ;;  %v509_v9 = vrot.slane %v5205_v60, 4  ;;  %v5229_v11 = vld [vmem:[#allocation2 + $0x28] sm:$0xf]  ;;  %4506 = vmatpush3.bf16.msra.mxu0 %v4803_v3  ;;  %v5237_v26 = vadd.f32 %v4998_v28, %v287_v59 }
  0x4f   : > { %v695_v18 = vld [vmem:[#allocation2 + $0x2c] sm:$0x1]  ;;  %v776_v19 = vshrl.u32 %v5219_v6, 16  ;;  %v779_v23 = vshll.u32 %v5219_v6, 16  ;;  %4382 = vmatpush3.bf16.msra.mxu1 %v4806_v47  ;;  %v785_v13 = vshll.u32 %v5229_v11, 16  ;;  %v789_v29 = vshrl.u32 %v5229_v11, 16  ;;  %4507 = vmatprep.subr.bf16.mxu0 %v4805_v52 }
  0x50   : > { %v795_v2 = vshll.u32 %v695_v18, 16  ;;  %v5241_v12 = vld [vmem:[#allocation2 + $0x28] sm:$0xf]  ;;  %v1890_v31 = vshrl.u32 %v1823_v16, 16  ;;  %4383 = vmatprep.subr.bf16.mxu1 %v4808_v62  ;;  %v5243_v4 = vld [vmem:[#allocation2 + $0x2c] sm:$0x1]  ;;  %v508_v49 = vsel %vm5061_vm10, %v500_v7, %v507_v8  ;;  %v626_v51 = vsel %vm5069_vm11, %v499_v38, %v625_v24 }
  0x51   : > { %v778_v32 = vrot.slane %v776_v19, 4  ;;  %v781_v33 = vrot.slane %v779_v23, 5  ;;  %v1893_v14 = vshll.u32 %v1823_v16, 16  ;;  %v1899_v20 = vshll.u32 %v5241_v12, 16  ;;  %v4809_v35 = vld [vmem:[%s6108_s3 + $0x168] sm:$0xff]   ;;  %v4812_v41 = vld [vmem:[%s6108_s3 + $0x38] sm:$0xff]  }
  0x52   : > { %v787_v3 = vrot.slane %v785_v13, 5  ;;  %v791_v21 = vrot.slane %v789_v29, 4  ;;  %v797_v34 = vrot.slane %v795_v2, 5  ;;  %v1892_v39 = vrot.slane %v1890_v31, 4  ;;  %4508 = vmatpush3.bf16.msra.mxu0 %v4805_v52  ;;  %627 = vst [vmem:[#allocation2 + $0x30] sm:$0xf] %v626_v51 }
  0x53   : > { %v782_v44 = vor.u32 %v781_v33, %v778_v32  ;;  %v1895_v57 = vrot.slane %v1893_v14, 5  ;;  %v1901_v45 = vrot.slane %v1899_v20, 5  ;;  %v1903_v46 = vshrl.u32 %v5241_v12, 16  ;;  %4384 = vmatpush3.bf16.msra.mxu1 %v4808_v62  ;;  %4509 = vmatprep.subr.bf16.mxu0 %v4807_v10  ;;  %628 = vst [vmem:[#allocation2 + $0x34] sm:$0xf] %v508_v49  ;;  %v4188_v18 = vld [vmem:[%s4984_s24 + $0x30] sm:$0xff]  }
  0x54   : > { %v792_v47 = vor.u32 %v791_v21, %v787_v3  ;;  %v1909_v48 = vshll.u32 %v5243_v4, 16  ;;  %4385 = vmatprep.subr.bf16.mxu1 %v4810_v17  ;;  %v630_v60 = vsel %vm5013_vm5, %v509_v9, %v629_v43  ;;  %v632_v59 = vld [vmem:[#allocation2 + $0x3c] sm:$0xf]  ;;  %v391_v61 = vld [vmem:[#allocation2 + $0x50] sm:$0x1]  ;;  %v513_v38 = vrot.slane %v511_v63, 7 }
  0x55   : > { %v783_v52 = vrot.slane %v782_v44, 4  ;;  %v1896_v56 = vor.u32 %v1895_v57, %v1892_v39  ;;  %v1905_v58 = vrot.slane %v1903_v46, 4  ;;  %631 = vst [vmem:[#allocation2 + $0x38] sm:$0x1] %v630_v60  ;;  %v521_v7 = vrot.slane %v519_v1, 7  ;;  %v4811_v19 = vld [vmem:[%s6108_s3 + $0x170] sm:$0xff]  }
  0x56   : > { %v793_v62 = vrot.slane %v792_v47, 4  ;;  %v1911_v16 = vrot.slane %v1909_v48, 5  ;;  %v636_v8 = vld [vmem:[#allocation2 + $0x44] sm:$0x1]  ;;  %v325_v13 = vmax.f32 %v5234_v25, 0.0  ;;  %4510 = vmatpush3.bf16.msra.mxu0 %v4807_v10  ;;  %v5272_v29 = vld [vmem:[%s4984_s24 + $0x38] sm:$0xff]   ;;  %v516_v1 = vor.u32 %v514_v36, %v513_v38 }
  0x57   : > { %v788_v9 = vsel %vm5005_vm3, %v783_v52, %v787_v3  ;;  %v1897_v23 = vrot.slane %v1896_v56, 4  ;;  %v1906_v24 = vor.u32 %v1905_v58, %v1901_v45  ;;  %4386 = vmatpush3.bf16.msra.mxu1 %v4810_v17  ;;  %v517_v2 = vrot.slane %v513_v38, 4  ;;  %4511 = vmatprep.subr.bf16.mxu0 %v4809_v35  ;;  %v5283_v25 = vld [vmem:[%s6108_s3 + $0x80] sm:$0xff]  }
  0x58   : > { %v798_v63 = vsel %vm5005_vm3, %v793_v62, %v797_v34  ;;  %v524_v31 = vor.u32 %v522_v5, %v521_v7  ;;  %4387 = vmatprep.subr.bf16.mxu1 %v4812_v41  ;;  %v526_v33 = vrot.slane %v521_v7, 4  ;;  %v633_v55 = vsel %vm5069_vm11, %v516_v1, %v632_v59  ;;  %v5326_v7 = vld [vmem:[%s6108_s3 + $0x180] sm:$0xff]  }
  0x59   : > { %v3782_v10 = vcombine.low %v788_v9, %v798_v63  ;;  %v1902_v17 = vsel %vm5005_vm3, %v1897_v23, %v1901_v45  ;;  %v1907_v32 = vrot.slane %v1906_v24, 4  ;;  %v326_v36 = vmax.f32 %v5237_v26, 0.0  ;;  %634 = vst [vmem:[#allocation2 + $0x3c] sm:$0xf] %v633_v55  ;;  %v4813_v26 = vld [vmem:[%s6108_s3 + $0x178] sm:$0xff]  }
  0x5a   : > { %v525_v54 = vsel %vm5061_vm10, %v517_v2, %v524_v31  ;;  %v392_v5 = vsel %vm5021_vm7, 0, %v391_v61  ;;  %v637_v20 = vsel %vm5013_vm5, %v526_v33, %v636_v8  ;;  %v5298_v3 = vpack.c.bf16 %v325_v13, %v325_v13  ;;  %4512 = vmatpush3.bf16.msra.mxu0 %v4809_v35  ;;  %v1826_v39 = vld [vmem:[#allocation2 + $0x30] sm:$0xf]  ;;  %v5303_v43 = vld [vmem:[#allocation2 + $0x34] sm:$0xf] }
  0x5b   : > { %4362 = vmatmul.mubr.bf16.gmra.mrb[4].mxu1 %v3782_v10  ;;  %v1912_v14 = vsel %vm5005_vm3, %v1907_v32, %v1911_v16  ;;  %635 = vst [vmem:[#allocation2 + $0x40] sm:$0xf] %v525_v54  ;;  %393 = vst [vmem:[#allocation2 + $0x50] sm:$0x1] %v392_v5  ;;  %v4137_v21 = vunpack.c.l.bf16 %v4188_v18  ;;  %v5305_v44 = vld [vmem:[#allocation2 + $0x30] sm:$0xf]  ;;  %v5307_v57 = vpack.c.bf16 %v326_v36, %v326_v36  ;;  %v4138_v45 = vunpack.c.h.bf16 %v4188_v18 }
  0x5c   : > { %v3901_v34 = vcombine.low %v1902_v17, %v1912_v14  ;;  %638 = vst [vmem:[#allocation2 + $0x44] sm:$0x1] %v637_v20  ;;  %4513 = vmatprep.subr.bf16.mxu0 %v4811_v19  ;;  %v4141_v46 = vunpack.c.l.bf16 %v5272_v29  ;;  %4388 = vmatpush3.bf16.msra.mxu1 %v4812_v41  ;;  %v5310_v47 = vld [vmem:[#allocation2 + $0x38] sm:$0x1]  ;;  %v1914_v48 = vshrl.u32 %v1826_v39, 16  ;;  %v1917_v49 = vshll.u32 %v1826_v39, 16 }
  0x5d   : > { %v1923_v51 = vshll.u32 %v5303_v43, 16  ;;  %v1927_v35 = vshrl.u32 %v5303_v43, 16  ;;  %4405 = vmatprep.subr.bf16.mxu1 %v5283_v25  ;;  %v1933_v52 = vshll.u32 %v5310_v47, 16  ;;  %v5316_v56 = vld [vmem:[#allocation2 + $0x34] sm:$0xf]  ;;  %v800_v60 = vshrl.u32 %v5305_v44, 16 }
  0x5e   : > { %4489 = vmatprep.mubr.bf16.mxu0 %v3901_v34  ;;  %v5318_v58 = vld [vmem:[#allocation2 + $0x38] sm:$0x1]  ;;  %v288_v41 = vmul.f32 %v4137_v21, %v4993_v27  ;;  %v289_v59 = vmul.f32 %v4138_v45, %v4993_v27  ;;  %v1916_v61 = vrot.slane %v1914_v48, 4  ;;  %v1919_v62 = vrot.slane %v1917_v49, 5  ;;  %4514 = vmatpush3.bf16.msra.mxu0 %v4811_v19 }
  0x5f   : > { %v1925_v16 = vrot.slane %v1923_v51, 5  ;;  %v1929_v38 = vrot.slane %v1927_v35, 4  ;;  %v1935_v8 = vrot.slane %v1933_v52, 5  ;;  %v802_v18 = vrot.slane %v800_v60, 4  ;;  %4515 = vmatprep.subr.bf16.mxu0 %v4813_v26 }
  0x60   : > { %v803_v9 = vshll.u32 %v5305_v44, 16  ;;  %v809_v23 = vshll.u32 %v5316_v56, 16  ;;  %v1920_v24 = vor.u32 %v1919_v62, %v1916_v61  ;;  %v813_v27 = vshrl.u32 %v5316_v56, 16  ;;  %v5332_v2 = vld [vmem:[#allocation2 + $0x3c] sm:$0xf] }
  0x61   : > { %v1930_v13 = vor.u32 %v1929_v38, %v1925_v16  ;;  %v819_v63 = vshll.u32 %v5318_v58, 16  ;;  %v5337_v10 = vadd.f32 %v4998_v28, %v288_v41  ;;  %v5340_v17 = vadd.f32 %v4998_v28, %v289_v59  ;;  %v1829_v45 = vld [vmem:[#allocation2 + $0x3c] sm:$0xf] }
  0x62   : > { %v805_v1 = vrot.slane %v803_v9, 5  ;;  %v811_v19 = vrot.slane %v809_v23, 5  ;;  %v5334_v31 = vld [vmem:[#allocation2 + $0x40] sm:$0xf]  ;;  %v1921_v32 = vrot.slane %v1920_v24, 4  ;;  %v815_v54 = vrot.slane %v813_v27, 4  ;;  %4516 = vmatpush3.bf16.msra.mxu0 %v4813_v26 }
  0x63   : > { %v1931_v33 = vrot.slane %v1930_v13, 4  ;;  %v821_v55 = vrot.slane %v819_v63, 5  ;;  %v5342_v5 = vld [vmem:[#allocation2 + $0x44] sm:$0x1]  ;;  %v824_v14 = vshrl.u32 %v5332_v2, 16  ;;  %v827_v20 = vshll.u32 %v5332_v2, 16  ;;  %4533 = vmatprep.subr.bf16.mxu0 %v5326_v7 }
  0x64   : > { %v806_v36 = vor.u32 %v805_v1, %v802_v18  ;;  %6122 = vst [vmem:[#allocation3_spill] sm:$0xff] %v5342_v5  ;;  %v833_v21 = vshll.u32 %v5334_v31, 16  ;;  %v1926_v28 = vsel %vm5005_vm3, %v1921_v32, %v1925_v16  ;;  %v816_v39 = vor.u32 %v815_v54, %v811_v19  ;;  %v5353_v52 = vld [vmem:[#allocation2 + $0x40] sm:$0xf]  ;;  %v5356_v62 = vld [vmem:[#allocation2 + $0x44] sm:$0x1] }
  0x65   : > { %v1936_v34 = vsel %vm5005_vm3, %v1931_v33, %v1935_v8  ;;  %v837_v26 = vshrl.u32 %v5334_v31, 16  ;;  %v826_v51 = vrot.slane %v824_v14, 4  ;;  %v829_v35 = vrot.slane %v827_v20, 5  ;;  %v368_v14 = vld [vmem:[#allocation2 + $0x54] sm:$0x1] }
  0x66   : > { %v3902_v48 = vcombine.low %v1926_v28, %v1936_v34  ;;  %v807_v49 = vrot.slane %v806_v36, 4  ;;  %v817_v60 = vrot.slane %v816_v39, 4  ;;  %v835_v41 = vrot.slane %v833_v21, 5  ;;  %v394_v34 = vld [vmem:[#allocation2 + $0x5c] sm:$0x1] }
  0x67   : > { %v839_v59 = vrot.slane %v837_v26, 4  ;;  %v843_v61 = vshll.u32 %v5342_v5, 16  ;;  %v830_v38 = vor.u32 %v829_v35, %v826_v51  ;;  %v1938_v8 = vshrl.u32 %v1829_v45, 16 }
  0x68   : > { %4490 = vmatmul.mubr.bf16.gmra.mrb[4].mxu0 %v3902_v48  ;;  %v812_v16 = vsel %vm5005_vm3, %v807_v49, %v811_v19  ;;  %v1941_v18 = vshll.u32 %v1829_v45, 16  ;;  %v822_v9 = vsel %vm5005_vm3, %v817_v60, %v821_v55  ;;  %v1947_v13 = vshll.u32 %v5353_v52, 16 }
  0x69   : > { %v840_v23 = vor.u32 %v839_v59, %v835_v41  ;;  %v845_v24 = vrot.slane %v843_v61, 5  ;;  %v3783_v27 = vcombine.low %v812_v16, %v822_v9  ;;  %v831_v63 = vrot.slane %v830_v38, 4  ;;  %v639_v61 = vld [vmem:[#allocation2 + $0x48] sm:$0xf]  ;;  %v643_v9 = vld [vmem:[#allocation2 + $0x50] sm:$0x1] }
  0x6a   : > { %v1940_v1 = vrot.slane %v1938_v8, 4  ;;  %v1943_v32 = vrot.slane %v1941_v18, 5  ;;  %v1949_v54 = vrot.slane %v1947_v13, 5  ;;  %v1951_v36 = vshrl.u32 %v5353_v52, 16 }
  0x6b   : > { %v841_v33 = vrot.slane %v840_v23, 4  ;;  %v1957_v19 = vshll.u32 %v5356_v62, 16  ;;  %4365 = vmatprep.mubr.bf16.mxu1 %v3783_v27  ;;  %v836_v20 = vsel %vm5005_vm3, %v831_v63, %v835_v41  ;;  %v528_v21 = vshrl.u32 %v5298_v3, 16  ;;  %v397_v63 = vld [vmem:[#allocation2 + $0x68] sm:$0x1] }
  0x6c   : > { %v1944_v55 = vor.u32 %v1943_v32, %v1940_v1  ;;  %v531_v28 = vshll.u32 %v5298_v3, 16  ;;  %v1953_v26 = vrot.slane %v1951_v36, 4  ;;  %v536_v48 = vshrl.u32 %v5307_v57, 16 }
  0x6d   : > { %v846_v39 = vsel %vm5005_vm3, %v841_v33, %v845_v24  ;;  %v1959_v45 = vrot.slane %v1957_v19, 5  ;;  %v530_v35 = vrot.slane %v528_v21, 7  ;;  %v539_v60 = vshll.u32 %v5307_v57, 16  ;;  %v371_v24 = vld [vmem:[#allocation2 + $0x60] sm:$0x1] }
  0x6e   : > { %v3784_v49 = vcombine.low %v836_v20, %v846_v39  ;;  %v1945_v51 = vrot.slane %v1944_v55, 4  ;;  %v1954_v41 = vor.u32 %v1953_v26, %v1949_v54  ;;  %v538_v59 = vrot.slane %v536_v48, 7  ;;  %v5395_v39 = vld [vmem:[#allocation2 + $0x18] sm:$0xe]  ;;  %v4879_v48 = vld [vmem:[%s6107_s2] ss:$0 sm:$0xff] }
  0x6f   : > { %v327_v16 = vmax.f32 %v5337_v10, 0.0  ;;  %v328_v3 = vmax.f32 %v5340_v17, 0.0  ;;  %v533_v8 = vor.u32 %v531_v28, %v530_v35  ;;  %v534_v18 = vrot.slane %v530_v35, 4 }
  0x70   : > { %4366 = vmatmul.mubr.bf16.gmra.mrb[8].mxu1 %v3784_v49  ;;  %v1950_v38 = vsel %vm5005_vm3, %v1945_v51, %v1949_v54  ;;  %v369_v23 = vsel %vm5013_vm5, 0, %v368_v14  ;;  %v1955_v13 = vrot.slane %v1954_v41, 4  ;;  %v541_v57 = vor.u32 %v539_v60, %v538_v59  ;;  %v4878_v14 = vld [vmem:[%s6106_s1] ss:$0 sm:$0xff] }
  0x71   : > { %v543_v27 = vrot.slane %v538_v59, 4  ;;  %370 = vst [vmem:[#allocation2 + $0x54] sm:$0x1] %v369_v23  ;;  %v395_v10 = vsel %vm5021_vm7, 0, %v394_v34  ;;  %v640_v17 = vsel %vm5069_vm11, %v533_v8, %v639_v61  ;;  %v4091_v1 = vpack.c.bf16 %v327_v16, %v327_v16 }
  0x72   : > { %396 = vst [vmem:[#allocation2 + $0x5c] sm:$0x1] %v395_v10  ;;  %v4092_v32 = vpack.c.bf16 %v328_v3, %v328_v3  ;;  %v4142_v33 = vunpack.c.h.bf16 %v5272_v29  ;;  %v1960_v54 = vsel %vm5005_vm3, %v1955_v13, %v1959_v45  ;;  %v542_v36 = vsel %vm5061_vm10, %v534_v18, %v541_v57  ;;  %641 = vst [vmem:[#allocation2 + $0x48] sm:$0xf] %v640_v17 }
  0x73   : > { %v644_v19 = vsel %vm5013_vm5, %v543_v27, %v643_v9  ;;  %v290_v20 = vmul.f32 %v4878_v14, %v4141_v46  ;;  %v3903_v55 = vcombine.low %v1950_v38, %v1960_v54  ;;  %642 = vst [vmem:[#allocation2 + $0x4c] sm:$0xf] %v542_v36  ;;  %v545_v21 = vshrl.u32 %v4091_v1, 16 }
  0x74   : > { %645 = vst [vmem:[#allocation2 + $0x50] sm:$0x1] %v644_v19  ;;  %v548_v28 = vshll.u32 %v4091_v1, 16  ;;  %v553_v34 = vshrl.u32 %v4092_v32, 16  ;;  %v556_v26 = vshll.u32 %v4092_v32, 16  ;;  %v291_v45 = vmul.f32 %v4878_v14, %v4142_v33 }
  0x75   : > { %v313_v49 = vadd.f32 %v4879_v48, %v290_v20  ;;  %v372_v51 = vsel %vm5013_vm5, 0, %v371_v24  ;;  %v2286_v29 = vrot.slane %v2284_v40, 4  ;;  %4493 = vmatprep.mubr.bf16.mxu0 %v3903_v55  ;;  %v547_v46 = vrot.slane %v545_v21, 7 }
  0x76   : > { %v555_v35 = vrot.slane %v553_v34, 7  ;;  %373 = vst [vmem:[#allocation2 + $0x60] sm:$0x1] %v372_v51  ;;  %v398_v60 = vsel %vm5021_vm7, 0, %v397_v63  ;;  %v314_v41 = vadd.f32 %v4879_v48, %v291_v45  ;;  %v3916_v24 = vrot.slane %v5395_v39, 9 }
  0x77   : > { %v329_v59 = vmax.f32 %v313_v49, 0.0  ;;  %399 = vst [vmem:[#allocation2 + $0x68] sm:$0x1] %v398_v60  ;;  %v550_v61 = vor.u32 %v548_v28, %v547_v46  ;;  %v551_v16 = vrot.slane %v547_v46, 4  ;;  %v5424_v63 = vsel %vm5407_vm14, %v2286_v29, %v2287_v50 }
  0x78   : > { %v558_v3 = vor.u32 %v556_v26, %v555_v35  ;;  %v560_v38 = vrot.slane %v555_v35, 4  ;;  %v646_v8 = vld [vmem:[#allocation2 + $0x54] sm:$0xf]  ;;  %v330_v23 = vmax.f32 %v314_v41, 0.0  ;;  %v2301_v37 = vrot.slane %v5310_v47, 5 }
  0x79   : > { %v650_v9 = vld [vmem:[#allocation2 + $0x5c] sm:$0x1]  ;;  %v1832_v42 = vld [vmem:[#allocation2 + $0x48] sm:$0xf]  ;;  %v647_v27 = vsel %vm5069_vm11, %v550_v61, %v646_v8  ;;  %v5430_v54 = vpack.c.bf16 %v329_v59, %v329_v59 }
  0x7a   : > { %v5412_v13 = vld [vmem:[#allocation2 + $0x48] sm:$0xf]  ;;  %v559_v57 = vsel %vm5061_vm10, %v551_v16, %v558_v3  ;;  %v651_v10 = vsel %vm5013_vm5, %v560_v38, %v650_v9  ;;  %v5426_v17 = vld [vmem:[#allocation2 + $0x4c] sm:$0xf]  ;;  %v1962_v32 = vshrl.u32 %v1832_v42, 16  ;;  %v1965_v33 = vshll.u32 %v1832_v42, 16 }
  0x7b   : > { %v5428_v1 = vld [vmem:[#allocation2 + $0x50] sm:$0x1]  ;;  %648 = vst [vmem:[#allocation2 + $0x54] sm:$0xf] %v647_v27  ;;  %649 = vst [vmem:[#allocation2 + $0x58] sm:$0xf] %v559_v57  ;;  %v5432_v36 = vpack.c.bf16 %v330_v23, %v330_v23 }
  0x7c   : > { %652 = vst [vmem:[#allocation2 + $0x5c] sm:$0x1] %v651_v10  ;;  %v1971_v19 = vshll.u32 %v5426_v17, 16  ;;  %v1975_v0 = vshrl.u32 %v5426_v17, 16  ;;  %v1981_v50 = vshll.u32 %v5428_v1, 16  ;;  %v848_v20 = vshrl.u32 %v5412_v13, 16 }
  0x7d   : > { %v5437_v14 = vld [vmem:[#allocation2 + $0x4c] sm:$0xf]  ;;  %v1964_v55 = vrot.slane %v1962_v32, 4  ;;  %v1967_v21 = vrot.slane %v1965_v33, 5  ;;  %v5440_v28 = vld [vmem:[#allocation2 + $0x50] sm:$0x1]  ;;  %v5463_v33 = vsel %vm5407_vm14, %v3916_v24, %v2284_v40 }
  0x7e   : > { %v851_v34 = vshll.u32 %v5412_v13, 16  ;;  %v857_v39 = vshll.u32 %v5437_v14, 16  ;;  %v1973_v26 = vrot.slane %v1971_v19, 5  ;;  %v1977_v45 = vrot.slane %v1975_v0, 4  ;;  %v5453_v27 = vld [vmem:[#allocation2] sm:$0xf] }
  0x7f   : > { %v1983_v48 = vrot.slane %v1981_v50, 5  ;;  %v850_v49 = vrot.slane %v848_v20, 4  ;;  %v1968_v51 = vor.u32 %v1967_v21, %v1964_v55  ;;  %v861_v35 = vshrl.u32 %v5437_v14, 16  ;;  %v5455_v10 = vld [vmem:[#allocation2 + $0x4] sm:$0xf] }
  0x80   : > { %v853_v29 = vrot.slane %v851_v34, 5  ;;  %v859_v46 = vrot.slane %v857_v39, 5  ;;  %v1978_v60 = vor.u32 %v1977_v45, %v1973_v26  ;;  %v867_v41 = vshll.u32 %v5440_v28, 16 }
  0x81   : > { %v562_v59 = vshrl.u32 %v5430_v54, 16  ;;  %v565_v61 = vshll.u32 %v5430_v54, 16  ;;  %v1969_v16 = vrot.slane %v1968_v51, 4  ;;  %v863_v38 = vrot.slane %v861_v35, 4 }
  0x82   : > { %v854_v3 = vor.u32 %v853_v29, %v850_v49  ;;  %v570_v8 = vshrl.u32 %v5432_v36, 16  ;;  %v1979_v9 = vrot.slane %v1978_v60, 4  ;;  %v869_v23 = vrot.slane %v867_v41, 5  ;;  %v5449_v42 = vld [vmem:[#allocation2 + $0x54] sm:$0xf] }
  0x83   : > { %v5451_v57 = vld [vmem:[#allocation2 + $0x58] sm:$0xf]  ;;  %v1974_v54 = vsel %vm5005_vm3, %v1969_v16, %v1973_v26  ;;  %v864_v0 = vor.u32 %v863_v38, %v859_v46  ;;  %v5467_v50 = vld [vmem:[#allocation2 + $0x5c] sm:$0x1]  ;;  %v872_v20 = vshrl.u32 %v5449_v42, 16  ;;  %v875_v34 = vshll.u32 %v5449_v42, 16 }
  0x84   : > { %v855_v19 = vrot.slane %v854_v3, 4  ;;  %v1835_v55 = vld [vmem:[#allocation2 + $0x54] sm:$0xf]  ;;  %v1984_v21 = vsel %vm5005_vm3, %v1979_v9, %v1983_v48  ;;  %v881_v53 = vshll.u32 %v5451_v57, 16  ;;  %v885_v40 = vshrl.u32 %v5451_v57, 16 }
  0x85   : > { %v5475_v24 = vld [vmem:[#allocation2 + $0x58] sm:$0xf]  ;;  %v3904_v39 = vcombine.low %v1974_v54, %v1984_v21  ;;  %v865_v45 = vrot.slane %v864_v0, 4  ;;  %v874_v49 = vrot.slane %v872_v20, 4  ;;  %v5479_v51 = vld [vmem:[#allocation2 + $0x5c] sm:$0x1] }
  0x86   : > { %v860_v26 = vsel %vm5005_vm3, %v855_v19, %v859_v46  ;;  %v877_v29 = vrot.slane %v875_v34, 5  ;;  %v883_v35 = vrot.slane %v881_v53, 5  ;;  %v887_v60 = vrot.slane %v885_v40, 4  ;;  %v653_v53 = vld [vmem:[#allocation2 + $0x60] sm:$0xf] }
  0x87   : > { %v891_v48 = vshll.u32 %v5467_v50, 16  ;;  %4494 = vmatmul.mubr.bf16.gmra.mrb[8].mxu0 %v3904_v39  ;;  %v870_v41 = vsel %vm5005_vm3, %v865_v45, %v869_v23  ;;  %v1986_v16 = vshrl.u32 %v1835_v55, 16  ;;  %v1989_v3 = vshll.u32 %v1835_v55, 16 }
  0x88   : > { %v1995_v38 = vshll.u32 %v5475_v24, 16  ;;  %v3785_v9 = vcombine.low %v860_v26, %v870_v41  ;;  %v878_v54 = vor.u32 %v877_v29, %v874_v49  ;;  %v888_v46 = vor.u32 %v887_v60, %v883_v35  ;;  %v2245_v49 = vld [vmem:[#allocation2 + $0x24] sm:$0xe] }
  0x89   : > { %v893_v19 = vrot.slane %v891_v48, 5  ;;  %v1988_v0 = vrot.slane %v1986_v16, 4  ;;  %v1991_v20 = vrot.slane %v1989_v3, 5  ;;  %v1999_v34 = vshrl.u32 %v5475_v24, 16 }
  0x8a   : > { %v1997_v21 = vrot.slane %v1995_v38, 5  ;;  %4369 = vmatprep.mubr.bf16.mxu1 %v3785_v9  ;;  %v879_v40 = vrot.slane %v878_v54, 4  ;;  %v889_v39 = vrot.slane %v888_v46, 4  ;;  %v2005_v32 = vshll.u32 %v5479_v51, 16  ;;  %v657_v54 = vld [vmem:[#allocation2 + $0x68] sm:$0x1] }
  0x8b   : > { %v564_v23 = vrot.slane %v562_v59, 7  ;;  %v1992_v45 = vor.u32 %v1991_v20, %v1988_v0  ;;  %v2001_v55 = vrot.slane %v1999_v34, 4  ;;  %v572_v5 = vrot.slane %v570_v8, 7 }
  0x8c   : > { %v573_v26 = vshll.u32 %v5432_v36, 16  ;;  %v884_v29 = vsel %vm5005_vm3, %v879_v40, %v883_v35  ;;  %v894_v60 = vsel %vm5005_vm3, %v889_v39, %v893_v19  ;;  %v2007_v48 = vrot.slane %v2005_v32, 5  ;;  %v2246_v36 = vld [vmem:[#allocation2 + $0x30] sm:$0xe]  ;;  %v2247_v32 = vld [vmem:[#allocation2 + $0x3c] sm:$0xe] }
  0x8d   : > { %v567_v41 = vor.u32 %v565_v61, %v564_v23  ;;  %v3786_v16 = vcombine.low %v884_v29, %v894_v60  ;;  %v1993_v3 = vrot.slane %v1992_v45, 4  ;;  %v2002_v38 = vor.u32 %v2001_v55, %v1997_v21  ;;  %v5498_v19 = vld [vmem:[#allocation2 + $0x14] sm:$0x1]  ;;  %v4883_v55 = vld [vmem:[#allocation2 + $0xc] sm:$0xf] }
  0x8e   : > { %v568_v9 = vrot.slane %v564_v23, 4  ;;  %v575_v59 = vor.u32 %v573_v26, %v572_v5  ;;  %v577_v46 = vrot.slane %v572_v5, 4  ;;  %v3940_v61 = vcombine.low %v5463_v33, %v5424_v63  ;;  %v5514_v26 = vld [vmem:[#allocation2 + $0x10] sm:$0xf]  ;;  %v5517_v29 = vld [vmem:[#allocation2 + $0x1c] sm:$0xf] }
  0x8f   : > { %v654_v8 = vsel %vm5069_vm11, %v567_v41, %v653_v53  ;;  %4370 = vmatmul.mubr.bf16.gmra.mrb[12].mxu1 %v3786_v16  ;;  %v1998_v35 = vsel %vm5005_vm3, %v1993_v3, %v1997_v21  ;;  %v2003_v0 = vrot.slane %v2002_v38, 4  ;;  %v2280_v20 = vrot.slane %v5498_v19, 5  ;;  %v2243_v16 = vld [vmem:[#allocation2 + $0xc] sm:$0xe] }
  0x90   : > { %655 = vst [vmem:[#allocation2 + $0x60] sm:$0xf] %v654_v8  ;;  %v576_v5 = vsel %vm5061_vm10, %v568_v9, %v575_v59  ;;  %v658_v22 = vsel %vm5013_vm5, %v577_v46, %v657_v54  ;;  %v6125_v34 = vcombine.low %v5453_v27, %v5455_v10  ;;  %v3917_v21 = vrot.slane %v2245_v49, 9  ;;  %v4885_v49 = vld [vmem:[#allocation2 + $0x18] sm:$0xf]  ;;  %v4818_v3 = vld [vmem:[%s6108_s3 + $0x88] sm:$0xff]  }
  0x91   : > { %v2008_v53 = vsel %vm5005_vm3, %v2003_v0, %v2007_v48  ;;  %656 = vst [vmem:[#allocation2 + $0x64] sm:$0xf] %v576_v5  ;;  %659 = vst [vmem:[#allocation2 + $0x68] sm:$0x1] %v658_v22  ;;  %v2291_v40 = vrot.slane %v5241_v12, 5  ;;  %v2294_v39 = vrot.slane %v5243_v4, 5  ;;  %v3796_v27 = vcombine.low %v4883_v55, %v5514_v26 }
  0x92   : > { %4389 = vmatprep.mubr.bf16.mxu1 %v6125_v34  ;;  %v3905_v23 = vcombine.low %v1998_v35, %v2008_v53  ;;  %v3918_v15 = vrot.slane %v2246_v36, 9  ;;  %v2298_v45 = vrot.slane %v5303_v43, 5  ;;  %v3797_v60 = vcombine.low %v4885_v49, %v5517_v29  ;;  %v4887_v59 = vld [vmem:[#allocation2 + $0x10] sm:$0xf] }
  0x93   : > { %v5522_v12 = vsel %vm5407_vm14, %v3917_v21, %v2291_v40  ;;  %v2293_v4 = vrot.slane %v2291_v40, 4  ;;  %v3919_v48 = vrot.slane %v2247_v32, 9  ;;  %v2305_v41 = vrot.slane %v5353_v52, 5  ;;  %v4822_v21 = vld [vmem:[%s6108_s3 + $0x90] sm:$0xff]  }
  0x94   : > { %4497 = vmatprep.mubr.bf16.mxu0 %v3905_v23  ;;  %v5526_v43 = vsel %vm5407_vm14, %v3918_v15, %v2298_v45  ;;  %v2300_v47 = vrot.slane %v2298_v45, 4  ;;  %v2308_v9 = vrot.slane %v5356_v62, 5  ;;  %v2277_v46 = vrot.slane %v4887_v59, 5  ;;  %v4828_v59 = vld [vmem:[%s6108_s3 + $0xa0] sm:$0xff]  }
  0x95   : > { %v5534_v38 = vsel %vm5407_vm14, %v2293_v4, %v2294_v39  ;;  %v2307_v36 = vrot.slane %v2305_v41, 4  ;;  %v5547_v62 = vsel %vm5407_vm14, %v3919_v48, %v2305_v41  ;;  %v3915_v34 = vrot.slane %v2243_v16, 9  ;;  %v4824_v16 = vld [vmem:[%s6108_s3 + $0x98] sm:$0xff]  }
  0x96   : > { %v3941_v8 = vcombine.low %v5522_v12, %v5534_v38  ;;  %v5541_v52 = vsel %vm5407_vm14, %v2300_v47, %v2301_v37  ;;  %v2279_v37 = vrot.slane %v2277_v46, 4  ;;  %v3799_v4 = vcombine.low %v5305_v44, %v5316_v56  ;;  %v2249_v38 = vld [vmem:[#allocation2 + $0x54] sm:$0xe] }
  0x97   : > { %v1838_v54 = vld [vmem:[#allocation2 + $0x60] sm:$0xf]  ;;  %4390 = vmatmul.mubr.bf16.vlgmr.msra.gmra.mrb[0].mxu1 %v3796_v27  ;;  %v3942_v32 = vcombine.low %v5526_v43, %v5541_v52  ;;  %v5559_v53 = vsel %vm5407_vm14, %v2307_v36, %v2308_v9  ;;  %v2278_v9 = vsel %vm5407_vm14, %v3915_v34, %v2277_v46  ;;  %v1311_v19 = vrot.slane %v5455_v10, 5 }
  0x98   : > { %v2010_v35 = vshrl.u32 %v1838_v54, 16  ;;  %v2013_v0 = vshll.u32 %v1838_v54, 16  ;;  %v5549_v5 = vld [vmem:[#allocation2 + $0x64] sm:$0xf]  ;;  %v5551_v22 = vld [vmem:[#allocation2 + $0x68] sm:$0x1]  ;;  %4406 = vmatpush3.bf16.msra.mxu1 %v5283_v25  ;;  %4393 = vmatprep.mubr.bf16.mxu1 %v3797_v60  ;;  %v3943_v25 = vcombine.low %v5547_v62, %v5559_v53  ;;  %v3798_v60 = vcombine.low %v5219_v6, %v5229_v11 }
  0x99   : > { %v2019_v23 = vshll.u32 %v5549_v5, 16  ;;  %v2023_v15 = vshrl.u32 %v5549_v5, 16  ;;  %4407 = vmatprep.subr.bf16.mxu1 %v4818_v3  ;;  %v2029_v45 = vshll.u32 %v5551_v22, 16  ;;  %v2281_v6 = vsel %vm5407_vm14, %v2279_v37, %v2280_v20  ;;  %v1282_v20 = vld [vmem:[#allocation2] sm:$0xe] }
  0x9a   : > { %v2012_v40 = vrot.slane %v2010_v35, 4  ;;  %v2015_v39 = vrot.slane %v2013_v0, 5  ;;  %v3939_v54 = vcombine.low %v2278_v9, %v2281_v6  ;;  %v3800_v36 = vcombine.low %v5332_v2, %v5334_v31  ;;  %v4888_v0 = vld [vmem:[#allocation2 + $0x8] sm:$0x1]  ;;  %v1283_v2 = vld [vmem:[#allocation2 + $0xc] sm:$0xe] }
  0x9b   : > { %v2021_v27 = vrot.slane %v2019_v23, 5  ;;  %v2025_v49 = vrot.slane %v2023_v15, 4  ;;  %v2031_v41 = vrot.slane %v2029_v45, 5  ;;  %v3801_v35 = vcombine.low %v5412_v13, %v5437_v14  ;;  %v4889_v23 = vld [vmem:[#allocation2 + $0x14] sm:$0x1]  ;;  %v4819_v45 = vld [vmem:[%s6108_s3 + $0x188] sm:$0xff]  }
  0x9c   : > { %v2016_v55 = vor.u32 %v2015_v39, %v2012_v40  ;;  %4408 = vmatpush3.bf16.msra.mxu1 %v4818_v3  ;;  %v1314_v34 = vrot.slane %v4888_v0, 5  ;;  %v3811_v40 = vrot.slane %v1282_v20, 9  ;;  %v1313_v10 = vrot.slane %v1311_v19, 4  ;;  %v1288_v39 = vld [vmem:[#allocation2 + $0x48] sm:$0xe] }
  0x9d   : > { %v2026_v48 = vor.u32 %v2025_v49, %v2021_v27  ;;  %4409 = vmatprep.subr.bf16.mxu1 %v4822_v21  ;;  %v1321_v15 = vrot.slane %v4889_v23, 5  ;;  %v2312_v13 = vrot.slane %v5426_v17, 5  ;;  %v1318_v37 = vrot.slane %v5514_v26, 5  ;;  %v5599_v49 = vld [vmem:[#allocation2 + $0x48] sm:$0xe]  ;;  %v4834_v26 = vld [vmem:[%s6108_s3 + $0xb0] sm:$0xff]  }
  0x9e   : > { %v2017_v47 = vrot.slane %v2016_v55, 4  ;;  %v1284_v55 = vld [vmem:[#allocation2 + $0x18] sm:$0xe]  ;;  %v1353_v9 = vrot.slane %v5437_v14, 5  ;;  %v1356_v6 = vrot.slane %v5440_v28, 5  ;;  %v3920_v12 = vrot.slane %v5599_v49, 9 }
  0x9f   : > { %v2027_v44 = vrot.slane %v2026_v48, 4  ;;  %4394 = vmatmul.mubr.bf16.gmra.mrb[4].mxu1 %v3798_v60  ;;  %v1312_v60 = vsel %vm5407_vm14, %v3811_v40, %v1311_v19  ;;  %v3817_v48 = vrot.slane %v1288_v39, 9  ;;  %v4836_v28 = vld [vmem:[%s6108_s3 + $0xb8] sm:$0xff]   ;;  %v2315_v20 = vrot.slane %v5428_v1, 5  ;;  %v1285_v23 = vld [vmem:[#allocation2 + $0x24] sm:$0xe] }
  0xa0   : > { %v2022_v11 = vsel %vm5005_vm3, %v2017_v47, %v2021_v27  ;;  %4410 = vmatpush3.bf16.msra.mxu1 %v4822_v21  ;;  %4397 = vmatprep.mubr.bf16.mxu1 %v3799_v4  ;;  %v4830_v21 = vld [vmem:[%s6108_s3 + $0xa8] sm:$0xff]   ;;  %v1289_v27 = vld [vmem:[#allocation2 + $0x54] sm:$0xe]  ;;  %v1315_v4 = vsel %vm5407_vm14, %v1313_v10, %v1314_v34  ;;  %v1325_v47 = vrot.slane %v5517_v29, 5  ;;  %v1320_v29 = vrot.slane %v1318_v37, 4  ;;  %v4825_v40 = vld [vmem:[%s6108_s3 + $0x198] sm:$0xff]  }
  0xa1   : > { %v2032_v3 = vsel %vm5005_vm3, %v2027_v44, %v2031_v41  ;;  %4411 = vmatprep.subr.bf16.mxu1 %v4824_v16  ;;  %v3802_v41 = vcombine.low %v5449_v42, %v5451_v57  ;;  %v3818_v44 = vrot.slane %v1289_v27, 9  ;;  %v3835_v42 = vcombine.low %v1312_v60, %v1315_v4  ;;  %v4891_v34 = vld [vmem:[#allocation2 + $0x28] sm:$0xf]  ;;  %v4838_v27 = vld [vmem:[%s6108_s3 + $0xc0] sm:$0xff]  }
  0xa2   : > { %v3906_v46 = vcombine.low %v2022_v11, %v2032_v3  ;;  %v3813_v11 = vrot.slane %v1284_v55, 9  ;;  %v1360_v3 = vrot.slane %v5451_v57, 5  ;;  %v1355_v14 = vrot.slane %v1353_v9, 4  ;;  %v4890_v57 = vld [vmem:[#allocation2 + $0x20] sm:$0x1] }
  0xa3   : > { %v1327_v63 = vrot.slane %v1325_v47, 4  ;;  %v1328_v33 = vrot.slane %v4890_v57, 5  ;;  %v1322_v0 = vsel %vm5407_vm14, %v1320_v29, %v1321_v15  ;;  %v1339_v15 = vrot.slane %v5316_v56, 5  ;;  %v2250_v4 = vld [vmem:[#allocation2 + $0x60] sm:$0xe]  ;;  %v4842_v56 = vld [vmem:[%s6108_s3 + $0xc8] sm:$0xff]  }
  0xa4   : > { %4498 = vmatmul.mubr.bf16.gmra.mrb[12].mxu0 %v3906_v46  ;;  %4412 = vmatpush3.bf16.msra.mxu1 %v4824_v16  ;;  %v3812_v16 = vrot.slane %v1283_v2, 9  ;;  %v5640_v19 = vsel %vm5407_vm14, %v1355_v14, %v1356_v6  ;;  %v2314_v46 = vrot.slane %v2312_v13, 4  ;;  %v1326_v10 = vsel %vm5407_vm14, %v3813_v11, %v1325_v47  ;;  %v1286_v2 = vld [vmem:[#allocation2 + $0x30] sm:$0xe]  ;;  %v4831_v29 = vld [vmem:[%s6108_s3 + $0x1a8] sm:$0xff]  }
  0xa5   : > { %4517 = vmatprep.mubr.bf16.mxu0 %v3939_v54  ;;  %4413 = vmatprep.subr.bf16.mxu1 %v4828_v59  ;;  %v1363_v54 = vrot.slane %v5467_v50, 5  ;;  %v5631_v50 = vsel %vm5407_vm14, %v3818_v44, %v1360_v3  ;;  %v1329_v39 = vsel %vm5407_vm14, %v1327_v63, %v1328_v33  ;;  %v2313_v49 = vsel %vm5407_vm14, %v3920_v12, %v2312_v13  ;;  %v6126_v33 = vld [vmem:[#allocation3_spill] sm:$0xff] }
  0xa6   : > { %v2316_v60 = vsel %vm5407_vm14, %v2314_v46, %v2315_v20  ;;  %v2326_v13 = vrot.slane %v5549_v5, 5  ;;  %v1341_v43 = vrot.slane %v1339_v15, 4  ;;  %v1342_v52 = vrot.slane %v5318_v58, 5 }
  0xa7   : > { %4398 = vmatmul.mubr.bf16.gmra.mrb[8].mxu1 %v3800_v36  ;;  %v3944_v62 = vcombine.low %v2313_v49, %v2316_v60  ;;  %v3922_v53 = vrot.slane %v2250_v4, 9  ;;  %v2329_v5 = vrot.slane %v5551_v22, 5  ;;  %v1346_v11 = vrot.slane %v5334_v31, 5  ;;  %v4844_v31 = vld [vmem:[%s6108_s3 + $0xd0] sm:$0xff]   ;;  %v5747_v49 = vld [vmem:[#allocation2 + $0x28] sm:$0xf] }
  0xa8   : > { %4414 = vmatpush3.bf16.msra.mxu1 %v4828_v59  ;;  %4401 = vmatprep.mubr.bf16.mxu1 %v3801_v35  ;;  %v5620_v59 = vsel %vm5407_vm14, %v3817_v48, %v1353_v9  ;;  %v3814_v48 = vrot.slane %v1285_v23, 9  ;;  %v1343_v22 = vsel %vm5407_vm14, %v1341_v43, %v1342_v52  ;;  %v4841_v23 = vld [vmem:[#allocation2 + $0x24] sm:$0xff]   ;;  %v2790_v60 = vld [vmem:[#allocation2 + $0x30] sm:$0xf]  ;;  %v5749_v4 = vld [vmem:[#allocation2 + $0x34] sm:$0xf] }
  0xa9   : > { %4415 = vmatprep.subr.bf16.mxu1 %v4830_v21  ;;  %v3841_v36 = vcombine.low %v5620_v59, %v5640_v19  ;;  %v1348_v57 = vrot.slane %v1346_v11, 4  ;;  %v4862_v59 = vld [vmem:[#allocation2 + $0xc] sm:$0xff]   ;;  %v2860_v43 = vshll.u32 %v2790_v60, 16  ;;  %v2866_v52 = vshll.u32 %v5749_v4, 16 }
  0xac   : > { %4518 = vmatmul.mubr.bf16.vlgmr.msra.gmra.mrb[0].mxu0 %v3940_v61  ;;  %4416 = vmatpush3.bf16.msra.mxu1 %v4830_v21  ;;  %v1362_v61 = vrot.slane %v1360_v3, 4  ;;  %v1332_v21 = vrot.slane %v4891_v34, 5  ;;  %v2328_v3 = vrot.slane %v2326_v13, 4  ;;  %v4837_v34 = vld [vmem:[%s6108_s3 + $0x1b8] sm:$0xff]  }
  0xad   : > { %4534 = vmatpush3.bf16.msra.mxu0 %v5326_v7  ;;  %4521 = vmatprep.mubr.bf16.mxu0 %v3941_v8  ;;  %v4823_v7 = vld [vmem:[%s6108_s3 + $0x190] sm:$0xff]   ;;  %v2319_v8 = vrot.slane %v5475_v24, 5  ;;  %v1319_v24 = vsel %vm5407_vm14, %v3812_v16, %v1318_v37  ;;  %v3921_v37 = vrot.slane %v2249_v38, 9  ;;  %v3815_v16 = vrot.slane %v1286_v2, 9  ;;  %v4848_v38 = vld [vmem:[%s6108_s3 + $0xd8] sm:$0xff]   ;;  %v4843_v2 = vld [vmem:[%s6108_s3 + $0x1c8] sm:$0xff]  }
  0xae   : > { %4535 = vmatprep.subr.bf16.mxu0 %v4819_v45  ;;  %4417 = vmatprep.subr.bf16.mxu1 %v4834_v26  ;;  %v5649_v35 = vsel %vm5407_vm14, %v1362_v61, %v1363_v54  ;;  %v3836_v47 = vcombine.low %v1319_v24, %v1322_v0  ;;  %v1334_v17 = vrot.slane %v1332_v21, 4  ;;  %v1333_v58 = vsel %vm5407_vm14, %v3814_v48, %v1332_v21  ;;  %v4839_v0 = vld [vmem:[#allocation2 + $0x18] sm:$0xff]   ;;  %v4850_v21 = vld [vmem:[%s6108_s3 + $0xe0] sm:$0xff]  }
  0xaf   : > { %4402 = vmatmul.mubr.bf16.gmra.mrb[12].mxu1 %v3802_v41  ;;  %v3842_v1 = vcombine.low %v5631_v50, %v5649_v35  ;;  %v2321_v55 = vrot.slane %v2319_v8, 4  ;;  %v4892_v41 = vld [vmem:[#allocation2 + $0x2c] sm:$0x1]  ;;  %v2320_v9 = vsel %vm5407_vm14, %v3921_v37, %v2319_v8  ;;  %v1340_v54 = vsel %vm5407_vm14, %v3815_v16, %v1339_v15  ;;  %v4835_v8 = vld [vmem:[%s6108_s3 + $0x1b0] sm:$0xff]   ;;  %v2784_v37 = vld [vmem:[#allocation2 + $0x18] sm:$0xf] }
  0xb0   : > { %4418 = vmatpush3.bf16.msra.mxu1 %v4834_v26  ;;  %4421 = vmatprep.mubr.bf16.mxu1 %v3835_v42  ;;  %v1335_v26 = vrot.slane %v4892_v41, 5  ;;  %v1287_v42 = vld [vmem:[#allocation2 + $0x3c] sm:$0xe]  ;;  %v1349_v61 = vrot.slane %v6126_v33, 5  ;;  %v2330_v12 = vsel %vm5407_vm14, %v2328_v3, %v2329_v5  ;;  %v4845_v15 = vld [vmem:[#allocation2 + $0x30] sm:$0xff]   ;;  %v2809_v19 = vshrl.u32 %v2784_v37, 16 }
  0xb1   : > { %4536 = vmatpush3.bf16.msra.mxu0 %v4819_v45  ;;  %4419 = vmatprep.subr.bf16.mxu1 %v4836_v28  ;;  %v2322_v45 = vrot.slane %v5479_v51, 5  ;;  %v3837_v51 = vcombine.low %v1326_v10, %v1329_v39  ;;  %v3816_v63 = vrot.slane %v1287_v42, 9  ;;  %v4854_v10 = vld [vmem:[%s6108_s3 + $0xe8] sm:$0xff]   ;;  %v4840_v39 = vld [vmem:[%s6108_s3 + $0x1c0] sm:$0xff]   ;;  %v2842_v41 = vshll.u32 %v5747_v49, 16 }
  0xb2   : > { %4537 = vmatprep.subr.bf16.mxu0 %v4823_v7  ;;  %v1350_v24 = vsel %vm5407_vm14, %v1348_v57, %v1349_v61  ;;  %v2857_v16 = vshrl.u32 %v2790_v60, 16  ;;  %v2811_v5 = vrot.slane %v2809_v19, 4  ;;  %v2793_v50 = vld [vmem:[#allocation2 + $0x3c] sm:$0xf]  ;;  %v5782_v42 = vld [vmem:[#allocation2 + $0x2c] sm:$0x1] }
  0xb3   : > { %v2323_v6 = vsel %vm5407_vm14, %v2321_v55, %v2322_v45  ;;  %v1347_v20 = vsel %vm5407_vm14, %v3816_v63, %v1346_v11  ;;  %v5742_v55 = vld [vmem:[#allocation2 + $0x1c] sm:$0xf]  ;;  %v4856_v45 = vld [vmem:[%s6108_s3 + $0xf0] sm:$0xff]   ;;  %v5778_v3 = vrot.slane %v2842_v41, 5  ;;  %v5787_v33 = vld [vmem:[#allocation2 + $0x38] sm:$0x1] }
  0xb4   : > { %4522 = vmatmul.mubr.bf16.gmra.mrb[4].mxu0 %v3942_v32  ;;  %4420 = vmatpush3.bf16.msra.mxu1 %v4836_v28  ;;  %v4829_v32 = vld [vmem:[%s6108_s3 + $0x1a0] sm:$0xff]   ;;  %v3945_v44 = vcombine.low %v2320_v9, %v2323_v6  ;;  %v3839_v28 = vcombine.low %v1340_v54, %v1343_v22  ;;  %v4851_v6 = vld [vmem:[#allocation2 + $0x48] sm:$0xff]   ;;  %v4863_v63 = vld [vmem:[#allocation2 + $0x18] sm:$0xff]   ;;  %v2881_v61 = vshrl.u32 %v2793_v50, 16 }
  0xb5   : > { %4538 = vmatpush3.bf16.msra.mxu0 %v4823_v7  ;;  %4525 = vmatprep.mubr.bf16.mxu0 %v3943_v25  ;;  %v1336_v25 = vsel %vm5407_vm14, %v1334_v17, %v1335_v26  ;;  %v2327_v7 = vsel %vm5407_vm14, %v3922_v53, %v2326_v13  ;;  %v2846_v26 = vshrl.u32 %v5747_v49, 16  ;;  %v4846_v13 = vld [vmem:[%s6108_s3 + $0x1d0] sm:$0xff]   ;;  %v4847_v9 = vld [vmem:[#allocation2 + $0x3c] sm:$0xff]  }
  0xb6   : > { %4539 = vmatprep.subr.bf16.mxu0 %v4825_v40  ;;  %4437 = vmatprep.subr.bf16.mxu1 %v4838_v27  ;;  %v3838_v14 = vcombine.low %v1333_v58, %v1336_v25  ;;  %v3946_v46 = vcombine.low %v2327_v7, %v2330_v12  ;;  %v4849_v53 = vld [vmem:[%s6108_s3 + $0x1d8] sm:$0xff]   ;;  %v5780_v22 = vld [vmem:[#allocation2 + $0x40] sm:$0xf]  ;;  %v2884_v7 = vshll.u32 %v2793_v50, 16  ;;  %v4866_v12 = vld [vmem:[#allocation2 + $0x24] sm:$0xff]  }
  0xb7   : > { %4422 = vmatmul.mubr.bf16.vlgmr.msra.gmra.mrb[0].mxu1 %v3836_v47  ;;  %v2818_v47 = vshll.u32 %v5742_v55, 16  ;;  %v2848_v54 = vrot.slane %v2846_v26, 4 }
  0xb8   : > { %4438 = vmatpush3.bf16.msra.mxu1 %v4838_v27  ;;  %4425 = vmatprep.mubr.bf16.mxu1 %v3837_v51  ;;  %v2787_v27 = vld [vmem:[#allocation2 + $0x24] sm:$0xf]  ;;  %v4860_v51 = vld [vmem:[%s6108_s3 + $0xf8] sm:$0xff]   ;;  %v2886_v60 = vrot.slane %v2884_v7, 5 }
  0xb9   : > { %4540 = vmatpush3.bf16.msra.mxu0 %v4825_v40  ;;  %4439 = vmatprep.subr.bf16.mxu1 %v4842_v56  ;;  %v3840_v40 = vcombine.low %v1347_v20, %v1350_v24  ;;  %v2833_v48 = vshrl.u32 %v2787_v27, 16  ;;  %v2836_v17 = vshll.u32 %v2787_v27, 16  ;;  %v5771_v25 = vrot.slane %v2818_v47, 5 }
  0xba   : > { %4541 = vmatprep.subr.bf16.mxu0 %v4829_v32  ;;  %v2883_v27 = vrot.slane %v2881_v61, 4  ;;  %v4858_v61 = vld [vmem:[%s6108_s3 + $0x1f0] sm:$0xff]  }
  0xbb   : > { %v2835_v35 = vrot.slane %v2833_v48, 4 }
  0xbc   : > { %4526 = vmatmul.mubr.bf16.gmra.mrb[8].mxu0 %v3944_v62  ;;  %4440 = vmatpush3.bf16.msra.mxu1 %v4842_v56  ;;  %v2822_v56 = vshrl.u32 %v5742_v55, 16  ;;  %v5766_v62 = vld [vmem:[#allocation2 + $0x20] sm:$0x1] }
  0xbd   : > { %4542 = vmatpush3.bf16.msra.mxu0 %v4829_v32  ;;  %4529 = vmatprep.mubr.bf16.mxu0 %v3945_v44  ;;  %v2870_v32 = vshrl.u32 %v5749_v4, 16  ;;  %v5776_v44 = vld [vmem:[%s6108_s3 + $0x200] sm:$0xff]   ;;  %v2828_v57 = vshll.u32 %v5766_v62, 16 }
  0xbe   : > { %4543 = vmatprep.subr.bf16.mxu0 %v4831_v29  ;;  %4441 = vmatprep.subr.bf16.mxu1 %v4844_v31  ;;  %v2824_v11 = vrot.slane %v2822_v56, 4 }
  0xbf   : > { %4426 = vmatmul.mubr.bf16.gmra.mrb[4].mxu1 %v3838_v14  ;;  %v5784_v14 = vrot.slane %v2866_v52, 5 }
  0xc0   : > { %4442 = vmatpush3.bf16.msra.mxu1 %v4844_v31  ;;  %4429 = vmatprep.mubr.bf16.mxu1 %v3839_v28  ;;  %v2862_v31 = vrot.slane %v2860_v43, 5  ;;  %v2872_v28 = vrot.slane %v2870_v32, 4  ;;  %v2825_v20 = vor.u32 %v2824_v11, %v5771_v25 }
  0xc1   : > { %4544 = vmatpush3.bf16.msra.mxu0 %v4831_v29  ;;  %4443 = vmatprep.subr.bf16.mxu1 %v4848_v38  ;;  %v2859_v29 = vrot.slane %v2857_v16, 4 }
  0xc2   : > { %4545 = vmatprep.subr.bf16.mxu0 %v4835_v8 }
  0xc4   : > { %4530 = vmatmul.mubr.bf16.gmra.mrb[12].mxu0 %v3946_v46  ;;  %4444 = vmatpush3.bf16.msra.mxu1 %v4848_v38  ;;  %v2890_v38 = vshll.u32 %v5780_v22, 16 }
  0xc5   : > { %4546 = vmatpush3.bf16.msra.mxu0 %v4835_v8  ;;  %4549 = vmatprep.mubr.bf16.mxu0 %v4839_v0  ;;  %v2894_v8 = vshrl.u32 %v5780_v22, 16  ;;  %v2852_v0 = vshll.u32 %v5782_v42, 16 }
  0xc6   : > { %4547 = vmatprep.subr.bf16.mxu0 %v4837_v34  ;;  %4445 = vmatprep.subr.bf16.mxu1 %v4850_v21 }
  0xc7   : > { %4430 = vmatmul.mubr.bf16.gmra.mrb[8].mxu1 %v3840_v40  ;;  %v4852_v40 = vld [vmem:[%s6108_s3 + $0x1e0] sm:$0xff]   ;;  %v2896_v19 = vrot.slane %v2894_v8, 4  ;;  %v2854_v26 = vrot.slane %v2852_v0, 5  ;;  %v5853_v8 = vld [vmem:[#allocation2 + $0x50] sm:$0x1] }
  0xc8   : > { %4446 = vmatpush3.bf16.msra.mxu1 %v4850_v21  ;;  %4433 = vmatprep.mubr.bf16.mxu1 %v3841_v36  ;;  %v2812_v36 = vshll.u32 %v2784_v37, 16  ;;  %v2796_v21 = vld [vmem:[#allocation2 + $0x48] sm:$0xf]  ;;  %v5805_v37 = vrot.slane %v2828_v57, 5  ;;  %v2799_v57 = vld [vmem:[#allocation2 + $0x54] sm:$0xf] }
  0xc9   : > { %4548 = vmatpush3.bf16.msra.mxu0 %v4837_v34  ;;  %4447 = vmatprep.subr.bf16.mxu1 %v4854_v10  ;;  %v5796_v34 = vld [vmem:[%s6108_s3 + $0x208] sm:$0xff]   ;;  %v2905_v47 = vshrl.u32 %v2796_v21, 16  ;;  %v2908_v56 = vshll.u32 %v2796_v21, 16 }
  0xca   : > { %4565 = vmatprep.subr.bf16.mxu0 %v4840_v39  ;;  %v2814_v58 = vrot.slane %v2812_v36, 5  ;;  %v5812_v36 = vld [vmem:[#allocation2 + $0x4c] sm:$0xf] }
  0xcb   : > { %v2918_v11 = vshrl.u32 %v5812_v36, 16 }
  0xcc   : > { %4550 = vmatmul.mubr.bf16.vlgmr.msra.gmra.mrb[0].mxu0 %v4841_v23  ;;  %4448 = vmatpush3.bf16.msra.mxu1 %v4854_v10  ;;  %v2815_v46 = vor.u32 %v2814_v58, %v2811_v5  ;;  %v2849_v10 = vor.u32 %v2848_v54, %v5778_v3  ;;  %v2873_v23 = vor.u32 %v2872_v28, %v5784_v14  ;;  %v2914_v58 = vshll.u32 %v5812_v36, 16 }
  0xcd   : > { %4566 = vmatpush3.bf16.msra.mxu0 %v4840_v39  ;;  %4553 = vmatprep.mubr.bf16.mxu0 %v4845_v15  ;;  %v2863_v39 = vor.u32 %v2862_v31, %v2859_v29  ;;  %v4853_v15 = vld [vmem:[#allocation2 + $0x54] sm:$0xff]   ;;  %v2910_v54 = vrot.slane %v2908_v56, 5 }
  0xce   : > { %4567 = vmatprep.subr.bf16.mxu0 %v4843_v2  ;;  %4449 = vmatprep.subr.bf16.mxu1 %v4856_v45  ;;  %v2816_v48 = vrot.slane %v2815_v46, 4  ;;  %v2850_v16 = vrot.slane %v2849_v10, 4  ;;  %v2874_v52 = vrot.slane %v2873_v23, 4  ;;  %v5855_v46 = vrot.slane %v2914_v58, 5 }
  0xcf   : > { %4434 = vmatmul.mubr.bf16.gmra.mrb[12].mxu1 %v3842_v1  ;;  %v2838_v1 = vrot.slane %v2836_v17, 5  ;;  %v2826_v17 = vrot.slane %v2825_v20, 4  ;;  %v2864_v43 = vrot.slane %v2863_v39, 4  ;;  %v2920_v20 = vrot.slane %v2918_v11, 4  ;;  %v4861_v39 = vld [vmem:[%s6108_s3 + $0x1f8] sm:$0xff]  }
  0xd0   : > { %4450 = vmatpush3.bf16.msra.mxu1 %v4856_v45  ;;  %4453 = vmatprep.mubr.bf16.mxu1 %v4862_v59  ;;  %v5807_v45 = vld [vmem:[#allocation2 + $0x44] sm:$0x1]  ;;  %v5810_v59 = vrot.slane %v2890_v38, 5  ;;  %v2821_v29 = vsel %vm5005_vm3, %v2816_v48, %v5771_v25  ;;  %v2855_v25 = vsel %vm5005_vm3, %v2850_v16, %v2854_v26  ;;  %v2932_v10 = vshll.u32 %v2799_v57, 16 }
  0xd1   : > { %4568 = vmatpush3.bf16.msra.mxu0 %v4843_v2  ;;  %4451 = vmatprep.subr.bf16.mxu1 %v4860_v51  ;;  %v2839_v24 = vor.u32 %v2838_v1, %v2835_v35  ;;  %v2876_v2 = vshll.u32 %v5787_v33, 16  ;;  %v2900_v5 = vshll.u32 %v5807_v45, 16  ;;  %v4870_v35 = vld [vmem:[#allocation2 + $0x3c] sm:$0xff]   ;;  %v2907_v1 = vrot.slane %v2905_v47, 4  ;;  %v3214_v47 = vld [vmem:[#allocation2 + $0x48] sm:$0xe] }
  0xd2   : > { %4569 = vmatprep.subr.bf16.mxu0 %v4846_v13  ;;  %v2897_v50 = vor.u32 %v2896_v19, %v5810_v59  ;;  %v2831_v31 = vsel %vm5005_vm3, %v2826_v17, %v5805_v37  ;;  %v2869_v7 = vsel %vm5005_vm3, %v2864_v43, %v5784_v14  ;;  %v5858_v14 = vld [vmem:[#allocation2 + $0x58] sm:$0xf]  ;;  %v5873_v19 = vld [vmem:[%s6108_s3 + $0x220] sm:$0xff]   ;;  %v5895_v43 = vld [vmem:[%s6108_s3 + $0x228] sm:$0xff]   ;;  %v3275_v58 = vrot.slane %v5853_v8, 5 }
  0xd3   : > { %v2840_v41 = vrot.slane %v2839_v24, 4  ;;  %v2878_v32 = vrot.slane %v2876_v2, 5  ;;  %v2902_v38 = vrot.slane %v2900_v5, 5  ;;  %v4859_v24 = vld [vmem:[#allocation2 + $0x6c] sm:$0xff]   ;;  %v2911_v21 = vor.u32 %v2910_v54, %v2907_v1  ;;  %v2802_v17 = vld [vmem:[#allocation2 + $0x60] sm:$0xf] }
  0xd4   : > { %4554 = vmatmul.mubr.bf16.gmra.mrb[4].mxu0 %v4847_v9  ;;  %4452 = vmatpush3.bf16.msra.mxu1 %v4860_v51  ;;  %v4857_v51 = vld [vmem:[#allocation2 + $0x60] sm:$0xff]   ;;  %v5821_v9 = vld [vmem:[%s6108_s3 + $0x210] sm:$0xff]   ;;  %v2898_v0 = vrot.slane %v2897_v50, 4  ;;  %v4003_v23 = vcombine.low %v2821_v29, %v2831_v31  ;;  %v3272_v2 = vrot.slane %v5812_v36, 5  ;;  %v2921_v36 = vor.u32 %v2920_v20, %v5855_v46 }
  0xd5   : > { %4570 = vmatpush3.bf16.msra.mxu0 %v4846_v13  ;;  %4557 = vmatprep.mubr.bf16.mxu0 %v4851_v6  ;;  %v4855_v13 = vld [vmem:[%s6108_s3 + $0x1e8] sm:$0xff]   ;;  %v4867_v6 = vld [vmem:[#allocation2 + $0x30] sm:$0xff]   ;;  %v2845_v28 = vsel %vm5005_vm3, %v2840_v41, %v5778_v3  ;;  %v2879_v3 = vsel %vm5005_vm3, %v2874_v52, %v2878_v32  ;;  %v2942_v48 = vshrl.u32 %v5858_v14, 16  ;;  %v5881_v41 = vld [vmem:[#allocation2 + $0x64] sm:$0xf]  ;;  %v2953_v11 = vshrl.u32 %v2802_v17, 16 }
  0xd6   : > { %4571 = vmatprep.subr.bf16.mxu0 %v4849_v53  ;;  %4629 = vmatprep.subr.bf16.mxu1 %v5776_v44  ;;  %v5867_v37 = vcombine.low %v2869_v7, %v2879_v3  ;;  %v2903_v26 = vsel %vm5005_vm3, %v2898_v0, %v2902_v38  ;;  %v4874_v52 = vld [vmem:[#allocation2 + $0x54] sm:$0xff]   ;;  %v5897_v32 = vld [vmem:[#allocation2 + $0x5c] sm:$0x1]  ;;  %v3274_v5 = vrot.slane %v3272_v2, 4  ;;  %v2956_v50 = vshll.u32 %v2802_v17, 16 }
  0xd7   : > { %4454 = vmatmul.mubr.bf16.vlgmr.msra.gmra.mrb[0].mxu1 %v4863_v63  ;;  %v5840_v63 = vld [vmem:[%s6108_s3 + $0x218] sm:$0xff]   ;;  %v2966_v1 = vshrl.u32 %v5881_v41, 16  ;;  %v2922_v54 = vrot.slane %v2921_v36, 4  ;;  %v2948_v7 = vshll.u32 %v5897_v32, 16  ;;  %v5919_v3 = vld [vmem:[%s6108_s3 + $0x230] sm:$0xff]   ;;  %v3286_v0 = vrot.slane %v5881_v41, 5 }
  0xd8   : > { %4637 = vmatpush3.bf16.msra.mxu1 %v5776_v44  ;;  %4457 = vmatprep.mubr.bf16.mxu1 %v4866_v12  ;;  %v3276_v20 = vsel %vm5407_vm14, %v3274_v5, %v3275_v58 }
  0xd9   : > { %4572 = vmatpush3.bf16.msra.mxu0 %v4849_v53  ;;  %4630 = vmatprep.subr.bf16.mxu1 %v5796_v34  ;;  %v2887_v53 = vor.u32 %v2886_v60, %v2883_v27  ;;  %v4871_v27 = vld [vmem:[#allocation2 + $0x48] sm:$0xff]   ;;  %v2924_v60 = vshll.u32 %v5853_v8, 16  ;;  %v5924_v8 = vld [vmem:[#allocation2 + $0x70] sm:$0xf] }
  0xda   : > { %4573 = vmatprep.subr.bf16.mxu0 %v4852_v40 }
  0xdb   : > { %v2888_v12 = vrot.slane %v2887_v53, 4  ;;  %v4023_v53 = vrot.slane %v3214_v47, 9  ;;  %v2926_v29 = vrot.slane %v2924_v60, 5  ;;  %v4875_v47 = vld [vmem:[#allocation2 + $0x60] sm:$0xff]  }
  0xdc   : > { %4558 = vmatmul.mubr.bf16.gmra.mrb[8].mxu0 %v4853_v15  ;;  %4638 = vmatpush3.bf16.msra.mxu1 %v5796_v34  ;;  %v5865_v15 = vcombine.low %v2845_v28, %v2855_v25  ;;  %v2944_v28 = vrot.slane %v2942_v48, 4  ;;  %v2986_v48 = vshll.u32 %v5924_v8, 16 }
  0xdd   : > { %4574 = vmatpush3.bf16.msra.mxu0 %v4852_v40  ;;  %4561 = vmatprep.mubr.bf16.mxu0 %v4857_v51  ;;  %v2929_v40 = vshrl.u32 %v2799_v57, 16  ;;  %v2893_v56 = vsel %vm5005_vm3, %v2888_v12, %v5810_v59  ;;  %v2938_v51 = vshll.u32 %v5858_v14, 16  ;;  %v5890_v59 = vrot.slane %v2932_v10, 5  ;;  %v2805_v12 = vld [vmem:[#allocation2 + $0x6c] sm:$0xf] }
  0xde   : > { %4575 = vmatprep.subr.bf16.mxu0 %v4855_v13  ;;  %4631 = vmatprep.subr.bf16.mxu1 %v5821_v9  ;;  %v5906_v57 = vcombine.low %v2893_v56, %v2903_v26  ;;  %v2804_v56 = vld [vmem:[#allocation2 + $0x68] sm:$0x1]  ;;  %v2977_v36 = vshrl.u32 %v2805_v12, 16  ;;  %v2990_v26 = vshrl.u32 %v5924_v8, 16 }
  0xdf   : > { %4458 = vmatmul.mubr.bf16.gmra.mrb[4].mxu1 %v4867_v6  ;;  %v5888_v16 = vrot.slane %v2929_v40, 4  ;;  %v3279_v6 = vrot.slane %v5858_v14, 5  ;;  %v5904_v31 = vrot.slane %v2938_v51, 5  ;;  %v2958_v40 = vrot.slane %v2956_v50, 5 }
  0xe0   : > { %4639 = vmatpush3.bf16.msra.mxu1 %v5821_v9  ;;  %4461 = vmatprep.mubr.bf16.mxu1 %v4870_v35  ;;  %v2962_v35 = vshll.u32 %v5881_v41, 16  ;;  %v2980_v51 = vshll.u32 %v2805_v12, 16  ;;  %v2972_v5 = vshll.u32 %v2804_v56, 16 }
  0xe1   : > { %4576 = vmatpush3.bf16.msra.mxu0 %v4855_v13  ;;  %4632 = vmatprep.subr.bf16.mxu1 %v5840_v63  ;;  %v5886_v13 = vrot.slane %v2911_v21, 4  ;;  %v2935_v25 = vor.u32 %v5890_v59, %v5888_v16  ;;  %v3281_v38 = vrot.slane %v3279_v6, 4  ;;  %v2955_v21 = vrot.slane %v2953_v11, 4 }
  0xe2   : > { %4577 = vmatprep.subr.bf16.mxu0 %v4858_v61  ;;  %v5932_v10 = vrot.slane %v2962_v35, 5  ;;  %v2945_v60 = vor.u32 %v2944_v28, %v5904_v31  ;;  %v3289_v59 = vrot.slane %v2804_v56, 5  ;;  %v2979_v11 = vrot.slane %v2977_v36, 4 }
  0xe3   : > { %v2982_v50 = vrot.slane %v2980_v51, 5  ;;  %v2992_v28 = vrot.slane %v2990_v26, 4  ;;  %v2974_v12 = vrot.slane %v2972_v5, 5 }
  0xe4   : > { %4562 = vmatmul.mubr.bf16.gmra.mrb[12].mxu0 %v4859_v24  ;;  %4640 = vmatpush3.bf16.msra.mxu1 %v5840_v63  ;;  %v3215_v24 = vld [vmem:[#allocation2 + $0x54] sm:$0xe]  ;;  %v2946_v58 = vrot.slane %v2945_v60, 4  ;;  %v3210_v60 = vld [vmem:[#allocation2 + $0x18] sm:$0xe] }
  0xe5   : > { %4578 = vmatpush3.bf16.msra.mxu0 %v4858_v61  ;;  %4581 = vmatprep.mubr.bf16.mxu0 %v4003_v23  ;;  %v2917_v61 = vsel %vm5005_vm3, %v5886_v13, %v5855_v46  ;;  %v3273_v46 = vsel %vm5407_vm14, %v4023_v53, %v3272_v2  ;;  %v3216_v23 = vld [vmem:[#allocation2 + $0x60] sm:$0xe]  ;;  %v3282_v2 = vrot.slane %v5897_v32, 5  ;;  %v4024_v41 = vrot.slane %v3215_v24, 9  ;;  %v5947_v13 = vld [vmem:[%s6108_s3 + $0x238] sm:$0xff]  }
  0xe6   : > { %4579 = vmatprep.subr.bf16.mxu0 %v4861_v39  ;;  %4633 = vmatprep.subr.bf16.mxu1 %v5873_v19  ;;  %v4047_v17 = vcombine.low %v3273_v46, %v3276_v20  ;;  %v4025_v16 = vrot.slane %v3216_v23, 9  ;;  %v2959_v32 = vor.u32 %v2958_v40, %v2955_v21  ;;  %v2983_v40 = vor.u32 %v2982_v50, %v2979_v11  ;;  %v3213_v50 = vld [vmem:[#allocation2 + $0x3c] sm:$0xe] }
  0xe7   : > { %4462 = vmatmul.mubr.bf16.gmra.mrb[8].mxu1 %v4871_v27  ;;  %v2927_v27 = vsel %vm5005_vm3, %v2922_v54, %v2926_v29  ;;  %v3280_v35 = vsel %vm5407_vm14, %v4024_v41, %v3279_v6  ;;  %v3293_v54 = vrot.slane %v5924_v8, 5  ;;  %v2988_v29 = vrot.slane %v2986_v48, 5 }
  0xe8   : > { %4641 = vmatpush3.bf16.msra.mxu1 %v5873_v19  ;;  %4465 = vmatprep.mubr.bf16.mxu1 %v4874_v52  ;;  %v2950_v52 = vrot.slane %v2948_v7, 5  ;;  %v2960_v6 = vrot.slane %v2959_v32, 4  ;;  %v2984_v36 = vrot.slane %v2983_v40, 4  ;;  %v4019_v48 = vrot.slane %v3210_v60, 9 }
  0xe9   : > { %4580 = vmatpush3.bf16.msra.mxu0 %v4861_v39  ;;  %4634 = vmatprep.subr.bf16.mxu1 %v5895_v43  ;;  %v2968_v39 = vrot.slane %v2966_v1, 4  ;;  %v3283_v1 = vsel %vm5407_vm14, %v3281_v38, %v3282_v2  ;;  %v2807_v38 = vld [vmem:[#allocation2 + $0x74] sm:$0x1]  ;;  %v3295_v24 = vrot.slane %v3293_v54, 4  ;;  %v3265_v11 = vrot.slane %v5780_v22, 5 }
  0xea   : > { %4597 = vmatprep.subr.bf16.mxu0 %v5776_v44  ;;  %v4048_v8 = vcombine.low %v3280_v35, %v3283_v1  ;;  %v2951_v21 = vsel %vm5005_vm3, %v2946_v58, %v2950_v52  ;;  %v2996_v23 = vshll.u32 %v2807_v38, 16  ;;  %v2989_v26 = vsel %vm5005_vm3, %v2984_v36, %v2988_v29  ;;  %v3212_v52 = vld [vmem:[#allocation2 + $0x30] sm:$0xe] }
  0xeb   : > { %v2969_v53 = vor.u32 %v2968_v39, %v5932_v10  ;;  %v2993_v39 = vor.u32 %v2992_v28, %v2988_v29  ;;  %v3261_v58 = vrot.slane %v5787_v33, 5  ;;  %v4022_v1 = vrot.slane %v3213_v50, 9 }
  0xec   : > { %4582 = vmatmul.mubr.bf16.vlgmr.msra.gmra.mrb[0].mxu0 %v5865_v15  ;;  %4642 = vmatpush3.bf16.msra.mxu1 %v5895_v43  ;;  %v3288_v15 = vrot.slane %v3286_v0, 4  ;;  %v2998_v51 = vrot.slane %v2996_v23, 5  ;;  %v3268_v29 = vrot.slane %v5807_v45, 5 }
  0xed   : > { %4598 = vmatpush3.bf16.msra.mxu0 %v5776_v44  ;;  %4585 = vmatprep.mubr.bf16.mxu0 %v5867_v37  ;;  %v4007_v44 = vcombine.low %v2917_v61, %v2927_v27  ;;  %v2936_v37 = vrot.slane %v2935_v25, 4  ;;  %v3287_v61 = vsel %vm5407_vm14, %v4025_v16, %v3286_v0  ;;  %v3217_v25 = vld [vmem:[#allocation2 + $0x6c] sm:$0xe]  ;;  %v2970_v7 = vrot.slane %v2969_v53, 4 }
  0xee   : > { %4599 = vmatprep.subr.bf16.mxu0 %v5796_v34  ;;  %4635 = vmatprep.subr.bf16.mxu1 %v5919_v3  ;;  %v3290_v14 = vsel %vm5407_vm14, %v3288_v15, %v3289_v59  ;;  %v4026_v20 = vrot.slane %v3217_v25, 9  ;;  %v3296_v0 = vrot.slane %v2807_v38, 5  ;;  %v3244_v27 = vrot.slane %v5742_v55, 5  ;;  %v3211_v59 = vld [vmem:[#allocation2 + $0x24] sm:$0xe] }
  0xef   : > { %4466 = vmatmul.mubr.bf16.gmra.mrb[12].mxu1 %v4875_v47  ;;  %v4049_v46 = vcombine.low %v3287_v61, %v3290_v14  ;;  %v3251_v16 = vrot.slane %v5747_v49, 5  ;;  %v4020_v53 = vrot.slane %v3211_v59, 9  ;;  %v3254_v49 = vrot.slane %v5782_v42, 5 }
  0xf0   : > { %4643 = vmatpush3.bf16.msra.mxu1 %v5919_v3  ;;  %4621 = vmatprep.mubr.bf16.mxu1 %v4047_v17  ;;  %v3294_v2 = vsel %vm5407_vm14, %v4026_v20, %v3293_v54  ;;  %v3297_v47 = vsel %vm5407_vm14, %v3295_v24, %v3296_v0  ;;  %v3246_v55 = vrot.slane %v3244_v27, 4  ;;  %v3247_v17 = vrot.slane %v5766_v62, 5 }
  0xf1   : > { %4600 = vmatpush3.bf16.msra.mxu0 %v5796_v34  ;;  %4636 = vmatprep.subr.bf16.mxu1 %v5947_v13  ;;  %v2941_v34 = vsel %vm5005_vm3, %v2936_v37, %v5904_v31  ;;  %v2965_v31 = vsel %vm5005_vm3, %v2960_v6, %v5932_v10  ;;  %v2994_v10 = vrot.slane %v2993_v39, 4  ;;  %v4050_v41 = vcombine.low %v3294_v2, %v3297_v47 }
  0xf2   : > { %4601 = vmatprep.subr.bf16.mxu0 %v5821_v9  ;;  %v3245_v15 = vsel %vm5407_vm14, %v4019_v48, %v3244_v27  ;;  %v3248_v62 = vsel %vm5407_vm14, %v3246_v55, %v3247_v17  ;;  %v3253_v5 = vrot.slane %v3251_v16, 4  ;;  %v3267_v54 = vrot.slane %v3265_v11, 4 }
  0xf3   : > { %v4043_v30 = vcombine.low %v3245_v15, %v3248_v62  ;;  %v3266_v22 = vsel %vm5407_vm14, %v4022_v1, %v3265_v11 }
  0xf4   : > { %4586 = vmatmul.mubr.bf16.gmra.mrb[4].mxu0 %v5906_v57  ;;  %4644 = vmatpush3.bf16.msra.mxu1 %v5947_v13  ;;  %v2975_v57 = vsel %vm5005_vm3, %v2970_v7, %v2974_v12  ;;  %v3269_v28 = vsel %vm5407_vm14, %v3267_v54, %v3268_v29 }
  0xf5   : > { %4602 = vmatpush3.bf16.msra.mxu0 %v5821_v9  ;;  %4589 = vmatprep.mubr.bf16.mxu0 %v4007_v44  ;;  %v4008_v9 = vcombine.low %v2941_v34, %v2951_v21  ;;  %v4009_v56 = vcombine.low %v2965_v31, %v2975_v57  ;;  %v4021_v44 = vrot.slane %v3212_v52, 9  ;;  %v4046_v61 = vcombine.low %v3266_v22, %v3269_v28 }
  0xf6   : > { %4603 = vmatprep.subr.bf16.mxu0 %v5840_v63 }
  0xf7   : > { %4622 = vmatmul.mubr.bf16.vlgmr.msra.gmra.mrb[16].mxu1 %v4048_v8 }
  0xf8   : > { %4625 = vmatprep.mubr.bf16.mxu1 %v4049_v46 }
  0xf9   : > { %4604 = vmatpush3.bf16.msra.mxu0 %v5840_v63  ;;  %v2999_v63 = vsel %vm5005_vm3, %v2994_v10, %v2998_v51 }
  0xfa   : > { %4605 = vmatprep.subr.bf16.mxu0 %v5873_v19  ;;  %v4010_v32 = vcombine.low %v2989_v26, %v2999_v63 }
  0xfc   : > { %4590 = vmatmul.mubr.bf16.gmra.mrb[8].mxu0 %v4008_v9 }
  0xfd   : > { %4606 = vmatpush3.bf16.msra.mxu0 %v5873_v19  ;;  %4593 = vmatprep.mubr.bf16.mxu0 %v4009_v56  ;;  %v3258_v19 = vrot.slane %v5749_v4, 5  ;;  %v3252_v4 = vsel %vm5407_vm14, %v4020_v53, %v3251_v16 }
  0xfe   : > { %4607 = vmatprep.subr.bf16.mxu0 %v5895_v43 }
  0xff   : > { %4626 = vmatmul.mubr.bf16.gmra.mrb[20].mxu1 %v4050_v41  ;;  %v3260_v37 = vrot.slane %v3258_v19, 4  ;;  %v3259_v42 = vsel %vm5407_vm14, %v4021_v44, %v3258_v19 }
 0x101   : > { %4608 = vmatpush3.bf16.msra.mxu0 %v5895_v43  ;;  %v3255_v43 = vsel %vm5407_vm14, %v3253_v5, %v3254_v49  ;;  %v3262_v33 = vsel %vm5407_vm14, %v3260_v37, %v3261_v58 }
 0x102   : > { %4609 = vmatprep.subr.bf16.mxu0 %v5919_v3  ;;  %v4044_v35 = vcombine.low %v3252_v4, %v3255_v43 }
 0x104   : > { %4594 = vmatmul.mubr.bf16.gmra.mrb[12].mxu0 %v4010_v32 }
 0x105   : > { %4610 = vmatpush3.bf16.msra.mxu0 %v5919_v3  ;;  %4613 = vmatprep.mubr.bf16.mxu0 %v4043_v30  ;;  %v4045_v3 = vcombine.low %v3259_v42, %v3262_v33 }
 0x106   : > { %4611 = vmatprep.subr.bf16.mxu0 %v5947_v13 }
 0x109   : > { %4612 = vmatpush3.bf16.msra.mxu0 %v5947_v13 }
 0x10c   : > { %4614 = vmatmul.mubr.bf16.vlgmr.msra.gmra.mrb[0].mxu0 %v4044_v35 }
 0x10d   : > { %4617 = vmatprep.mubr.bf16.mxu0 %v4045_v3 }
 0x114   : > { %4618 = vmatmul.mubr.bf16.gmra.mrb[4].mxu0 %v4046_v61 }
 0x1aa   : > { %v4455_v14 = vpop.f32.mrb[0].mxu1 }
 0x1ab   : > { %v1738_v25 = vpop.f32.mrb[1].mxu1 }
 0x1ac   : > { %v4456_v6 = vpop.f32.mrb[2].mxu1 }
 0x1ad   : > { %v1741_v7 = vpop.f32.mrb[3].mxu1 }
 0x1b2   : > { %v6022_v13 = vpop.f32.mrb[4].mxu1 }
 0x1b3   : > { %v6024_v12 = vpop.f32.mrb[5].mxu1 }
 0x1b4   : > { %v6026_v38 = vpop.f32.mrb[6].mxu1 }
 0x1b5   : > { %v6028_v45 = vpop.f32.mrb[7].mxu1 }
 0x1ba   : > { %v4463_v34 = vpop.f32.mrb[8].mxu1 }
 0x1bb   : > { %v1770_v8 = vpop.f32.mrb[9].mxu1 }
 0x1bc   : > { %v4464_v46 = vpop.f32.mrb[10].mxu1 }
 0x1bd   : > { %v1773_v20 = vpop.f32.mrb[11].mxu1 }
 0x1c2   : > { %v4467_v18 = vpop.f32.mrb[12].mxu1 }
 0x1c3   : > { %v1786_v24 = vpop.f32.mrb[13].mxu1 }
 0x1c4   : > { %v4468_v0 = vpop.f32.mrb[14].mxu1 }
 0x1c5   : > { %v1789_v21 = vpop.f32.mrb[15].mxu1 }
 0x1ca   : > { %v4623_v40 = vpop.f32.mrb[16].mxu1 }
 0x1cb   : > { %v3461_v39 = vpop.f32.mrb[17].mxu1 }
 0x1cc   : > { %v4624_v23 = vpop.f32.mrb[18].mxu1 }
 0x1cd   : > { %v3464_v31 = vpop.f32.mrb[19].mxu1 }
 0x1cf   : > { %v4591_v57 = vpop.f32.mrb[8].mxu0 }
 0x1d0   : > { %v4653_v27 = vadd.f32 %v4591_v57, %v4463_v34  ;;  %v3163_v60 = vpop.f32.mrb[9].mxu0 }
 0x1d1   : > { %v4655_v9 = vadd.f32 %v3163_v60, %v1770_v8  ;;  %v4592_v2 = vpop.f32.mrb[10].mxu0 }
 0x1d2   : > { %v4657_v47 = vadd.f32 %v4592_v2, %v4464_v46  ;;  %v3166_v56 = vpop.f32.mrb[11].mxu0  ;;  %v6030_v36 = vadd.f32 %v4653_v27, %v4623_v40  ;;  %v4627_v10 = vpop.f32.mrb[20].mxu1 }
 0x1d3   : > { %v4659_v51 = vadd.f32 %v3166_v56, %v1773_v20  ;;  %v6032_v48 = vadd.f32 %v4655_v9, %v3461_v39  ;;  %v3477_v55 = vpop.f32.mrb[21].mxu1 }
 0x1d4   : > { %v6034_v17 = vadd.f32 %v4657_v47, %v4624_v23  ;;  %v4628_v41 = vpop.f32.mrb[22].mxu1 }
 0x1d5   : > { %v6043_v26 = vadd.f32 %v4659_v51, %v3464_v31  ;;  %v3480_v63 = vpop.f32.mrb[23].mxu1 }
 0x1d6   : > { %v4171_v16 = vpack.c.bf16 %v6034_v17, %v6030_v36 }
 0x1d7   : > { %v4595_v15 = vpop.f32.mrb[12].mxu0  ;;  %v4166_v62 = vpack.c.bf16 %v6043_v26, %v6032_v48 }
 0x1d8   : > { %v4661_v59 = vadd.f32 %v4595_v15, %v4467_v18  ;;  %v3179_v19 = vpop.f32.mrb[13].mxu0  ;;  %4194 = vst [vmem:[%s6041_s25 + $0x28] sm:$0xff] %v4171_v16  }
 0x1d9   : > { %v4663_v52 = vadd.f32 %v3179_v19, %v1786_v24  ;;  %v4596_v32 = vpop.f32.mrb[14].mxu0  ;;  %4193 = vst [vmem:[%s6041_s25 + $0x20] sm:$0xff] %v4166_v62  }
 0x1da   : > { %v4665_v30 = vadd.f32 %v4596_v32, %v4468_v0  ;;  %v3182_v53 = vpop.f32.mrb[15].mxu0  ;;  %v6051_v5 = vadd.f32 %v4661_v59, %v4627_v10  ;;  %v3539_v59 = vmul.f32 %v6030_v36, %v6030_v36  ;;  %v3540_v32 = vmul.f32 %v6034_v17, %v6034_v17 }
 0x1db   : > { %v4667_v49 = vadd.f32 %v3182_v53, %v1789_v21  ;;  %v6053_v44 = vadd.f32 %v4663_v52, %v3477_v55 }
 0x1dc   : > { %v6055_v37 = vadd.f32 %v4665_v30, %v4628_v41 }
 0x1dd   : > { %v6057_v58 = vadd.f32 %v4667_v49, %v3480_v63 }
 0x1de   : > { %v4181_v4 = vpack.c.bf16 %v6055_v37, %v6051_v5 }
 0x1df   : > { %v4615_v43 = vpop.f32.mrb[0].mxu0  ;;  %v4176_v11 = vpack.c.bf16 %v6057_v58, %v6053_v44 }
 0x1e0   : > { %v4645_v42 = vadd.f32 %v4615_v43, %v4455_v14  ;;  %v3429_v33 = vpop.f32.mrb[1].mxu0  ;;  %4196 = vst [vmem:[%s6041_s25 + $0x38] sm:$0xff] %v4181_v4  }
 0x1e1   : > { %v4646_v50 = vadd.f32 %v3429_v33, %v1738_v25  ;;  %v4616_v35 = vpop.f32.mrb[2].mxu0  ;;  %4195 = vst [vmem:[%s6041_s25 + $0x30] sm:$0xff] %v4176_v11   ;;  %v3544_v33 = vmul.f32 %v6055_v37, %v6055_v37 }
 0x1e2   : > { %v4647_v3 = vadd.f32 %v4616_v35, %v4456_v6  ;;  %v3432_v1 = vpop.f32.mrb[3].mxu0  ;;  %v3531_v8 = vmul.f32 %v4645_v42, %v4645_v42 }
 0x1e3   : > { %v4648_v54 = vadd.f32 %v3432_v1, %v1741_v7  ;;  %v3529_v22 = vmul.f32 %v4646_v50, %v4646_v50 }
 0x1e4   : > { %v4151_v29 = vpack.c.bf16 %v4647_v3, %v4645_v42  ;;  %v3532_v25 = vmul.f32 %v4647_v3, %v4647_v3 }
 0x1e5   : > { %v3508_v28 = vadd.f32 %v4648_v54, %v4646_v50  ;;  %v3530_v61 = vmul.f32 %v4648_v54, %v4648_v54  ;;  %v4146_v34 = vpack.c.bf16 %v4648_v54, %v4646_v50 }
 0x1e6   : > { %4190 = vst [vmem:[%s6041_s25 + $0x8] sm:$0xff] %v4151_v29  }
 0x1e7   : > { %v3509_v46 = vadd.f32 %v4645_v42, %v3508_v28  ;;  %v3545_v20 = vadd.f32 %v3530_v61, %v3529_v22  ;;  %4147 = vst [vmem:[%s6041_s25] sm:$0xff] %v4146_v34   ;;  %v4619_v14 = vpop.f32.mrb[4].mxu0 }
 0x1e8   : > { %v4649_v18 = vadd.f32 %v4619_v14, %v6022_v13  ;;  %v3445_v24 = vpop.f32.mrb[5].mxu0 }
 0x1e9   : > { %v3546_v0 = vadd.f32 %v3545_v20, %v3531_v8  ;;  %v4650_v6 = vadd.f32 %v3445_v24, %v6024_v12  ;;  %v3510_v7 = vadd.f32 %v4647_v3, %v3509_v46  ;;  %v4620_v21 = vpop.f32.mrb[6].mxu0 }
 0x1ea   : > { %v4651_v40 = vadd.f32 %v4620_v21, %v6026_v38  ;;  %v3448_v39 = vpop.f32.mrb[7].mxu0  ;;  %v3535_v56 = vmul.f32 %v4649_v18, %v4649_v18  ;;  %v3537_v38 = vmul.f32 %v6032_v48, %v6032_v48 }
 0x1eb   : > { %v3511_v23 = vadd.f32 %v4650_v6, %v3510_v7  ;;  %v3533_v31 = vmul.f32 %v4650_v6, %v4650_v6  ;;  %v3547_v57 = vadd.f32 %v3546_v0, %v3532_v25  ;;  %v4652_v27 = vadd.f32 %v3448_v39, %v6028_v45 }
 0x1ec   : > { %v4161_v60 = vpack.c.bf16 %v4651_v40, %v4649_v18  ;;  %v3536_v51 = vmul.f32 %v4651_v40, %v4651_v40  ;;  %v3538_v45 = vmul.f32 %v6043_v26, %v6043_v26 }
 0x1ed   : > { %v3548_v9 = vadd.f32 %v3547_v57, %v3533_v31  ;;  %v3512_v13 = vadd.f32 %v4652_v27, %v3511_v23  ;;  %v3534_v2 = vmul.f32 %v4652_v27, %v4652_v27  ;;  %v4156_v47 = vpack.c.bf16 %v4652_v27, %v4650_v6 }
 0x1ee   : > { %4192 = vst [vmem:[%s6041_s25 + $0x18] sm:$0xff] %v4161_v60  }
 0x1ef   : > { %v3513_v10 = vadd.f32 %v4649_v18, %v3512_v13  ;;  %v3549_v12 = vadd.f32 %v3548_v9, %v3534_v2  ;;  %4191 = vst [vmem:[%s6041_s25 + $0x10] sm:$0xff] %v4156_v47  }
 0x1f1   : > { %v3514_v55 = vadd.f32 %v4651_v40, %v3513_v10  ;;  %v3550_v41 = vadd.f32 %v3549_v12, %v3535_v56 }
 0x1f3   : > { %v3515_v63 = vadd.f32 %v6032_v48, %v3514_v55  ;;  %v3551_v16 = vadd.f32 %v3550_v41, %v3536_v51  ;;  %v3541_v48 = vmul.f32 %v6053_v44, %v6053_v44 }
 0x1f5   : > { %v3516_v15 = vadd.f32 %v6043_v26, %v3515_v63  ;;  %v3552_v62 = vadd.f32 %v3551_v16, %v3537_v38  ;;  %v3542_v26 = vmul.f32 %v6057_v58, %v6057_v58 }
 0x1f7   : > { %v3517_v19 = vadd.f32 %v6030_v36, %v3516_v15  ;;  %v3553_v52 = vadd.f32 %v3552_v62, %v3538_v45  ;;  %v3543_v36 = vmul.f32 %v6051_v5, %v6051_v5 }
 0x1f9   : > { %v3518_v30 = vadd.f32 %v6034_v17, %v3517_v19  ;;  %v3554_v53 = vadd.f32 %v3553_v52, %v3539_v59 }
 0x1fb   : > { %v3519_v49 = vadd.f32 %v6053_v44, %v3518_v30  ;;  %v3555_v4 = vadd.f32 %v3554_v53, %v3540_v32 }
 0x1fd   : > { %v3520_v43 = vadd.f32 %v6057_v58, %v3519_v49  ;;  %v3556_v11 = vadd.f32 %v3555_v4, %v3541_v48 }
 0x1ff   : > { %v3521_v42 = vadd.f32 %v6051_v5, %v3520_v43  ;;  %v3557_v17 = vadd.f32 %v3556_v11, %v3542_v26 }
 0x201   : > { %v3522_v50 = vadd.f32 %v6055_v37, %v3521_v42  ;;  %v3558_v44 = vadd.f32 %v3557_v17, %v3543_v36 }
 0x203   : > { %v3523_v35 = vrot.slane %v3522_v50, 4  ;;  %v3559_v3 = vadd.f32 %v3558_v44, %v3544_v33 }
 0x205   : > { %v3524_v1 = vadd.f32 %v3523_v35, %v3522_v50  ;;  %v3560_v54 = vrot.slane %v3559_v3, 4 }
 0x207   : > { %v3525_v29 = vrot.slane %v3524_v1, 2  ;;  %v3561_v58 = vadd.f32 %v3560_v54, %v3559_v3 }
 0x209   : > { %v3526_v22 = vadd.f32 %v3525_v29, %v3524_v1  ;;  %v3562_v28 = vrot.slane %v3561_v58, 2 }
 0x20b   : > { %v3527_v61 = vrot.slane %v3526_v22, 1  ;;  %v3563_v34 = vadd.f32 %v3562_v28, %v3561_v58 }
 0x20d   : > { %v3564_v8 = vrot.slane %v3563_v34, 1  ;;  %v3528_v5 = vadd.f32 %v3527_v61, %v3526_v22 }
 0x20f   : > { %v3565_v46 = vadd.f32 %v3564_v8, %v3563_v34 }
 0x211   : > { %v3567_v37 = vsel %vm347_vm2, %v3528_v5, %v3565_v46 }
 0x212   : > { %3568 = vst [vmem:[%s235_s27] sm:$0x3] %v3567_v37 }
 0x213 PF: > { %s16_s18 = sadd.s32 1, %s4899_s18  }
 0x214   : > { %p13_p4 = scmp.ge.s32.totalorder %s16_s18, 4  }
 0x216   :  { %15 = sbr.rel (!%p13_p4) target bundleno = 1 (0x1), region = 89 }

</bundles_post_ra>
